<compile_context>
chip_gen: v7x
topology: tpu7x:2x2x1
jax: 0.10.0
libtpu: 0.0.40
codegen_flags: <defaults>
</compile_context>

<pallas_src>
import functools

import jax
import jax.numpy as jnp
from jax import lax
from jax.experimental import pallas as pl
from jax.experimental.pallas import tpu as pltpu


def _spatial_attention_kernel(w_sm, hpos_ref, wpos_ref, x_ref, out_ref,
                              sum_ref, max_ref, *,
                              num_channels, c_tile, chunk, height, width,
                              mask_tail):
    # w_sm:      (99,) f32 SMEM  -- conv weights [c*49 + i*7 + j], bias at [98]
    # hpos_ref:  (1, H*W) int32  -- row index of each flat position (resident)
    # wpos_ref:  (1, H*W) int32  -- col index of each flat position (resident)
    # x_ref:     (c_tile, H*W)   -- channel block of the current batch element
    # out_ref:   (1, H*W)        -- sigmoid(conv(...)) for the current batch element
    # sum_ref / max_ref: (1, H*W) f32 running channel-sum / channel-max accumulators
    c_idx = pl.program_id(1)
    n_c = pl.num_programs(1)
    hw = height * width

    @pl.when(c_idx == 0)
    def _init():
        sum_ref[...] = jnp.zeros_like(sum_ref)
        max_ref[...] = jnp.full_like(max_ref, -jnp.inf)

    def _accumulate(start, blk):
        blk = blk.astype(jnp.float32)                       # (chunk, H*W)
        if mask_tail:
            # Last grid block may run past C: mask padded channels
            # (0 for the sum, -inf for the max).
            rows = lax.broadcasted_iota(jnp.int32, (blk.shape[0], 1), 0)
            ok = (c_idx * c_tile + start + rows) < num_channels
            blk_s = jnp.where(ok, blk, 0.0)
            blk_m = jnp.where(ok, blk, -jnp.inf)
        else:
            blk_s = blk
            blk_m = blk
        sum_ref[...] = sum_ref[...] + jnp.sum(blk_s, axis=0, keepdims=True)
        max_ref[...] = jnp.maximum(max_ref[...],
                                   jnp.max(blk_m, axis=0, keepdims=True))

    if c_tile == chunk:
        _accumulate(0, x_ref[...])
    else:
        def _body(t, carry):
            s = pl.multiple_of(t * chunk, chunk)
            _accumulate(s, x_ref[pl.ds(s, chunk), :])
            return carry
        lax.fori_loop(0, c_tile // chunk, _body, 0)

    @pl.when(c_idx == n_c - 1)
    def _finalize():
        avg = sum_ref[...] * (1.0 / float(num_channels))    # (1, H*W)
        mxv = max_ref[...]                                  # (1, H*W)
        hh = hpos_ref[...]                                  # (1, H*W) int32
        ww = wpos_ref[...]

        # Per-tap width validity masks (exact zero-padding semantics), hoisted.
        wvs = [(ww >= (3 - j)) & (ww < (width + 3 - j)) for j in range(7)]

        bias = w_sm[2 * 49]
        acc = bias + jnp.zeros((1, hw), jnp.float32)
        for i in range(7):
            hv = (hh >= (3 - i)) & (hh < (height + 3 - i))
            row_shift = (i - 3) * width
            for j in range(7):
                m = hv & wvs[j]
                # Shift so rolled[k] = flat[k + (i-3)*W + (j-3)]; out-of-image
                # positions are masked to zero below.
                shift = (-(row_shift + (j - 3))) % hw
                if shift == 0:
                    a_r, m_r = avg, mxv
                else:
                    a_r = pltpu.roll(avg, shift=shift, axis=1)
                    m_r = pltpu.roll(mxv, shift=shift, axis=1)
                tap = w_sm[i * 7 + j] * a_r + w_sm[49 + i * 7 + j] * m_r
                acc = acc + jnp.where(m, tap, 0.0)

        out_ref[...] = jax.nn.sigmoid(acc).astype(out_ref.dtype)


def spatial_attention(x, conv_w, conv_b, *, c_tile=None,
                      target_tile_bytes=8 * 1024 * 1024):
    """CBAM SpatialAttentionModule forward.

    x:      (B, C, H, W)
    conv_w: (1, 2, 7, 7)  Conv2d(2, 1, 7, padding=3) weight (in-ch 0 = avg, 1 = max)
    conv_b: (1,)          Conv2d bias
    returns (B, 1, H, W) sigmoid spatial-attention map.
    """
    B, C, H, W = x.shape
    assert conv_w.shape == (1, 2, 7, 7) and conv_b.shape == (1,)
    HW = H * W
    itemsize = x.dtype.itemsize
    slice_bytes = HW * itemsize

    # Inner reduction chunk (~256 KiB, multiple of 8 rows, bounded unroll).
    chunk = max(8, min(512, ((256 * 1024) // max(1, slice_bytes)) // 8 * 8))

    # Channel block: multiple of `chunk` (hence of 8) targeting ~8 MiB, <= C.
    if c_tile is None:
        rows_cap = min(C, max(8, target_tile_bytes // max(1, slice_bytes)))
    else:
        rows_cap = min(C, max(1, int(c_tile)))
    if C <= 8:
        c_tile = C
        chunk = C
    elif rows_cap >= chunk:
        c_tile = (rows_cap // chunk) * chunk
    else:
        c_tile = max(8, (rows_cap // 8) * 8)
        chunk = c_tile
    num_ct = pl.cdiv(C, c_tile)
    mask_tail = (C % c_tile) != 0

    # Flat row/col index vectors for the zero-padding masks of the 7x7 conv.
    idx = jnp.arange(HW, dtype=jnp.int32)
    hpos = (idx // W).reshape(1, HW)
    wpos = (idx % W).reshape(1, HW)

    # Conv weights (+ bias as element 98) as a flat SMEM scalar-prefetch operand.
    w_flat = jnp.concatenate([conv_w.reshape(-1).astype(jnp.float32),
                              conv_b.reshape(-1).astype(jnp.float32)])   # (99,)

    x_flat = x.reshape(B, C, HW)   # free view of contiguous NCHW

    kernel = functools.partial(
        _spatial_attention_kernel,
        num_channels=C, c_tile=c_tile, chunk=chunk,
        height=H, width=W, mask_tail=mask_tail)

    # VMEM budget from actual buffer sizes (double-buffered x dominates); capped
    # so it also fits v7x's 64 MiB per-TC VMEM.
    x_block_bytes = c_tile * slice_bytes
    vmem_need = (2 * x_block_bytes            # x block, double buffered
                 + 2 * 2 * HW * 4             # hpos/wpos, double buffered
                 + 2 * HW * itemsize          # output block, double buffered
                 + 2 * HW * 4)                # sum/max scratch
    vmem_limit = int(min(max(vmem_need + (4 << 20), 16 << 20), 48 << 20))

    out = pl.pallas_call(
        kernel,
        out_shape=jax.ShapeDtypeStruct((B, 1, HW), x.dtype),
        grid_spec=pltpu.PrefetchScalarGridSpec(
            num_scalar_prefetch=1,
            grid=(B, num_ct),                  # batch parallel, C-reduction last
            in_specs=[
                pl.BlockSpec((1, HW), lambda b, c, w: (0, 0)),           # hpos
                pl.BlockSpec((1, HW), lambda b, c, w: (0, 0)),           # wpos
                pl.BlockSpec((None, c_tile, HW), lambda b, c, w: (b, c, 0)),
            ],
            out_specs=pl.BlockSpec((None, 1, HW), lambda b, c, w: (b, 0, 0)),
            scratch_shapes=[
                pltpu.VMEM((1, HW), jnp.float32),   # running channel sum
                pltpu.VMEM((1, HW), jnp.float32),   # running channel max
            ],
        ),
        compiler_params=pltpu.CompilerParams(
            dimension_semantics=("parallel", "arbitrary"),
            vmem_limit_bytes=vmem_limit,
        ),
    )(w_flat, hpos, wpos, x_flat)

    return out.reshape(B, 1, H, W)


def _reference(x, conv_w, conv_b):
    """Pure-JAX reference with explicit zero-pad + taps (exact f32)."""
    B, C, H, W = x.shape
    xf = x.astype(jnp.float32)
    avg = jnp.mean(xf, axis=1)
    mx = jnp.max(xf, axis=1)
    cat = jnp.stack([avg, mx], axis=1)                      # (B, 2, H, W)
    pad = jnp.pad(cat, ((0, 0), (0, 0), (3, 3), (3, 3)))
    pre = jnp.zeros((B, H, W), jnp.float32) + conv_b[0]
    for c in range(2):
        for i in range(7):
            for j in range(7):
                pre = pre + conv_w[0, c, i, j] * pad[:, c, i:i + H, j:j + W]
    return jax.nn.sigmoid(pre)[:, None, :, :]


if __name__ == "__main__":
    key = jax.random.PRNGKey(0)
    k1, k2, k3, k4, k5 = jax.random.split(key, 5)

    fan_in = 2 * 7 * 7
    conv_w = jax.random.normal(k2, (1, 2, 7, 7), dtype=jnp.float32) / jnp.sqrt(fan_in)
    conv_b = jax.random.normal(k3, (1,), dtype=jnp.float32) * 0.1

    # Config 1: single channel block per batch element.
    x1 = jax.random.normal(k1, (2, 64, 16, 16), dtype=jnp.float32)
    o1 = spatial_attention(x1, conv_w, conv_b)
    jax.block_until_ready(o1)
    assert o1.shape == (2, 1, 16, 16)
    e1 = float(jnp.max(jnp.abs(o1 - _reference(x1, conv_w, conv_b))))
    assert e1 < 1e-4, e1

    # Config 2: multiple channel blocks + masked partial tail (C=40, c_tile=16).
    x2 = jax.random.normal(k4, (2, 40, 16, 16), dtype=jnp.float32)
    o2 = spatial_attention(x2, conv_w, conv_b, c_tile=16)
    jax.block_until_ready(o2)
    e2 = float(jnp.max(jnp.abs(o2 - _reference(x2, conv_w, conv_b))))
    assert e2 < 1e-4, e2

    # Config 3: multi-chunk in-kernel reduction loop (C=512 -> 2 chunks of 256).
    x3 = jax.random.normal(k5, (1, 512, 16, 16), dtype=jnp.float32)
    o3 = spatial_attention(x3, conv_w, conv_b)
    jax.block_until_ready(o3)
    e3 = float(jnp.max(jnp.abs(o3 - _reference(x3, conv_w, conv_b))))
    assert e3 < 1e-4, e3

    print("KERNEL_OK")
</pallas_src>

<mosaic_0001>
module attributes {stable_mosaic.version = 11 : i64} {
  func.func @_spatial_attention_kernel(%arg0: i32, %arg1: i32, %arg2: memref<99xf32, #tpu.memory_space<smem>>, %arg3: memref<1x256xi32, #tpu.memory_space<vmem>>, %arg4: memref<1x256xi32, #tpu.memory_space<vmem>>, %arg5: memref<1x64x256xf32, #tpu.memory_space<vmem>>, %arg6: memref<1x1x256xf32, #tpu.memory_space<vmem>>, %arg7: memref<1x256xf32, #tpu.memory_space<vmem>>, %arg8: memref<1x256xf32, #tpu.memory_space<vmem>>) attributes {dimension_semantics = [#tpu.dimension_semantics<parallel>, #tpu.dimension_semantics<arbitrary>], iteration_bounds = array<i64: 2, 1>, scalar_prefetch = 1 : i64, scratch_operands = 2 : i64, tpu.core_type = #tpu.core_type<tc>, window_params = [{pipeline_mode = #tpu.pipeline_mode<synchronous>, transform_indices = @transform_0, window_bounds = array<i64: 1, 256>}, {pipeline_mode = #tpu.pipeline_mode<synchronous>, transform_indices = @transform_1, window_bounds = array<i64: 1, 256>}, {transform_indices = @transform_2, window_bounds = array<i64: 1, 64, 256>}, {transform_indices = @transform_3, window_bounds = array<i64: 1, 1, 256>}]} {
    %c0_i32 = arith.constant 0 : i32
    %0 = arith.cmpi eq, %arg1, %c0_i32 : i32
    %1 = arith.extui %0 : i1 to i32
    %c0_i32_0 = arith.constant 0 : i32
    %2 = arith.cmpi ne, %1, %c0_i32_0 : i32
    scf.if %2 {
      %cst_14 = arith.constant 0.000000e+00 : f32
      %18 = vector.broadcast %cst_14 : f32 to vector<1x256xf32>
      %c0_15 = arith.constant 0 : index
      %c0_16 = arith.constant 0 : index
      %19 = vector.load %arg7[%c0_15, %c0_16] : memref<1x256xf32, #tpu.memory_space<vmem>>, vector<1x256xf32>
      tpu.vector_store %arg7[%c0_15, %c0_16], %18 {strides = array<i32>} : memref<1x256xf32, #tpu.memory_space<vmem>>, vector<1x256xf32>,
      %cst_17 = arith.constant 0xFF800000 : f32
      %20 = vector.broadcast %cst_17 : f32 to vector<1x256xf32>
      %c0_18 = arith.constant 0 : index
      %c0_19 = arith.constant 0 : index
      %21 = vector.load %arg8[%c0_18, %c0_19] : memref<1x256xf32, #tpu.memory_space<vmem>>, vector<1x256xf32>
      tpu.vector_store %arg8[%c0_18, %c0_19], %20 {strides = array<i32>} : memref<1x256xf32, #tpu.memory_space<vmem>>, vector<1x256xf32>,
    } else {
    }
    %c0 = arith.constant 0 : index
    %c0_1 = arith.constant 0 : index
    %c0_2 = arith.constant 0 : index
    %3 = vector.load %arg5[%c0, %c0_1, %c0_2] : memref<1x64x256xf32, #tpu.memory_space<vmem>>, vector<1x64x256xf32>
    %4 = vector.shape_cast %3 : vector<1x64x256xf32> to vector<64x256xf32>
    %c0_3 = arith.constant 0 : index
    %c0_4 = arith.constant 0 : index
    %5 = vector.load %arg7[%c0_3, %c0_4] : memref<1x256xf32, #tpu.memory_space<vmem>>, vector<1x256xf32>
    %cst = arith.constant dense<0.000000e+00> : vector<256xf32>
    %6 = vector.multi_reduction <add>, %4, %cst [0] : vector<64x256xf32> to vector<256xf32>
    %7 = vector.shape_cast %6 : vector<256xf32> to vector<1x256xf32>
    %8 = arith.addf %5, %7 : vector<1x256xf32>
    %c0_5 = arith.constant 0 : index
    %c0_6 = arith.constant 0 : index
    %9 = vector.load %arg7[%c0_5, %c0_6] : memref<1x256xf32, #tpu.memory_space<vmem>>, vector<1x256xf32>
    tpu.vector_store %arg7[%c0_5, %c0_6], %8 {strides = array<i32>} : memref<1x256xf32, #tpu.memory_space<vmem>>, vector<1x256xf32>,
    %c0_7 = arith.constant 0 : index
    %c0_8 = arith.constant 0 : index
    %10 = vector.load %arg8[%c0_7, %c0_8] : memref<1x256xf32, #tpu.memory_space<vmem>>, vector<1x256xf32>
    %cst_9 = arith.constant dense<0xFF800000> : vector<256xf32>
    %11 = vector.multi_reduction <maximumf>, %4, %cst_9 [0] : vector<64x256xf32> to vector<256xf32>
    %12 = vector.shape_cast %11 : vector<256xf32> to vector<1x256xf32>
    %13 = arith.maximumf %10, %12 : vector<1x256xf32>
    %c0_10 = arith.constant 0 : index
    %c0_11 = arith.constant 0 : index
    %14 = vector.load %arg8[%c0_10, %c0_11] : memref<1x256xf32, #tpu.memory_space<vmem>>, vector<1x256xf32>
    tpu.vector_store %arg8[%c0_10, %c0_11], %13 {strides = array<i32>} : memref<1x256xf32, #tpu.memory_space<vmem>>, vector<1x256xf32>,
    %c0_i32_12 = arith.constant 0 : i32
    %15 = arith.cmpi eq, %arg1, %c0_i32_12 : i32
    %16 = arith.extui %15 : i1 to i32
    %c0_i32_13 = arith.constant 0 : i32
    %17 = arith.cmpi ne, %16, %c0_i32_13 : i32
    scf.if %17 {
      %c0_14 = arith.constant 0 : index
      %c0_15 = arith.constant 0 : index
      %18 = vector.load %arg7[%c0_14, %c0_15] : memref<1x256xf32, #tpu.memory_space<vmem>>, vector<1x256xf32>
      %cst_16 = arith.constant 1.562500e-02 : f32
      %19 = vector.broadcast %cst_16 : f32 to vector<1x256xf32>
      %20 = arith.mulf %18, %19 : vector<1x256xf32>
      %c0_17 = arith.constant 0 : index
      %c0_18 = arith.constant 0 : index
      %21 = vector.load %arg8[%c0_17, %c0_18] : memref<1x256xf32, #tpu.memory_space<vmem>>, vector<1x256xf32>
      %c0_19 = arith.constant 0 : index
      %c0_20 = arith.constant 0 : index
      %22 = vector.load %arg3[%c0_19, %c0_20] : memref<1x256xi32, #tpu.memory_space<vmem>>, vector<1x256xi32>
      %c0_21 = arith.constant 0 : index
      %c0_22 = arith.constant 0 : index
      %23 = vector.load %arg4[%c0_21, %c0_22] : memref<1x256xi32, #tpu.memory_space<vmem>>, vector<1x256xi32>
      %c3_i32 = arith.constant 3 : i32
      %24 = vector.broadcast %c3_i32 : i32 to vector<1x256xi32>
      %25 = arith.cmpi sge, %23, %24 : vector<1x256xi32>
      %c19_i32 = arith.constant 19 : i32
      %26 = vector.broadcast %c19_i32 : i32 to vector<1x256xi32>
      %27 = arith.cmpi slt, %23, %26 : vector<1x256xi32>
      %28 = arith.andi %25, %27 : vector<1x256xi1>
      %c2_i32 = arith.constant 2 : i32
      %29 = vector.broadcast %c2_i32 : i32 to vector<1x256xi32>
      %30 = arith.cmpi sge, %23, %29 : vector<1x256xi32>
      %c18_i32 = arith.constant 18 : i32
      %31 = vector.broadcast %c18_i32 : i32 to vector<1x256xi32>
      %32 = arith.cmpi slt, %23, %31 : vector<1x256xi32>
      %33 = arith.andi %30, %32 : vector<1x256xi1>
      %c1_i32 = arith.constant 1 : i32
      %34 = vector.broadcast %c1_i32 : i32 to vector<1x256xi32>
      %35 = arith.cmpi sge, %23, %34 : vector<1x256xi32>
      %c17_i32 = arith.constant 17 : i32
      %36 = vector.broadcast %c17_i32 : i32 to vector<1x256xi32>
      %37 = arith.cmpi slt, %23, %36 : vector<1x256xi32>
      %38 = arith.andi %35, %37 : vector<1x256xi1>
      %c0_i32_23 = arith.constant 0 : i32
      %39 = vector.broadcast %c0_i32_23 : i32 to vector<1x256xi32>
      %40 = arith.cmpi sge, %23, %39 : vector<1x256xi32>
      %c16_i32 = arith.constant 16 : i32
      %41 = vector.broadcast %c16_i32 : i32 to vector<1x256xi32>
      %42 = arith.cmpi slt, %23, %41 : vector<1x256xi32>
      %43 = arith.andi %40, %42 : vector<1x256xi1>
      %c-1_i32 = arith.constant -1 : i32
      %44 = vector.broadcast %c-1_i32 : i32 to vector<1x256xi32>
      %45 = arith.cmpi sge, %23, %44 : vector<1x256xi32>
      %c15_i32 = arith.constant 15 : i32
      %46 = vector.broadcast %c15_i32 : i32 to vector<1x256xi32>
      %47 = arith.cmpi slt, %23, %46 : vector<1x256xi32>
      %48 = arith.andi %45, %47 : vector<1x256xi1>
      %c-2_i32 = arith.constant -2 : i32
      %49 = vector.broadcast %c-2_i32 : i32 to vector<1x256xi32>
      %50 = arith.cmpi sge, %23, %49 : vector<1x256xi32>
      %c14_i32 = arith.constant 14 : i32
      %51 = vector.broadcast %c14_i32 : i32 to vector<1x256xi32>
      %52 = arith.cmpi slt, %23, %51 : vector<1x256xi32>
      %53 = arith.andi %50, %52 : vector<1x256xi1>
      %c-3_i32 = arith.constant -3 : i32
      %54 = vector.broadcast %c-3_i32 : i32 to vector<1x256xi32>
      %55 = arith.cmpi sge, %23, %54 : vector<1x256xi32>
      %c13_i32 = arith.constant 13 : i32
      %56 = vector.broadcast %c13_i32 : i32 to vector<1x256xi32>
      %57 = arith.cmpi slt, %23, %56 : vector<1x256xi32>
      %58 = arith.andi %55, %57 : vector<1x256xi1>
      %c98 = arith.constant 98 : index
      %59 = memref.load %arg2[%c98] : memref<99xf32, #tpu.memory_space<smem>>
      %cst_24 = arith.constant 0.000000e+00 : f32
      %60 = vector.broadcast %cst_24 : f32 to vector<1x256xf32>
      %61 = vector.broadcast %59 : f32 to vector<1x256xf32>
      %62 = arith.addf %61, %60 : vector<1x256xf32>
      %c3_i32_25 = arith.constant 3 : i32
      %63 = vector.broadcast %c3_i32_25 : i32 to vector<1x256xi32>
      %64 = arith.cmpi sge, %22, %63 : vector<1x256xi32>
      %c19_i32_26 = arith.constant 19 : i32
      %65 = vector.broadcast %c19_i32_26 : i32 to vector<1x256xi32>
      %66 = arith.cmpi slt, %22, %65 : vector<1x256xi32>
      %67 = arith.andi %64, %66 : vector<1x256xi1>
      %68 = arith.andi %67, %28 : vector<1x256xi1>
      %c51_i32 = arith.constant 51 : i32
      %69 = tpu.dynamic_rotate %20 by %c51_i32 dim 1 : vector<1x256xf32>, i32 -> vector<1x256xf32>
      %c51_i32_27 = arith.constant 51 : i32
      %70 = tpu.dynamic_rotate %21 by %c51_i32_27 dim 1 : vector<1x256xf32>, i32 -> vector<1x256xf32>
      %c0_28 = arith.constant 0 : index
      %71 = memref.load %arg2[%c0_28] : memref<99xf32, #tpu.memory_space<smem>>
      %72 = vector.broadcast %71 : f32 to vector<1x256xf32>
      %73 = arith.mulf %72, %69 : vector<1x256xf32>
      %c49 = arith.constant 49 : index
      %74 = memref.load %arg2[%c49] : memref<99xf32, #tpu.memory_space<smem>>
      %75 = vector.broadcast %74 : f32 to vector<1x256xf32>
      %76 = arith.mulf %75, %70 : vector<1x256xf32>
      %77 = arith.addf %73, %76 : vector<1x256xf32>
      %cst_29 = arith.constant 0.000000e+00 : f32
      %78 = vector.broadcast %cst_29 : f32 to vector<1x256xf32>
      %79 = arith.select %68, %77, %78 : vector<1x256xi1>, vector<1x256xf32>
      %80 = arith.addf %62, %79 : vector<1x256xf32>
      %81 = arith.andi %67, %33 : vector<1x256xi1>
      %c50_i32 = arith.constant 50 : i32
      %82 = tpu.dynamic_rotate %20 by %c50_i32 dim 1 : vector<1x256xf32>, i32 -> vector<1x256xf32>
      %c50_i32_30 = arith.constant 50 : i32
      %83 = tpu.dynamic_rotate %21 by %c50_i32_30 dim 1 : vector<1x256xf32>, i32 -> vector<1x256xf32>
      %c1 = arith.constant 1 : index
      %84 = memref.load %arg2[%c1] : memref<99xf32, #tpu.memory_space<smem>>
      %85 = vector.broadcast %84 : f32 to vector<1x256xf32>
      %86 = arith.mulf %85, %82 : vector<1x256xf32>
      %c50 = arith.constant 50 : index
      %87 = memref.load %arg2[%c50] : memref<99xf32, #tpu.memory_space<smem>>
      %88 = vector.broadcast %87 : f32 to vector<1x256xf32>
      %89 = arith.mulf %88, %83 : vector<1x256xf32>
      %90 = arith.addf %86, %89 : vector<1x256xf32>
      %cst_31 = arith.constant 0.000000e+00 : f32
      %91 = vector.broadcast %cst_31 : f32 to vector<1x256xf32>
      %92 = arith.select %81, %90, %91 : vector<1x256xi1>, vector<1x256xf32>
      %93 = arith.addf %80, %92 : vector<1x256xf32>
      %94 = arith.andi %67, %38 : vector<1x256xi1>
      %c49_i32 = arith.constant 49 : i32
      %95 = tpu.dynamic_rotate %20 by %c49_i32 dim 1 : vector<1x256xf32>, i32 -> vector<1x256xf32>
      %c49_i32_32 = arith.constant 49 : i32
      %96 = tpu.dynamic_rotate %21 by %c49_i32_32 dim 1 : vector<1x256xf32>, i32 -> vector<1x256xf32>
      %c2 = arith.constant 2 : index
      %97 = memref.load %arg2[%c2] : memref<99xf32, #tpu.memory_space<smem>>
      %98 = vector.broadcast %97 : f32 to vector<1x256xf32>
      %99 = arith.mulf %98, %95 : vector<1x256xf32>
      %c51 = arith.constant 51 : index
      %100 = memref.load %arg2[%c51] : memref<99xf32, #tpu.memory_space<smem>>
      %101 = vector.broadcast %100 : f32 to vector<1x256xf32>
      %102 = arith.mulf %101, %96 : vector<1x256xf32>
      %103 = arith.addf %99, %102 : vector<1x256xf32>
      %cst_33 = arith.constant 0.000000e+00 : f32
      %104 = vector.broadcast %cst_33 : f32 to vector<1x256xf32>
      %105 = arith.select %94, %103, %104 : vector<1x256xi1>, vector<1x256xf32>
      %106 = arith.addf %93, %105 : vector<1x256xf32>
      %107 = arith.andi %67, %43 : vector<1x256xi1>
      %c48_i32 = arith.constant 48 : i32
      %108 = tpu.dynamic_rotate %20 by %c48_i32 dim 1 : vector<1x256xf32>, i32 -> vector<1x256xf32>
      %c48_i32_34 = arith.constant 48 : i32
      %109 = tpu.dynamic_rotate %21 by %c48_i32_34 dim 1 : vector<1x256xf32>, i32 -> vector<1x256xf32>
      %c3 = arith.constant 3 : index
      %110 = memref.load %arg2[%c3] : memref<99xf32, #tpu.memory_space<smem>>
      %111 = vector.broadcast %110 : f32 to vector<1x256xf32>
      %112 = arith.mulf %111, %108 : vector<1x256xf32>
      %c52 = arith.constant 52 : index
      %113 = memref.load %arg2[%c52] : memref<99xf32, #tpu.memory_space<smem>>
      %114 = vector.broadcast %113 : f32 to vector<1x256xf32>
      %115 = arith.mulf %114, %109 : vector<1x256xf32>
      %116 = arith.addf %112, %115 : vector<1x256xf32>
      %cst_35 = arith.constant 0.000000e+00 : f32
      %117 = vector.broadcast %cst_35 : f32 to vector<1x256xf32>
      %118 = arith.select %107, %116, %117 : vector<1x256xi1>, vector<1x256xf32>
      %119 = arith.addf %106, %118 : vector<1x256xf32>
      %120 = arith.andi %67, %48 : vector<1x256xi1>
      %c47_i32 = arith.constant 47 : i32
      %121 = tpu.dynamic_rotate %20 by %c47_i32 dim 1 : vector<1x256xf32>, i32 -> vector<1x256xf32>
      %c47_i32_36 = arith.constant 47 : i32
      %122 = tpu.dynamic_rotate %21 by %c47_i32_36 dim 1 : vector<1x256xf32>, i32 -> vector<1x256xf32>
      %c4 = arith.constant 4 : index
      %123 = memref.load %arg2[%c4] : memref<99xf32, #tpu.memory_space<smem>>
      %124 = vector.broadcast %123 : f32 to vector<1x256xf32>
      %125 = arith.mulf %124, %121 : vector<1x256xf32>
      %c53 = arith.constant 53 : index
      %126 = memref.load %arg2[%c53] : memref<99xf32, #tpu.memory_space<smem>>
      %127 = vector.broadcast %126 : f32 to vector<1x256xf32>
      %128 = arith.mulf %127, %122 : vector<1x256xf32>
      %129 = arith.addf %125, %128 : vector<1x256xf32>
      %cst_37 = arith.constant 0.000000e+00 : f32
      %130 = vector.broadcast %cst_37 : f32 to vector<1x256xf32>
      %131 = arith.select %120, %129, %130 : vector<1x256xi1>, vector<1x256xf32>
      %132 = arith.addf %119, %131 : vector<1x256xf32>
      %133 = arith.andi %67, %53 : vector<1x256xi1>
      %c46_i32 = arith.constant 46 : i32
      %134 = tpu.dynamic_rotate %20 by %c46_i32 dim 1 : vector<1x256xf32>, i32 -> vector<1x256xf32>
      %c46_i32_38 = arith.constant 46 : i32
      %135 = tpu.dynamic_rotate %21 by %c46_i32_38 dim 1 : vector<1x256xf32>, i32 -> vector<1x256xf32>
      %c5 = arith.constant 5 : index
      %136 = memref.load %arg2[%c5] : memref<99xf32, #tpu.memory_space<smem>>
      %137 = vector.broadcast %136 : f32 to vector<1x256xf32>
      %138 = arith.mulf %137, %134 : vector<1x256xf32>
      %c54 = arith.constant 54 : index
      %139 = memref.load %arg2[%c54] : memref<99xf32, #tpu.memory_space<smem>>
      %140 = vector.broadcast %139 : f32 to vector<1x256xf32>
      %141 = arith.mulf %140, %135 : vector<1x256xf32>
      %142 = arith.addf %138, %141 : vector<1x256xf32>
      %cst_39 = arith.constant 0.000000e+00 : f32
      %143 = vector.broadcast %cst_39 : f32 to vector<1x256xf32>
      %144 = arith.select %133, %142, %143 : vector<1x256xi1>, vector<1x256xf32>
      %145 = arith.addf %132, %144 : vector<1x256xf32>
      %146 = arith.andi %67, %58 : vector<1x256xi1>
      %c45_i32 = arith.constant 45 : i32
      %147 = tpu.dynamic_rotate %20 by %c45_i32 dim 1 : vector<1x256xf32>, i32 -> vector<1x256xf32>
      %c45_i32_40 = arith.constant 45 : i32
      %148 = tpu.dynamic_rotate %21 by %c45_i32_40 dim 1 : vector<1x256xf32>, i32 -> vector<1x256xf32>
      %c6 = arith.constant 6 : index
      %149 = memref.load %arg2[%c6] : memref<99xf32, #tpu.memory_space<smem>>
      %150 = vector.broadcast %149 : f32 to vector<1x256xf32>
      %151 = arith.mulf %150, %147 : vector<1x256xf32>
      %c55 = arith.constant 55 : index
      %152 = memref.load %arg2[%c55] : memref<99xf32, #tpu.memory_space<smem>>
      %153 = vector.broadcast %152 : f32 to vector<1x256xf32>
      %154 = arith.mulf %153, %148 : vector<1x256xf32>
      %155 = arith.addf %151, %154 : vector<1x256xf32>
      %cst_41 = arith.constant 0.000000e+00 : f32
      %156 = vector.broadcast %cst_41 : f32 to vector<1x256xf32>
      %157 = arith.select %146, %155, %156 : vector<1x256xi1>, vector<1x256xf32>
      %158 = arith.addf %145, %157 : vector<1x256xf32>
      %c2_i32_42 = arith.constant 2 : i32
      %159 = vector.broadcast %c2_i32_42 : i32 to vector<1x256xi32>
      %160 = arith.cmpi sge, %22, %159 : vector<1x256xi32>
      %c18_i32_43 = arith.constant 18 : i32
      %161 = vector.broadcast %c18_i32_43 : i32 to vector<1x256xi32>
      %162 = arith.cmpi slt, %22, %161 : vector<1x256xi32>
      %163 = arith.andi %160, %162 : vector<1x256xi1>
      %164 = arith.andi %163, %28 : vector<1x256xi1>
      %c35_i32 = arith.constant 35 : i32
      %165 = tpu.dynamic_rotate %20 by %c35_i32 dim 1 : vector<1x256xf32>, i32 -> vector<1x256xf32>
      %c35_i32_44 = arith.constant 35 : i32
      %166 = tpu.dynamic_rotate %21 by %c35_i32_44 dim 1 : vector<1x256xf32>, i32 -> vector<1x256xf32>
      %c7 = arith.constant 7 : index
      %167 = memref.load %arg2[%c7] : memref<99xf32, #tpu.memory_space<smem>>
      %168 = vector.broadcast %167 : f32 to vector<1x256xf32>
      %169 = arith.mulf %168, %165 : vector<1x256xf32>
      %c56 = arith.constant 56 : index
      %170 = memref.load %arg2[%c56] : memref<99xf32, #tpu.memory_space<smem>>
      %171 = vector.broadcast %170 : f32 to vector<1x256xf32>
      %172 = arith.mulf %171, %166 : vector<1x256xf32>
      %173 = arith.addf %169, %172 : vector<1x256xf32>
      %cst_45 = arith.constant 0.000000e+00 : f32
      %174 = vector.broadcast %cst_45 : f32 to vector<1x256xf32>
      %175 = arith.select %164, %173, %174 : vector<1x256xi1>, vector<1x256xf32>
      %176 = arith.addf %158, %175 : vector<1x256xf32>
      %177 = arith.andi %163, %33 : vector<1x256xi1>
      %c34_i32 = arith.constant 34 : i32
      %178 = tpu.dynamic_rotate %20 by %c34_i32 dim 1 : vector<1x256xf32>, i32 -> vector<1x256xf32>
      %c34_i32_46 = arith.constant 34 : i32
      %179 = tpu.dynamic_rotate %21 by %c34_i32_46 dim 1 : vector<1x256xf32>, i32 -> vector<1x256xf32>
      %c8 = arith.constant 8 : index
      %180 = memref.load %arg2[%c8] : memref<99xf32, #tpu.memory_space<smem>>
      %181 = vector.broadcast %180 : f32 to vector<1x256xf32>
      %182 = arith.mulf %181, %178 : vector<1x256xf32>
      %c57 = arith.constant 57 : index
      %183 = memref.load %arg2[%c57] : memref<99xf32, #tpu.memory_space<smem>>
      %184 = vector.broadcast %183 : f32 to vector<1x256xf32>
      %185 = arith.mulf %184, %179 : vector<1x256xf32>
      %186 = arith.addf %182, %185 : vector<1x256xf32>
      %cst_47 = arith.constant 0.000000e+00 : f32
      %187 = vector.broadcast %cst_47 : f32 to vector<1x256xf32>
      %188 = arith.select %177, %186, %187 : vector<1x256xi1>, vector<1x256xf32>
      %189 = arith.addf %176, %188 : vector<1x256xf32>
      %190 = arith.andi %163, %38 : vector<1x256xi1>
      %c33_i32 = arith.constant 33 : i32
      %191 = tpu.dynamic_rotate %20 by %c33_i32 dim 1 : vector<1x256xf32>, i32 -> vector<1x256xf32>
      %c33_i32_48 = arith.constant 33 : i32
      %192 = tpu.dynamic_rotate %21 by %c33_i32_48 dim 1 : vector<1x256xf32>, i32 -> vector<1x256xf32>
      %c9 = arith.constant 9 : index
      %193 = memref.load %arg2[%c9] : memref<99xf32, #tpu.memory_space<smem>>
      %194 = vector.broadcast %193 : f32 to vector<1x256xf32>
      %195 = arith.mulf %194, %191 : vector<1x256xf32>
      %c58 = arith.constant 58 : index
      %196 = memref.load %arg2[%c58] : memref<99xf32, #tpu.memory_space<smem>>
      %197 = vector.broadcast %196 : f32 to vector<1x256xf32>
      %198 = arith.mulf %197, %192 : vector<1x256xf32>
      %199 = arith.addf %195, %198 : vector<1x256xf32>
      %cst_49 = arith.constant 0.000000e+00 : f32
      %200 = vector.broadcast %cst_49 : f32 to vector<1x256xf32>
      %201 = arith.select %190, %199, %200 : vector<1x256xi1>, vector<1x256xf32>
      %202 = arith.addf %189, %201 : vector<1x256xf32>
      %203 = arith.andi %163, %43 : vector<1x256xi1>
      %c32_i32 = arith.constant 32 : i32
      %204 = tpu.dynamic_rotate %20 by %c32_i32 dim 1 : vector<1x256xf32>, i32 -> vector<1x256xf32>
      %c32_i32_50 = arith.constant 32 : i32
      %205 = tpu.dynamic_rotate %21 by %c32_i32_50 dim 1 : vector<1x256xf32>, i32 -> vector<1x256xf32>
      %c10 = arith.constant 10 : index
      %206 = memref.load %arg2[%c10] : memref<99xf32, #tpu.memory_space<smem>>
      %207 = vector.broadcast %206 : f32 to vector<1x256xf32>
      %208 = arith.mulf %207, %204 : vector<1x256xf32>
      %c59 = arith.constant 59 : index
      %209 = memref.load %arg2[%c59] : memref<99xf32, #tpu.memory_space<smem>>
      %210 = vector.broadcast %209 : f32 to vector<1x256xf32>
      %211 = arith.mulf %210, %205 : vector<1x256xf32>
      %212 = arith.addf %208, %211 : vector<1x256xf32>
      %cst_51 = arith.constant 0.000000e+00 : f32
      %213 = vector.broadcast %cst_51 : f32 to vector<1x256xf32>
      %214 = arith.select %203, %212, %213 : vector<1x256xi1>, vector<1x256xf32>
      %215 = arith.addf %202, %214 : vector<1x256xf32>
      %216 = arith.andi %163, %48 : vector<1x256xi1>
      %c31_i32 = arith.constant 31 : i32
      %217 = tpu.dynamic_rotate %20 by %c31_i32 dim 1 : vector<1x256xf32>, i32 -> vector<1x256xf32>
      %c31_i32_52 = arith.constant 31 : i32
      %218 = tpu.dynamic_rotate %21 by %c31_i32_52 dim 1 : vector<1x256xf32>, i32 -> vector<1x256xf32>
      %c11 = arith.constant 11 : index
      %219 = memref.load %arg2[%c11] : memref<99xf32, #tpu.memory_space<smem>>
      %220 = vector.broadcast %219 : f32 to vector<1x256xf32>
      %221 = arith.mulf %220, %217 : vector<1x256xf32>
      %c60 = arith.constant 60 : index
      %222 = memref.load %arg2[%c60] : memref<99xf32, #tpu.memory_space<smem>>
      %223 = vector.broadcast %222 : f32 to vector<1x256xf32>
      %224 = arith.mulf %223, %218 : vector<1x256xf32>
      %225 = arith.addf %221, %224 : vector<1x256xf32>
      %cst_53 = arith.constant 0.000000e+00 : f32
      %226 = vector.broadcast %cst_53 : f32 to vector<1x256xf32>
      %227 = arith.select %216, %225, %226 : vector<1x256xi1>, vector<1x256xf32>
      %228 = arith.addf %215, %227 : vector<1x256xf32>
      %229 = arith.andi %163, %53 : vector<1x256xi1>
      %c30_i32 = arith.constant 30 : i32
      %230 = tpu.dynamic_rotate %20 by %c30_i32 dim 1 : vector<1x256xf32>, i32 -> vector<1x256xf32>
      %c30_i32_54 = arith.constant 30 : i32
      %231 = tpu.dynamic_rotate %21 by %c30_i32_54 dim 1 : vector<1x256xf32>, i32 -> vector<1x256xf32>
      %c12 = arith.constant 12 : index
      %232 = memref.load %arg2[%c12] : memref<99xf32, #tpu.memory_space<smem>>
      %233 = vector.broadcast %232 : f32 to vector<1x256xf32>
      %234 = arith.mulf %233, %230 : vector<1x256xf32>
      %c61 = arith.constant 61 : index
      %235 = memref.load %arg2[%c61] : memref<99xf32, #tpu.memory_space<smem>>
      %236 = vector.broadcast %235 : f32 to vector<1x256xf32>
      %237 = arith.mulf %236, %231 : vector<1x256xf32>
      %238 = arith.addf %234, %237 : vector<1x256xf32>
      %cst_55 = arith.constant 0.000000e+00 : f32
      %239 = vector.broadcast %cst_55 : f32 to vector<1x256xf32>
      %240 = arith.select %229, %238, %239 : vector<1x256xi1>, vector<1x256xf32>
      %241 = arith.addf %228, %240 : vector<1x256xf32>
      %242 = arith.andi %163, %58 : vector<1x256xi1>
      %c29_i32 = arith.constant 29 : i32
      %243 = tpu.dynamic_rotate %20 by %c29_i32 dim 1 : vector<1x256xf32>, i32 -> vector<1x256xf32>
      %c29_i32_56 = arith.constant 29 : i32
      %244 = tpu.dynamic_rotate %21 by %c29_i32_56 dim 1 : vector<1x256xf32>, i32 -> vector<1x256xf32>
      %c13 = arith.constant 13 : index
      %245 = memref.load %arg2[%c13] : memref<99xf32, #tpu.memory_space<smem>>
      %246 = vector.broadcast %245 : f32 to vector<1x256xf32>
      %247 = arith.mulf %246, %243 : vector<1x256xf32>
      %c62 = arith.constant 62 : index
      %248 = memref.load %arg2[%c62] : memref<99xf32, #tpu.memory_space<smem>>
      %249 = vector.broadcast %248 : f32 to vector<1x256xf32>
      %250 = arith.mulf %249, %244 : vector<1x256xf32>
      %251 = arith.addf %247, %250 : vector<1x256xf32>
      %cst_57 = arith.constant 0.000000e+00 : f32
      %252 = vector.broadcast %cst_57 : f32 to vector<1x256xf32>
      %253 = arith.select %242, %251, %252 : vector<1x256xi1>, vector<1x256xf32>
      %254 = arith.addf %241, %253 : vector<1x256xf32>
      %c1_i32_58 = arith.constant 1 : i32
      %255 = vector.broadcast %c1_i32_58 : i32 to vector<1x256xi32>
      %256 = arith.cmpi sge, %22, %255 : vector<1x256xi32>
      %c17_i32_59 = arith.constant 17 : i32
      %257 = vector.broadcast %c17_i32_59 : i32 to vector<1x256xi32>
      %258 = arith.cmpi slt, %22, %257 : vector<1x256xi32>
      %259 = arith.andi %256, %258 : vector<1x256xi1>
      %260 = arith.andi %259, %28 : vector<1x256xi1>
      %c19_i32_60 = arith.constant 19 : i32
      %261 = tpu.dynamic_rotate %20 by %c19_i32_60 dim 1 : vector<1x256xf32>, i32 -> vector<1x256xf32>
      %c19_i32_61 = arith.constant 19 : i32
      %262 = tpu.dynamic_rotate %21 by %c19_i32_61 dim 1 : vector<1x256xf32>, i32 -> vector<1x256xf32>
      %c14 = arith.constant 14 : index
      %263 = memref.load %arg2[%c14] : memref<99xf32, #tpu.memory_space<smem>>
      %264 = vector.broadcast %263 : f32 to vector<1x256xf32>
      %265 = arith.mulf %264, %261 : vector<1x256xf32>
      %c63 = arith.constant 63 : index
      %266 = memref.load %arg2[%c63] : memref<99xf32, #tpu.memory_space<smem>>
      %267 = vector.broadcast %266 : f32 to vector<1x256xf32>
      %268 = arith.mulf %267, %262 : vector<1x256xf32>
      %269 = arith.addf %265, %268 : vector<1x256xf32>
      %cst_62 = arith.constant 0.000000e+00 : f32
      %270 = vector.broadcast %cst_62 : f32 to vector<1x256xf32>
      %271 = arith.select %260, %269, %270 : vector<1x256xi1>, vector<1x256xf32>
      %272 = arith.addf %254, %271 : vector<1x256xf32>
      %273 = arith.andi %259, %33 : vector<1x256xi1>
      %c18_i32_63 = arith.constant 18 : i32
      %274 = tpu.dynamic_rotate %20 by %c18_i32_63 dim 1 : vector<1x256xf32>, i32 -> vector<1x256xf32>
      %c18_i32_64 = arith.constant 18 : i32
      %275 = tpu.dynamic_rotate %21 by %c18_i32_64 dim 1 : vector<1x256xf32>, i32 -> vector<1x256xf32>
      %c15 = arith.constant 15 : index
      %276 = memref.load %arg2[%c15] : memref<99xf32, #tpu.memory_space<smem>>
      %277 = vector.broadcast %276 : f32 to vector<1x256xf32>
      %278 = arith.mulf %277, %274 : vector<1x256xf32>
      %c64 = arith.constant 64 : index
      %279 = memref.load %arg2[%c64] : memref<99xf32, #tpu.memory_space<smem>>
      %280 = vector.broadcast %279 : f32 to vector<1x256xf32>
      %281 = arith.mulf %280, %275 : vector<1x256xf32>
      %282 = arith.addf %278, %281 : vector<1x256xf32>
      %cst_65 = arith.constant 0.000000e+00 : f32
      %283 = vector.broadcast %cst_65 : f32 to vector<1x256xf32>
      %284 = arith.select %273, %282, %283 : vector<1x256xi1>, vector<1x256xf32>
      %285 = arith.addf %272, %284 : vector<1x256xf32>
      %286 = arith.andi %259, %38 : vector<1x256xi1>
      %c17_i32_66 = arith.constant 17 : i32
      %287 = tpu.dynamic_rotate %20 by %c17_i32_66 dim 1 : vector<1x256xf32>, i32 -> vector<1x256xf32>
      %c17_i32_67 = arith.constant 17 : i32
      %288 = tpu.dynamic_rotate %21 by %c17_i32_67 dim 1 : vector<1x256xf32>, i32 -> vector<1x256xf32>
      %c16 = arith.constant 16 : index
      %289 = memref.load %arg2[%c16] : memref<99xf32, #tpu.memory_space<smem>>
      %290 = vector.broadcast %289 : f32 to vector<1x256xf32>
      %291 = arith.mulf %290, %287 : vector<1x256xf32>
      %c65 = arith.constant 65 : index
      %292 = memref.load %arg2[%c65] : memref<99xf32, #tpu.memory_space<smem>>
      %293 = vector.broadcast %292 : f32 to vector<1x256xf32>
      %294 = arith.mulf %293, %288 : vector<1x256xf32>
      %295 = arith.addf %291, %294 : vector<1x256xf32>
      %cst_68 = arith.constant 0.000000e+00 : f32
      %296 = vector.broadcast %cst_68 : f32 to vector<1x256xf32>
      %297 = arith.select %286, %295, %296 : vector<1x256xi1>, vector<1x256xf32>
      %298 = arith.addf %285, %297 : vector<1x256xf32>
      %299 = arith.andi %259, %43 : vector<1x256xi1>
      %c16_i32_69 = arith.constant 16 : i32
      %300 = tpu.dynamic_rotate %20 by %c16_i32_69 dim 1 : vector<1x256xf32>, i32 -> vector<1x256xf32>
      %c16_i32_70 = arith.constant 16 : i32
      %301 = tpu.dynamic_rotate %21 by %c16_i32_70 dim 1 : vector<1x256xf32>, i32 -> vector<1x256xf32>
      %c17 = arith.constant 17 : index
      %302 = memref.load %arg2[%c17] : memref<99xf32, #tpu.memory_space<smem>>
      %303 = vector.broadcast %302 : f32 to vector<1x256xf32>
      %304 = arith.mulf %303, %300 : vector<1x256xf32>
      %c66 = arith.constant 66 : index
      %305 = memref.load %arg2[%c66] : memref<99xf32, #tpu.memory_space<smem>>
      %306 = vector.broadcast %305 : f32 to vector<1x256xf32>
      %307 = arith.mulf %306, %301 : vector<1x256xf32>
      %308 = arith.addf %304, %307 : vector<1x256xf32>
      %cst_71 = arith.constant 0.000000e+00 : f32
      %309 = vector.broadcast %cst_71 : f32 to vector<1x256xf32>
      %310 = arith.select %299, %308, %309 : vector<1x256xi1>, vector<1x256xf32>
      %311 = arith.addf %298, %310 : vector<1x256xf32>
      %312 = arith.andi %259, %48 : vector<1x256xi1>
      %c15_i32_72 = arith.constant 15 : i32
      %313 = tpu.dynamic_rotate %20 by %c15_i32_72 dim 1 : vector<1x256xf32>, i32 -> vector<1x256xf32>
      %c15_i32_73 = arith.constant 15 : i32
      %314 = tpu.dynamic_rotate %21 by %c15_i32_73 dim 1 : vector<1x256xf32>, i32 -> vector<1x256xf32>
      %c18 = arith.constant 18 : index
      %315 = memref.load %arg2[%c18] : memref<99xf32, #tpu.memory_space<smem>>
      %316 = vector.broadcast %315 : f32 to vector<1x256xf32>
      %317 = arith.mulf %316, %313 : vector<1x256xf32>
      %c67 = arith.constant 67 : index
      %318 = memref.load %arg2[%c67] : memref<99xf32, #tpu.memory_space<smem>>
      %319 = vector.broadcast %318 : f32 to vector<1x256xf32>
      %320 = arith.mulf %319, %314 : vector<1x256xf32>
      %321 = arith.addf %317, %320 : vector<1x256xf32>
      %cst_74 = arith.constant 0.000000e+00 : f32
      %322 = vector.broadcast %cst_74 : f32 to vector<1x256xf32>
      %323 = arith.select %312, %321, %322 : vector<1x256xi1>, vector<1x256xf32>
      %324 = arith.addf %311, %323 : vector<1x256xf32>
      %325 = arith.andi %259, %53 : vector<1x256xi1>
      %c14_i32_75 = arith.constant 14 : i32
      %326 = tpu.dynamic_rotate %20 by %c14_i32_75 dim 1 : vector<1x256xf32>, i32 -> vector<1x256xf32>
      %c14_i32_76 = arith.constant 14 : i32
      %327 = tpu.dynamic_rotate %21 by %c14_i32_76 dim 1 : vector<1x256xf32>, i32 -> vector<1x256xf32>
      %c19 = arith.constant 19 : index
      %328 = memref.load %arg2[%c19] : memref<99xf32, #tpu.memory_space<smem>>
      %329 = vector.broadcast %328 : f32 to vector<1x256xf32>
      %330 = arith.mulf %329, %326 : vector<1x256xf32>
      %c68 = arith.constant 68 : index
      %331 = memref.load %arg2[%c68] : memref<99xf32, #tpu.memory_space<smem>>
      %332 = vector.broadcast %331 : f32 to vector<1x256xf32>
      %333 = arith.mulf %332, %327 : vector<1x256xf32>
      %334 = arith.addf %330, %333 : vector<1x256xf32>
      %cst_77 = arith.constant 0.000000e+00 : f32
      %335 = vector.broadcast %cst_77 : f32 to vector<1x256xf32>
      %336 = arith.select %325, %334, %335 : vector<1x256xi1>, vector<1x256xf32>
      %337 = arith.addf %324, %336 : vector<1x256xf32>
      %338 = arith.andi %259, %58 : vector<1x256xi1>
      %c13_i32_78 = arith.constant 13 : i32
      %339 = tpu.dynamic_rotate %20 by %c13_i32_78 dim 1 : vector<1x256xf32>, i32 -> vector<1x256xf32>
      %c13_i32_79 = arith.constant 13 : i32
      %340 = tpu.dynamic_rotate %21 by %c13_i32_79 dim 1 : vector<1x256xf32>, i32 -> vector<1x256xf32>
      %c20 = arith.constant 20 : index
      %341 = memref.load %arg2[%c20] : memref<99xf32, #tpu.memory_space<smem>>
      %342 = vector.broadcast %341 : f32 to vector<1x256xf32>
      %343 = arith.mulf %342, %339 : vector<1x256xf32>
      %c69 = arith.constant 69 : index
      %344 = memref.load %arg2[%c69] : memref<99xf32, #tpu.memory_space<smem>>
      %345 = vector.broadcast %344 : f32 to vector<1x256xf32>
      %346 = arith.mulf %345, %340 : vector<1x256xf32>
      %347 = arith.addf %343, %346 : vector<1x256xf32>
      %cst_80 = arith.constant 0.000000e+00 : f32
      %348 = vector.broadcast %cst_80 : f32 to vector<1x256xf32>
      %349 = arith.select %338, %347, %348 : vector<1x256xi1>, vector<1x256xf32>
      %350 = arith.addf %337, %349 : vector<1x256xf32>
      %c0_i32_81 = arith.constant 0 : i32
      %351 = vector.broadcast %c0_i32_81 : i32 to vector<1x256xi32>
      %352 = arith.cmpi sge, %22, %351 : vector<1x256xi32>
      %c16_i32_82 = arith.constant 16 : i32
      %353 = vector.broadcast %c16_i32_82 : i32 to vector<1x256xi32>
      %354 = arith.cmpi slt, %22, %353 : vector<1x256xi32>
      %355 = arith.andi %352, %354 : vector<1x256xi1>
      %356 = arith.andi %355, %28 : vector<1x256xi1>
      %c3_i32_83 = arith.constant 3 : i32
      %357 = tpu.dynamic_rotate %20 by %c3_i32_83 dim 1 : vector<1x256xf32>, i32 -> vector<1x256xf32>
      %c3_i32_84 = arith.constant 3 : i32
      %358 = tpu.dynamic_rotate %21 by %c3_i32_84 dim 1 : vector<1x256xf32>, i32 -> vector<1x256xf32>
      %c21 = arith.constant 21 : index
      %359 = memref.load %arg2[%c21] : memref<99xf32, #tpu.memory_space<smem>>
      %360 = vector.broadcast %359 : f32 to vector<1x256xf32>
      %361 = arith.mulf %360, %357 : vector<1x256xf32>
      %c70 = arith.constant 70 : index
      %362 = memref.load %arg2[%c70] : memref<99xf32, #tpu.memory_space<smem>>
      %363 = vector.broadcast %362 : f32 to vector<1x256xf32>
      %364 = arith.mulf %363, %358 : vector<1x256xf32>
      %365 = arith.addf %361, %364 : vector<1x256xf32>
      %cst_85 = arith.constant 0.000000e+00 : f32
      %366 = vector.broadcast %cst_85 : f32 to vector<1x256xf32>
      %367 = arith.select %356, %365, %366 : vector<1x256xi1>, vector<1x256xf32>
      %368 = arith.addf %350, %367 : vector<1x256xf32>
      %369 = arith.andi %355, %33 : vector<1x256xi1>
      %c2_i32_86 = arith.constant 2 : i32
      %370 = tpu.dynamic_rotate %20 by %c2_i32_86 dim 1 : vector<1x256xf32>, i32 -> vector<1x256xf32>
      %c2_i32_87 = arith.constant 2 : i32
      %371 = tpu.dynamic_rotate %21 by %c2_i32_87 dim 1 : vector<1x256xf32>, i32 -> vector<1x256xf32>
      %c22 = arith.constant 22 : index
      %372 = memref.load %arg2[%c22] : memref<99xf32, #tpu.memory_space<smem>>
      %373 = vector.broadcast %372 : f32 to vector<1x256xf32>
      %374 = arith.mulf %373, %370 : vector<1x256xf32>
      %c71 = arith.constant 71 : index
      %375 = memref.load %arg2[%c71] : memref<99xf32, #tpu.memory_space<smem>>
      %376 = vector.broadcast %375 : f32 to vector<1x256xf32>
      %377 = arith.mulf %376, %371 : vector<1x256xf32>
      %378 = arith.addf %374, %377 : vector<1x256xf32>
      %cst_88 = arith.constant 0.000000e+00 : f32
      %379 = vector.broadcast %cst_88 : f32 to vector<1x256xf32>
      %380 = arith.select %369, %378, %379 : vector<1x256xi1>, vector<1x256xf32>
      %381 = arith.addf %368, %380 : vector<1x256xf32>
      %382 = arith.andi %355, %38 : vector<1x256xi1>
      %c1_i32_89 = arith.constant 1 : i32
      %383 = tpu.dynamic_rotate %20 by %c1_i32_89 dim 1 : vector<1x256xf32>, i32 -> vector<1x256xf32>
      %c1_i32_90 = arith.constant 1 : i32
      %384 = tpu.dynamic_rotate %21 by %c1_i32_90 dim 1 : vector<1x256xf32>, i32 -> vector<1x256xf32>
      %c23 = arith.constant 23 : index
      %385 = memref.load %arg2[%c23] : memref<99xf32, #tpu.memory_space<smem>>
      %386 = vector.broadcast %385 : f32 to vector<1x256xf32>
      %387 = arith.mulf %386, %383 : vector<1x256xf32>
      %c72 = arith.constant 72 : index
      %388 = memref.load %arg2[%c72] : memref<99xf32, #tpu.memory_space<smem>>
      %389 = vector.broadcast %388 : f32 to vector<1x256xf32>
      %390 = arith.mulf %389, %384 : vector<1x256xf32>
      %391 = arith.addf %387, %390 : vector<1x256xf32>
      %cst_91 = arith.constant 0.000000e+00 : f32
      %392 = vector.broadcast %cst_91 : f32 to vector<1x256xf32>
      %393 = arith.select %382, %391, %392 : vector<1x256xi1>, vector<1x256xf32>
      %394 = arith.addf %381, %393 : vector<1x256xf32>
      %395 = arith.andi %355, %43 : vector<1x256xi1>
      %c24 = arith.constant 24 : index
      %396 = memref.load %arg2[%c24] : memref<99xf32, #tpu.memory_space<smem>>
      %397 = vector.broadcast %396 : f32 to vector<1x256xf32>
      %398 = arith.mulf %397, %20 : vector<1x256xf32>
      %c73 = arith.constant 73 : index
      %399 = memref.load %arg2[%c73] : memref<99xf32, #tpu.memory_space<smem>>
      %400 = vector.broadcast %399 : f32 to vector<1x256xf32>
      %401 = arith.mulf %400, %21 : vector<1x256xf32>
      %402 = arith.addf %398, %401 : vector<1x256xf32>
      %cst_92 = arith.constant 0.000000e+00 : f32
      %403 = vector.broadcast %cst_92 : f32 to vector<1x256xf32>
      %404 = arith.select %395, %402, %403 : vector<1x256xi1>, vector<1x256xf32>
      %405 = arith.addf %394, %404 : vector<1x256xf32>
      %406 = arith.andi %355, %48 : vector<1x256xi1>
      %c255_i32 = arith.constant 255 : i32
      %407 = tpu.dynamic_rotate %20 by %c255_i32 dim 1 : vector<1x256xf32>, i32 -> vector<1x256xf32>
      %c255_i32_93 = arith.constant 255 : i32
      %408 = tpu.dynamic_rotate %21 by %c255_i32_93 dim 1 : vector<1x256xf32>, i32 -> vector<1x256xf32>
      %c25 = arith.constant 25 : index
      %409 = memref.load %arg2[%c25] : memref<99xf32, #tpu.memory_space<smem>>
      %410 = vector.broadcast %409 : f32 to vector<1x256xf32>
      %411 = arith.mulf %410, %407 : vector<1x256xf32>
      %c74 = arith.constant 74 : index
      %412 = memref.load %arg2[%c74] : memref<99xf32, #tpu.memory_space<smem>>
      %413 = vector.broadcast %412 : f32 to vector<1x256xf32>
      %414 = arith.mulf %413, %408 : vector<1x256xf32>
      %415 = arith.addf %411, %414 : vector<1x256xf32>
      %cst_94 = arith.constant 0.000000e+00 : f32
      %416 = vector.broadcast %cst_94 : f32 to vector<1x256xf32>
      %417 = arith.select %406, %415, %416 : vector<1x256xi1>, vector<1x256xf32>
      %418 = arith.addf %405, %417 : vector<1x256xf32>
      %419 = arith.andi %355, %53 : vector<1x256xi1>
      %c254_i32 = arith.constant 254 : i32
      %420 = tpu.dynamic_rotate %20 by %c254_i32 dim 1 : vector<1x256xf32>, i32 -> vector<1x256xf32>
      %c254_i32_95 = arith.constant 254 : i32
      %421 = tpu.dynamic_rotate %21 by %c254_i32_95 dim 1 : vector<1x256xf32>, i32 -> vector<1x256xf32>
      %c26 = arith.constant 26 : index
      %422 = memref.load %arg2[%c26] : memref<99xf32, #tpu.memory_space<smem>>
      %423 = vector.broadcast %422 : f32 to vector<1x256xf32>
      %424 = arith.mulf %423, %420 : vector<1x256xf32>
      %c75 = arith.constant 75 : index
      %425 = memref.load %arg2[%c75] : memref<99xf32, #tpu.memory_space<smem>>
      %426 = vector.broadcast %425 : f32 to vector<1x256xf32>
      %427 = arith.mulf %426, %421 : vector<1x256xf32>
      %428 = arith.addf %424, %427 : vector<1x256xf32>
      %cst_96 = arith.constant 0.000000e+00 : f32
      %429 = vector.broadcast %cst_96 : f32 to vector<1x256xf32>
      %430 = arith.select %419, %428, %429 : vector<1x256xi1>, vector<1x256xf32>
      %431 = arith.addf %418, %430 : vector<1x256xf32>
      %432 = arith.andi %355, %58 : vector<1x256xi1>
      %c253_i32 = arith.constant 253 : i32
      %433 = tpu.dynamic_rotate %20 by %c253_i32 dim 1 : vector<1x256xf32>, i32 -> vector<1x256xf32>
      %c253_i32_97 = arith.constant 253 : i32
      %434 = tpu.dynamic_rotate %21 by %c253_i32_97 dim 1 : vector<1x256xf32>, i32 -> vector<1x256xf32>
      %c27 = arith.constant 27 : index
      %435 = memref.load %arg2[%c27] : memref<99xf32, #tpu.memory_space<smem>>
      %436 = vector.broadcast %435 : f32 to vector<1x256xf32>
      %437 = arith.mulf %436, %433 : vector<1x256xf32>
      %c76 = arith.constant 76 : index
      %438 = memref.load %arg2[%c76] : memref<99xf32, #tpu.memory_space<smem>>
      %439 = vector.broadcast %438 : f32 to vector<1x256xf32>
      %440 = arith.mulf %439, %434 : vector<1x256xf32>
      %441 = arith.addf %437, %440 : vector<1x256xf32>
      %cst_98 = arith.constant 0.000000e+00 : f32
      %442 = vector.broadcast %cst_98 : f32 to vector<1x256xf32>
      %443 = arith.select %432, %441, %442 : vector<1x256xi1>, vector<1x256xf32>
      %444 = arith.addf %431, %443 : vector<1x256xf32>
      %c-1_i32_99 = arith.constant -1 : i32
      %445 = vector.broadcast %c-1_i32_99 : i32 to vector<1x256xi32>
      %446 = arith.cmpi sge, %22, %445 : vector<1x256xi32>
      %c15_i32_100 = arith.constant 15 : i32
      %447 = vector.broadcast %c15_i32_100 : i32 to vector<1x256xi32>
      %448 = arith.cmpi slt, %22, %447 : vector<1x256xi32>
      %449 = arith.andi %446, %448 : vector<1x256xi1>
      %450 = arith.andi %449, %28 : vector<1x256xi1>
      %c243_i32 = arith.constant 243 : i32
      %451 = tpu.dynamic_rotate %20 by %c243_i32 dim 1 : vector<1x256xf32>, i32 -> vector<1x256xf32>
      %c243_i32_101 = arith.constant 243 : i32
      %452 = tpu.dynamic_rotate %21 by %c243_i32_101 dim 1 : vector<1x256xf32>, i32 -> vector<1x256xf32>
      %c28 = arith.constant 28 : index
      %453 = memref.load %arg2[%c28] : memref<99xf32, #tpu.memory_space<smem>>
      %454 = vector.broadcast %453 : f32 to vector<1x256xf32>
      %455 = arith.mulf %454, %451 : vector<1x256xf32>
      %c77 = arith.constant 77 : index
      %456 = memref.load %arg2[%c77] : memref<99xf32, #tpu.memory_space<smem>>
      %457 = vector.broadcast %456 : f32 to vector<1x256xf32>
      %458 = arith.mulf %457, %452 : vector<1x256xf32>
      %459 = arith.addf %455, %458 : vector<1x256xf32>
      %cst_102 = arith.constant 0.000000e+00 : f32
      %460 = vector.broadcast %cst_102 : f32 to vector<1x256xf32>
      %461 = arith.select %450, %459, %460 : vector<1x256xi1>, vector<1x256xf32>
      %462 = arith.addf %444, %461 : vector<1x256xf32>
      %463 = arith.andi %449, %33 : vector<1x256xi1>
      %c242_i32 = arith.constant 242 : i32
      %464 = tpu.dynamic_rotate %20 by %c242_i32 dim 1 : vector<1x256xf32>, i32 -> vector<1x256xf32>
      %c242_i32_103 = arith.constant 242 : i32
      %465 = tpu.dynamic_rotate %21 by %c242_i32_103 dim 1 : vector<1x256xf32>, i32 -> vector<1x256xf32>
      %c29 = arith.constant 29 : index
      %466 = memref.load %arg2[%c29] : memref<99xf32, #tpu.memory_space<smem>>
      %467 = vector.broadcast %466 : f32 to vector<1x256xf32>
      %468 = arith.mulf %467, %464 : vector<1x256xf32>
      %c78 = arith.constant 78 : index
      %469 = memref.load %arg2[%c78] : memref<99xf32, #tpu.memory_space<smem>>
      %470 = vector.broadcast %469 : f32 to vector<1x256xf32>
      %471 = arith.mulf %470, %465 : vector<1x256xf32>
      %472 = arith.addf %468, %471 : vector<1x256xf32>
      %cst_104 = arith.constant 0.000000e+00 : f32
      %473 = vector.broadcast %cst_104 : f32 to vector<1x256xf32>
      %474 = arith.select %463, %472, %473 : vector<1x256xi1>, vector<1x256xf32>
      %475 = arith.addf %462, %474 : vector<1x256xf32>
      %476 = arith.andi %449, %38 : vector<1x256xi1>
      %c241_i32 = arith.constant 241 : i32
      %477 = tpu.dynamic_rotate %20 by %c241_i32 dim 1 : vector<1x256xf32>, i32 -> vector<1x256xf32>
      %c241_i32_105 = arith.constant 241 : i32
      %478 = tpu.dynamic_rotate %21 by %c241_i32_105 dim 1 : vector<1x256xf32>, i32 -> vector<1x256xf32>
      %c30 = arith.constant 30 : index
      %479 = memref.load %arg2[%c30] : memref<99xf32, #tpu.memory_space<smem>>
      %480 = vector.broadcast %479 : f32 to vector<1x256xf32>
      %481 = arith.mulf %480, %477 : vector<1x256xf32>
      %c79 = arith.constant 79 : index
      %482 = memref.load %arg2[%c79] : memref<99xf32, #tpu.memory_space<smem>>
      %483 = vector.broadcast %482 : f32 to vector<1x256xf32>
      %484 = arith.mulf %483, %478 : vector<1x256xf32>
      %485 = arith.addf %481, %484 : vector<1x256xf32>
      %cst_106 = arith.constant 0.000000e+00 : f32
      %486 = vector.broadcast %cst_106 : f32 to vector<1x256xf32>
      %487 = arith.select %476, %485, %486 : vector<1x256xi1>, vector<1x256xf32>
      %488 = arith.addf %475, %487 : vector<1x256xf32>
      %489 = arith.andi %449, %43 : vector<1x256xi1>
      %c240_i32 = arith.constant 240 : i32
      %490 = tpu.dynamic_rotate %20 by %c240_i32 dim 1 : vector<1x256xf32>, i32 -> vector<1x256xf32>
      %c240_i32_107 = arith.constant 240 : i32
      %491 = tpu.dynamic_rotate %21 by %c240_i32_107 dim 1 : vector<1x256xf32>, i32 -> vector<1x256xf32>
      %c31 = arith.constant 31 : index
      %492 = memref.load %arg2[%c31] : memref<99xf32, #tpu.memory_space<smem>>
      %493 = vector.broadcast %492 : f32 to vector<1x256xf32>
      %494 = arith.mulf %493, %490 : vector<1x256xf32>
      %c80 = arith.constant 80 : index
      %495 = memref.load %arg2[%c80] : memref<99xf32, #tpu.memory_space<smem>>
      %496 = vector.broadcast %495 : f32 to vector<1x256xf32>
      %497 = arith.mulf %496, %491 : vector<1x256xf32>
      %498 = arith.addf %494, %497 : vector<1x256xf32>
      %cst_108 = arith.constant 0.000000e+00 : f32
      %499 = vector.broadcast %cst_108 : f32 to vector<1x256xf32>
      %500 = arith.select %489, %498, %499 : vector<1x256xi1>, vector<1x256xf32>
      %501 = arith.addf %488, %500 : vector<1x256xf32>
      %502 = arith.andi %449, %48 : vector<1x256xi1>
      %c239_i32 = arith.constant 239 : i32
      %503 = tpu.dynamic_rotate %20 by %c239_i32 dim 1 : vector<1x256xf32>, i32 -> vector<1x256xf32>
      %c239_i32_109 = arith.constant 239 : i32
      %504 = tpu.dynamic_rotate %21 by %c239_i32_109 dim 1 : vector<1x256xf32>, i32 -> vector<1x256xf32>
      %c32 = arith.constant 32 : index
      %505 = memref.load %arg2[%c32] : memref<99xf32, #tpu.memory_space<smem>>
      %506 = vector.broadcast %505 : f32 to vector<1x256xf32>
      %507 = arith.mulf %506, %503 : vector<1x256xf32>
      %c81 = arith.constant 81 : index
      %508 = memref.load %arg2[%c81] : memref<99xf32, #tpu.memory_space<smem>>
      %509 = vector.broadcast %508 : f32 to vector<1x256xf32>
      %510 = arith.mulf %509, %504 : vector<1x256xf32>
      %511 = arith.addf %507, %510 : vector<1x256xf32>
      %cst_110 = arith.constant 0.000000e+00 : f32
      %512 = vector.broadcast %cst_110 : f32 to vector<1x256xf32>
      %513 = arith.select %502, %511, %512 : vector<1x256xi1>, vector<1x256xf32>
      %514 = arith.addf %501, %513 : vector<1x256xf32>
      %515 = arith.andi %449, %53 : vector<1x256xi1>
      %c238_i32 = arith.constant 238 : i32
      %516 = tpu.dynamic_rotate %20 by %c238_i32 dim 1 : vector<1x256xf32>, i32 -> vector<1x256xf32>
      %c238_i32_111 = arith.constant 238 : i32
      %517 = tpu.dynamic_rotate %21 by %c238_i32_111 dim 1 : vector<1x256xf32>, i32 -> vector<1x256xf32>
      %c33 = arith.constant 33 : index
      %518 = memref.load %arg2[%c33] : memref<99xf32, #tpu.memory_space<smem>>
      %519 = vector.broadcast %518 : f32 to vector<1x256xf32>
      %520 = arith.mulf %519, %516 : vector<1x256xf32>
      %c82 = arith.constant 82 : index
      %521 = memref.load %arg2[%c82] : memref<99xf32, #tpu.memory_space<smem>>
      %522 = vector.broadcast %521 : f32 to vector<1x256xf32>
      %523 = arith.mulf %522, %517 : vector<1x256xf32>
      %524 = arith.addf %520, %523 : vector<1x256xf32>
      %cst_112 = arith.constant 0.000000e+00 : f32
      %525 = vector.broadcast %cst_112 : f32 to vector<1x256xf32>
      %526 = arith.select %515, %524, %525 : vector<1x256xi1>, vector<1x256xf32>
      %527 = arith.addf %514, %526 : vector<1x256xf32>
      %528 = arith.andi %449, %58 : vector<1x256xi1>
      %c237_i32 = arith.constant 237 : i32
      %529 = tpu.dynamic_rotate %20 by %c237_i32 dim 1 : vector<1x256xf32>, i32 -> vector<1x256xf32>
      %c237_i32_113 = arith.constant 237 : i32
      %530 = tpu.dynamic_rotate %21 by %c237_i32_113 dim 1 : vector<1x256xf32>, i32 -> vector<1x256xf32>
      %c34 = arith.constant 34 : index
      %531 = memref.load %arg2[%c34] : memref<99xf32, #tpu.memory_space<smem>>
      %532 = vector.broadcast %531 : f32 to vector<1x256xf32>
      %533 = arith.mulf %532, %529 : vector<1x256xf32>
      %c83 = arith.constant 83 : index
      %534 = memref.load %arg2[%c83] : memref<99xf32, #tpu.memory_space<smem>>
      %535 = vector.broadcast %534 : f32 to vector<1x256xf32>
      %536 = arith.mulf %535, %530 : vector<1x256xf32>
      %537 = arith.addf %533, %536 : vector<1x256xf32>
      %cst_114 = arith.constant 0.000000e+00 : f32
      %538 = vector.broadcast %cst_114 : f32 to vector<1x256xf32>
      %539 = arith.select %528, %537, %538 : vector<1x256xi1>, vector<1x256xf32>
      %540 = arith.addf %527, %539 : vector<1x256xf32>
      %c-2_i32_115 = arith.constant -2 : i32
      %541 = vector.broadcast %c-2_i32_115 : i32 to vector<1x256xi32>
      %542 = arith.cmpi sge, %22, %541 : vector<1x256xi32>
      %c14_i32_116 = arith.constant 14 : i32
      %543 = vector.broadcast %c14_i32_116 : i32 to vector<1x256xi32>
      %544 = arith.cmpi slt, %22, %543 : vector<1x256xi32>
      %545 = arith.andi %542, %544 : vector<1x256xi1>
      %546 = arith.andi %545, %28 : vector<1x256xi1>
      %c227_i32 = arith.constant 227 : i32
      %547 = tpu.dynamic_rotate %20 by %c227_i32 dim 1 : vector<1x256xf32>, i32 -> vector<1x256xf32>
      %c227_i32_117 = arith.constant 227 : i32
      %548 = tpu.dynamic_rotate %21 by %c227_i32_117 dim 1 : vector<1x256xf32>, i32 -> vector<1x256xf32>
      %c35 = arith.constant 35 : index
      %549 = memref.load %arg2[%c35] : memref<99xf32, #tpu.memory_space<smem>>
      %550 = vector.broadcast %549 : f32 to vector<1x256xf32>
      %551 = arith.mulf %550, %547 : vector<1x256xf32>
      %c84 = arith.constant 84 : index
      %552 = memref.load %arg2[%c84] : memref<99xf32, #tpu.memory_space<smem>>
      %553 = vector.broadcast %552 : f32 to vector<1x256xf32>
      %554 = arith.mulf %553, %548 : vector<1x256xf32>
      %555 = arith.addf %551, %554 : vector<1x256xf32>
      %cst_118 = arith.constant 0.000000e+00 : f32
      %556 = vector.broadcast %cst_118 : f32 to vector<1x256xf32>
      %557 = arith.select %546, %555, %556 : vector<1x256xi1>, vector<1x256xf32>
      %558 = arith.addf %540, %557 : vector<1x256xf32>
      %559 = arith.andi %545, %33 : vector<1x256xi1>
      %c226_i32 = arith.constant 226 : i32
      %560 = tpu.dynamic_rotate %20 by %c226_i32 dim 1 : vector<1x256xf32>, i32 -> vector<1x256xf32>
      %c226_i32_119 = arith.constant 226 : i32
      %561 = tpu.dynamic_rotate %21 by %c226_i32_119 dim 1 : vector<1x256xf32>, i32 -> vector<1x256xf32>
      %c36 = arith.constant 36 : index
      %562 = memref.load %arg2[%c36] : memref<99xf32, #tpu.memory_space<smem>>
      %563 = vector.broadcast %562 : f32 to vector<1x256xf32>
      %564 = arith.mulf %563, %560 : vector<1x256xf32>
      %c85 = arith.constant 85 : index
      %565 = memref.load %arg2[%c85] : memref<99xf32, #tpu.memory_space<smem>>
      %566 = vector.broadcast %565 : f32 to vector<1x256xf32>
      %567 = arith.mulf %566, %561 : vector<1x256xf32>
      %568 = arith.addf %564, %567 : vector<1x256xf32>
      %cst_120 = arith.constant 0.000000e+00 : f32
      %569 = vector.broadcast %cst_120 : f32 to vector<1x256xf32>
      %570 = arith.select %559, %568, %569 : vector<1x256xi1>, vector<1x256xf32>
      %571 = arith.addf %558, %570 : vector<1x256xf32>
      %572 = arith.andi %545, %38 : vector<1x256xi1>
      %c225_i32 = arith.constant 225 : i32
      %573 = tpu.dynamic_rotate %20 by %c225_i32 dim 1 : vector<1x256xf32>, i32 -> vector<1x256xf32>
      %c225_i32_121 = arith.constant 225 : i32
      %574 = tpu.dynamic_rotate %21 by %c225_i32_121 dim 1 : vector<1x256xf32>, i32 -> vector<1x256xf32>
      %c37 = arith.constant 37 : index
      %575 = memref.load %arg2[%c37] : memref<99xf32, #tpu.memory_space<smem>>
      %576 = vector.broadcast %575 : f32 to vector<1x256xf32>
      %577 = arith.mulf %576, %573 : vector<1x256xf32>
      %c86 = arith.constant 86 : index
      %578 = memref.load %arg2[%c86] : memref<99xf32, #tpu.memory_space<smem>>
      %579 = vector.broadcast %578 : f32 to vector<1x256xf32>
      %580 = arith.mulf %579, %574 : vector<1x256xf32>
      %581 = arith.addf %577, %580 : vector<1x256xf32>
      %cst_122 = arith.constant 0.000000e+00 : f32
      %582 = vector.broadcast %cst_122 : f32 to vector<1x256xf32>
      %583 = arith.select %572, %581, %582 : vector<1x256xi1>, vector<1x256xf32>
      %584 = arith.addf %571, %583 : vector<1x256xf32>
      %585 = arith.andi %545, %43 : vector<1x256xi1>
      %c224_i32 = arith.constant 224 : i32
      %586 = tpu.dynamic_rotate %20 by %c224_i32 dim 1 : vector<1x256xf32>, i32 -> vector<1x256xf32>
      %c224_i32_123 = arith.constant 224 : i32
      %587 = tpu.dynamic_rotate %21 by %c224_i32_123 dim 1 : vector<1x256xf32>, i32 -> vector<1x256xf32>
      %c38 = arith.constant 38 : index
      %588 = memref.load %arg2[%c38] : memref<99xf32, #tpu.memory_space<smem>>
      %589 = vector.broadcast %588 : f32 to vector<1x256xf32>
      %590 = arith.mulf %589, %586 : vector<1x256xf32>
      %c87 = arith.constant 87 : index
      %591 = memref.load %arg2[%c87] : memref<99xf32, #tpu.memory_space<smem>>
      %592 = vector.broadcast %591 : f32 to vector<1x256xf32>
      %593 = arith.mulf %592, %587 : vector<1x256xf32>
      %594 = arith.addf %590, %593 : vector<1x256xf32>
      %cst_124 = arith.constant 0.000000e+00 : f32
      %595 = vector.broadcast %cst_124 : f32 to vector<1x256xf32>
      %596 = arith.select %585, %594, %595 : vector<1x256xi1>, vector<1x256xf32>
      %597 = arith.addf %584, %596 : vector<1x256xf32>
      %598 = arith.andi %545, %48 : vector<1x256xi1>
      %c223_i32 = arith.constant 223 : i32
      %599 = tpu.dynamic_rotate %20 by %c223_i32 dim 1 : vector<1x256xf32>, i32 -> vector<1x256xf32>
      %c223_i32_125 = arith.constant 223 : i32
      %600 = tpu.dynamic_rotate %21 by %c223_i32_125 dim 1 : vector<1x256xf32>, i32 -> vector<1x256xf32>
      %c39 = arith.constant 39 : index
      %601 = memref.load %arg2[%c39] : memref<99xf32, #tpu.memory_space<smem>>
      %602 = vector.broadcast %601 : f32 to vector<1x256xf32>
      %603 = arith.mulf %602, %599 : vector<1x256xf32>
      %c88 = arith.constant 88 : index
      %604 = memref.load %arg2[%c88] : memref<99xf32, #tpu.memory_space<smem>>
      %605 = vector.broadcast %604 : f32 to vector<1x256xf32>
      %606 = arith.mulf %605, %600 : vector<1x256xf32>
      %607 = arith.addf %603, %606 : vector<1x256xf32>
      %cst_126 = arith.constant 0.000000e+00 : f32
      %608 = vector.broadcast %cst_126 : f32 to vector<1x256xf32>
      %609 = arith.select %598, %607, %608 : vector<1x256xi1>, vector<1x256xf32>
      %610 = arith.addf %597, %609 : vector<1x256xf32>
      %611 = arith.andi %545, %53 : vector<1x256xi1>
      %c222_i32 = arith.constant 222 : i32
      %612 = tpu.dynamic_rotate %20 by %c222_i32 dim 1 : vector<1x256xf32>, i32 -> vector<1x256xf32>
      %c222_i32_127 = arith.constant 222 : i32
      %613 = tpu.dynamic_rotate %21 by %c222_i32_127 dim 1 : vector<1x256xf32>, i32 -> vector<1x256xf32>
      %c40 = arith.constant 40 : index
      %614 = memref.load %arg2[%c40] : memref<99xf32, #tpu.memory_space<smem>>
      %615 = vector.broadcast %614 : f32 to vector<1x256xf32>
      %616 = arith.mulf %615, %612 : vector<1x256xf32>
      %c89 = arith.constant 89 : index
      %617 = memref.load %arg2[%c89] : memref<99xf32, #tpu.memory_space<smem>>
      %618 = vector.broadcast %617 : f32 to vector<1x256xf32>
      %619 = arith.mulf %618, %613 : vector<1x256xf32>
      %620 = arith.addf %616, %619 : vector<1x256xf32>
      %cst_128 = arith.constant 0.000000e+00 : f32
      %621 = vector.broadcast %cst_128 : f32 to vector<1x256xf32>
      %622 = arith.select %611, %620, %621 : vector<1x256xi1>, vector<1x256xf32>
      %623 = arith.addf %610, %622 : vector<1x256xf32>
      %624 = arith.andi %545, %58 : vector<1x256xi1>
      %c221_i32 = arith.constant 221 : i32
      %625 = tpu.dynamic_rotate %20 by %c221_i32 dim 1 : vector<1x256xf32>, i32 -> vector<1x256xf32>
      %c221_i32_129 = arith.constant 221 : i32
      %626 = tpu.dynamic_rotate %21 by %c221_i32_129 dim 1 : vector<1x256xf32>, i32 -> vector<1x256xf32>
      %c41 = arith.constant 41 : index
      %627 = memref.load %arg2[%c41] : memref<99xf32, #tpu.memory_space<smem>>
      %628 = vector.broadcast %627 : f32 to vector<1x256xf32>
      %629 = arith.mulf %628, %625 : vector<1x256xf32>
      %c90 = arith.constant 90 : index
      %630 = memref.load %arg2[%c90] : memref<99xf32, #tpu.memory_space<smem>>
      %631 = vector.broadcast %630 : f32 to vector<1x256xf32>
      %632 = arith.mulf %631, %626 : vector<1x256xf32>
      %633 = arith.addf %629, %632 : vector<1x256xf32>
      %cst_130 = arith.constant 0.000000e+00 : f32
      %634 = vector.broadcast %cst_130 : f32 to vector<1x256xf32>
      %635 = arith.select %624, %633, %634 : vector<1x256xi1>, vector<1x256xf32>
      %636 = arith.addf %623, %635 : vector<1x256xf32>
      %c-3_i32_131 = arith.constant -3 : i32
      %637 = vector.broadcast %c-3_i32_131 : i32 to vector<1x256xi32>
      %638 = arith.cmpi sge, %22, %637 : vector<1x256xi32>
      %c13_i32_132 = arith.constant 13 : i32
      %639 = vector.broadcast %c13_i32_132 : i32 to vector<1x256xi32>
      %640 = arith.cmpi slt, %22, %639 : vector<1x256xi32>
      %641 = arith.andi %638, %640 : vector<1x256xi1>
      %642 = arith.andi %641, %28 : vector<1x256xi1>
      %c211_i32 = arith.constant 211 : i32
      %643 = tpu.dynamic_rotate %20 by %c211_i32 dim 1 : vector<1x256xf32>, i32 -> vector<1x256xf32>
      %c211_i32_133 = arith.constant 211 : i32
      %644 = tpu.dynamic_rotate %21 by %c211_i32_133 dim 1 : vector<1x256xf32>, i32 -> vector<1x256xf32>
      %c42 = arith.constant 42 : index
      %645 = memref.load %arg2[%c42] : memref<99xf32, #tpu.memory_space<smem>>
      %646 = vector.broadcast %645 : f32 to vector<1x256xf32>
      %647 = arith.mulf %646, %643 : vector<1x256xf32>
      %c91 = arith.constant 91 : index
      %648 = memref.load %arg2[%c91] : memref<99xf32, #tpu.memory_space<smem>>
      %649 = vector.broadcast %648 : f32 to vector<1x256xf32>
      %650 = arith.mulf %649, %644 : vector<1x256xf32>
      %651 = arith.addf %647, %650 : vector<1x256xf32>
      %cst_134 = arith.constant 0.000000e+00 : f32
      %652 = vector.broadcast %cst_134 : f32 to vector<1x256xf32>
      %653 = arith.select %642, %651, %652 : vector<1x256xi1>, vector<1x256xf32>
      %654 = arith.addf %636, %653 : vector<1x256xf32>
      %655 = arith.andi %641, %33 : vector<1x256xi1>
      %c210_i32 = arith.constant 210 : i32
      %656 = tpu.dynamic_rotate %20 by %c210_i32 dim 1 : vector<1x256xf32>, i32 -> vector<1x256xf32>
      %c210_i32_135 = arith.constant 210 : i32
      %657 = tpu.dynamic_rotate %21 by %c210_i32_135 dim 1 : vector<1x256xf32>, i32 -> vector<1x256xf32>
      %c43 = arith.constant 43 : index
      %658 = memref.load %arg2[%c43] : memref<99xf32, #tpu.memory_space<smem>>
      %659 = vector.broadcast %658 : f32 to vector<1x256xf32>
      %660 = arith.mulf %659, %656 : vector<1x256xf32>
      %c92 = arith.constant 92 : index
      %661 = memref.load %arg2[%c92] : memref<99xf32, #tpu.memory_space<smem>>
      %662 = vector.broadcast %661 : f32 to vector<1x256xf32>
      %663 = arith.mulf %662, %657 : vector<1x256xf32>
      %664 = arith.addf %660, %663 : vector<1x256xf32>
      %cst_136 = arith.constant 0.000000e+00 : f32
      %665 = vector.broadcast %cst_136 : f32 to vector<1x256xf32>
      %666 = arith.select %655, %664, %665 : vector<1x256xi1>, vector<1x256xf32>
      %667 = arith.addf %654, %666 : vector<1x256xf32>
      %668 = arith.andi %641, %38 : vector<1x256xi1>
      %c209_i32 = arith.constant 209 : i32
      %669 = tpu.dynamic_rotate %20 by %c209_i32 dim 1 : vector<1x256xf32>, i32 -> vector<1x256xf32>
      %c209_i32_137 = arith.constant 209 : i32
      %670 = tpu.dynamic_rotate %21 by %c209_i32_137 dim 1 : vector<1x256xf32>, i32 -> vector<1x256xf32>
      %c44 = arith.constant 44 : index
      %671 = memref.load %arg2[%c44] : memref<99xf32, #tpu.memory_space<smem>>
      %672 = vector.broadcast %671 : f32 to vector<1x256xf32>
      %673 = arith.mulf %672, %669 : vector<1x256xf32>
      %c93 = arith.constant 93 : index
      %674 = memref.load %arg2[%c93] : memref<99xf32, #tpu.memory_space<smem>>
      %675 = vector.broadcast %674 : f32 to vector<1x256xf32>
      %676 = arith.mulf %675, %670 : vector<1x256xf32>
      %677 = arith.addf %673, %676 : vector<1x256xf32>
      %cst_138 = arith.constant 0.000000e+00 : f32
      %678 = vector.broadcast %cst_138 : f32 to vector<1x256xf32>
      %679 = arith.select %668, %677, %678 : vector<1x256xi1>, vector<1x256xf32>
      %680 = arith.addf %667, %679 : vector<1x256xf32>
      %681 = arith.andi %641, %43 : vector<1x256xi1>
      %c208_i32 = arith.constant 208 : i32
      %682 = tpu.dynamic_rotate %20 by %c208_i32 dim 1 : vector<1x256xf32>, i32 -> vector<1x256xf32>
      %c208_i32_139 = arith.constant 208 : i32
      %683 = tpu.dynamic_rotate %21 by %c208_i32_139 dim 1 : vector<1x256xf32>, i32 -> vector<1x256xf32>
      %c45 = arith.constant 45 : index
      %684 = memref.load %arg2[%c45] : memref<99xf32, #tpu.memory_space<smem>>
      %685 = vector.broadcast %684 : f32 to vector<1x256xf32>
      %686 = arith.mulf %685, %682 : vector<1x256xf32>
      %c94 = arith.constant 94 : index
      %687 = memref.load %arg2[%c94] : memref<99xf32, #tpu.memory_space<smem>>
      %688 = vector.broadcast %687 : f32 to vector<1x256xf32>
      %689 = arith.mulf %688, %683 : vector<1x256xf32>
      %690 = arith.addf %686, %689 : vector<1x256xf32>
      %cst_140 = arith.constant 0.000000e+00 : f32
      %691 = vector.broadcast %cst_140 : f32 to vector<1x256xf32>
      %692 = arith.select %681, %690, %691 : vector<1x256xi1>, vector<1x256xf32>
      %693 = arith.addf %680, %692 : vector<1x256xf32>
      %694 = arith.andi %641, %48 : vector<1x256xi1>
      %c207_i32 = arith.constant 207 : i32
      %695 = tpu.dynamic_rotate %20 by %c207_i32 dim 1 : vector<1x256xf32>, i32 -> vector<1x256xf32>
      %c207_i32_141 = arith.constant 207 : i32
      %696 = tpu.dynamic_rotate %21 by %c207_i32_141 dim 1 : vector<1x256xf32>, i32 -> vector<1x256xf32>
      %c46 = arith.constant 46 : index
      %697 = memref.load %arg2[%c46] : memref<99xf32, #tpu.memory_space<smem>>
      %698 = vector.broadcast %697 : f32 to vector<1x256xf32>
      %699 = arith.mulf %698, %695 : vector<1x256xf32>
      %c95 = arith.constant 95 : index
      %700 = memref.load %arg2[%c95] : memref<99xf32, #tpu.memory_space<smem>>
      %701 = vector.broadcast %700 : f32 to vector<1x256xf32>
      %702 = arith.mulf %701, %696 : vector<1x256xf32>
      %703 = arith.addf %699, %702 : vector<1x256xf32>
      %cst_142 = arith.constant 0.000000e+00 : f32
      %704 = vector.broadcast %cst_142 : f32 to vector<1x256xf32>
      %705 = arith.select %694, %703, %704 : vector<1x256xi1>, vector<1x256xf32>
      %706 = arith.addf %693, %705 : vector<1x256xf32>
      %707 = arith.andi %641, %53 : vector<1x256xi1>
      %c206_i32 = arith.constant 206 : i32
      %708 = tpu.dynamic_rotate %20 by %c206_i32 dim 1 : vector<1x256xf32>, i32 -> vector<1x256xf32>
      %c206_i32_143 = arith.constant 206 : i32
      %709 = tpu.dynamic_rotate %21 by %c206_i32_143 dim 1 : vector<1x256xf32>, i32 -> vector<1x256xf32>
      %c47 = arith.constant 47 : index
      %710 = memref.load %arg2[%c47] : memref<99xf32, #tpu.memory_space<smem>>
      %711 = vector.broadcast %710 : f32 to vector<1x256xf32>
      %712 = arith.mulf %711, %708 : vector<1x256xf32>
      %c96 = arith.constant 96 : index
      %713 = memref.load %arg2[%c96] : memref<99xf32, #tpu.memory_space<smem>>
      %714 = vector.broadcast %713 : f32 to vector<1x256xf32>
      %715 = arith.mulf %714, %709 : vector<1x256xf32>
      %716 = arith.addf %712, %715 : vector<1x256xf32>
      %cst_144 = arith.constant 0.000000e+00 : f32
      %717 = vector.broadcast %cst_144 : f32 to vector<1x256xf32>
      %718 = arith.select %707, %716, %717 : vector<1x256xi1>, vector<1x256xf32>
      %719 = arith.addf %706, %718 : vector<1x256xf32>
      %720 = arith.andi %641, %58 : vector<1x256xi1>
      %c205_i32 = arith.constant 205 : i32
      %721 = tpu.dynamic_rotate %20 by %c205_i32 dim 1 : vector<1x256xf32>, i32 -> vector<1x256xf32>
      %c205_i32_145 = arith.constant 205 : i32
      %722 = tpu.dynamic_rotate %21 by %c205_i32_145 dim 1 : vector<1x256xf32>, i32 -> vector<1x256xf32>
      %c48 = arith.constant 48 : index
      %723 = memref.load %arg2[%c48] : memref<99xf32, #tpu.memory_space<smem>>
      %724 = vector.broadcast %723 : f32 to vector<1x256xf32>
      %725 = arith.mulf %724, %721 : vector<1x256xf32>
      %c97 = arith.constant 97 : index
      %726 = memref.load %arg2[%c97] : memref<99xf32, #tpu.memory_space<smem>>
      %727 = vector.broadcast %726 : f32 to vector<1x256xf32>
      %728 = arith.mulf %727, %722 : vector<1x256xf32>
      %729 = arith.addf %725, %728 : vector<1x256xf32>
      %cst_146 = arith.constant 0.000000e+00 : f32
      %730 = vector.broadcast %cst_146 : f32 to vector<1x256xf32>
      %731 = arith.select %720, %729, %730 : vector<1x256xi1>, vector<1x256xf32>
      %732 = arith.addf %719, %731 : vector<1x256xf32>
      %733 = arith.negf %732 : vector<1x256xf32>
      %734 = math.exp %733 : vector<1x256xf32>
      %cst_147 = arith.constant 1.000000e+00 : f32
      %735 = vector.broadcast %cst_147 : f32 to vector<1x256xf32>
      %736 = arith.addf %735, %734 : vector<1x256xf32>
      %737 = arith.divf %735, %736 : vector<1x256xf32>
      %c0_148 = arith.constant 0 : index
      %c0_149 = arith.constant 0 : index
      %c0_150 = arith.constant 0 : index
      %738 = vector.load %arg6[%c0_148, %c0_149, %c0_150] : memref<1x1x256xf32, #tpu.memory_space<vmem>>, vector<1x1x256xf32>
      %739 = vector.shape_cast %738 : vector<1x1x256xf32> to vector<1x256xf32>
      %740 = vector.shape_cast %737 : vector<1x256xf32> to vector<1x1x256xf32>
      tpu.vector_store %arg6[%c0_148, %c0_149, %c0_150], %740 {strides = array<i32>} : memref<1x1x256xf32, #tpu.memory_space<vmem>>, vector<1x1x256xf32>,
    } else {
    }
    return
  }
  func.func @transform_0(%arg0: i32, %arg1: i32, %arg2: memref<99xf32, #tpu.memory_space<smem>>) -> (i32, i32) {
    %c0_i32 = arith.constant 0 : i32
    %c0_i32_0 = arith.constant 0 : i32
    %c0_i32_1 = arith.constant 0 : i32
    return %c0_i32, %c0_i32_0 : i32, i32
  }
  func.func @transform_1(%arg0: i32, %arg1: i32, %arg2: memref<99xf32, #tpu.memory_space<smem>>) -> (i32, i32) {
    %c0_i32 = arith.constant 0 : i32
    %c0_i32_0 = arith.constant 0 : i32
    %c0_i32_1 = arith.constant 0 : i32
    return %c0_i32, %c0_i32_0 : i32, i32
  }
  func.func @transform_2(%arg0: i32, %arg1: i32, %arg2: memref<99xf32, #tpu.memory_space<smem>>) -> (i32, i32, i32) {
    %c0_i32 = arith.constant 0 : i32
    %c0_i32_0 = arith.constant 0 : i32
    return %arg0, %arg1, %c0_i32 : i32, i32, i32
  }
  func.func @transform_3(%arg0: i32, %arg1: i32, %arg2: memref<99xf32, #tpu.memory_space<smem>>) -> (i32, i32, i32) {
    %c0_i32 = arith.constant 0 : i32
    %c0_i32_0 = arith.constant 0 : i32
    %c0_i32_1 = arith.constant 0 : i32
    return %arg0, %c0_i32, %c0_i32_0 : i32, i32, i32
  }
}

</mosaic_0001>

<bundles_post_ra>
// kernel: tpu_custom_call.1
= control target key start
LH: loop header
LB: loop body
LE: loop exit
PB: predicated region body
PF: predicated region fallthrough
CT: control target
= control target key end

     0   :  { %s5398_s0 = inlined_call_operand.hbm [shape: f32[99], index: 0, kind: input, shape index: {}]   ;;  %s5399_s1 = inlined_call_operand.vmem [shape: s32[1,256], index: 1, kind: input, shape index: {}]   ;;  %s5400_s2 = inlined_call_operand.vmem [shape: s32[1,256], index: 2, kind: input, shape index: {}]   ;;  %s5401_s3 = inlined_call_operand.hbm [shape: f32[2,64,256], index: 3, kind: input, shape index: {}]   ;;  %s5402_s4 = inlined_call_operand.hbm [shape: f32[2,1,256], index: 4, kind: output, shape index: {}]  }
   0x1   :  { %5429 = sst [smem:[#allocation37_spill]] %s5401_s3  ;;  %s2877_s17 = scalar_lea.hbm %s5398_s0, 16 }
   0x2   :  { %5430 = sst [smem:[#allocation38_spill]] %s5402_s4  ;;  %p2878_p0 = scmp.ne.s32.totalorder %s5398_s0, %s2877_s17 }
   0x3   :  { %p2881_p1 = scmp.lt.u32.totalorder %s2877_s17, %s5398_s0 }
   0x5   :  { %p2883_p2 = pnand %p2881_p1, %p2878_p0 }
   0x7   :  { %2886 = shalt.err (!%p2883_p2)  }
   0x8   :  { %s3003_s22 = smov [#allocation5]  }
   0x9   :  { %10 = dma.hbm_to_smem %s5398_s0, 16, %s3003_s22, [#allocation4] }
   0xa   :  { %2969 = dma.done.wait [#allocation4], 16 }
   0xb   :  { %2970 = vsyncadd [#allocation4], 4294967280 }
   0xc   :  { %12 = sfence }
   0xd   :  { %13 = vsyncpa [#allocation7], 0 }
   0xe   :  { %15 = vsyncpa [#allocation7 + $0x1], 0 }
   0xf   :  { %16 = vsyncpa [#allocation8], 0 }
  0x10   :  { %18 = vsyncpa [#allocation8 + $0x1], 0  ;;  %s3096_s25 = smov 0   ;;  %s3098_s26 = smov 0  }
  0x11   :  { %s3100_s27 = smov 0   ;;  %s3102_s28 = smov 0  }
  0x12   :  { %s3104_s29 = smov 0   ;;  %s3106_s30 = smov 0  }
  0x13 LB: > { %5431 = sst [smem:[#allocation13_spill]] %s2981_s25  ;;  %s2638_s0 = sadd.s32 4294967295, %s3001_s30   ;;  %s3001_s30 = sphi %s3106_s30, %s24_s30   ;;  %s2997_s29 = sphi %s3104_s29, %s5581_s29   ;;  %s2993_s28 = sphi %s3102_s28, %s5580_s28   ;;  %s2989_s27 = sphi %s3100_s27, %s5579_s27   ;;  %s2985_s26 = sphi %s3098_s26, %s5578_s26   ;;  %s2981_s25 = sphi %s3096_s25, %s5577_s25  }
  0x14   : > { %5432 = sst [smem:[#allocation14_spill]] %s2985_s26  ;;  %s2639_s5 = sadd.s32 4294967294, %s3001_s30  }
  0x15   : > { %5433 = sst [smem:[#allocation15_spill]] %s2989_s27  ;;  %s36_s6 = sadd.s32 1, %s2997_s29 }
  0x16   : > { %5434 = sst [smem:[#allocation16_spill]] %s2993_s28  ;;  %s87_s7 = sadd.s32 1, %s2989_s27 }
  0x17   : > { %5435 = sst [smem:[#allocation17_spill]] %s2997_s29  ;;  %p38_p3 = scmp.ge.s32.totalorder %s36_s6, 2 }
  0x18   : > { %5436 = sst [smem:[#allocation18_spill]] %s3001_s30  ;;  %p94_p4 = scmp.ne.s32.totalorder %s2989_s27, %s2985_s26 }
  0x19   : > { %p95_p5 = scmp.eq.s32.totalorder %s3001_s30, 0  ;;  %p100_p6 = scmp.ne.s32.totalorder %s2985_s26, %s2981_s25 }
  0x1a   : > { %s5583_s6 = smov (%p38_p3, %s36_s6), 0  ;;  %p101_p8 = scmp.eq.s32.totalorder %s2638_s0, 0 }
  0x1b   : > { %5437 = sst [smem:[#allocation19_spill]] %s5583_s6  ;;  %p3137_p7 = por %p95_p5, %p94_p4 }
  0x1c   : > { %s82_s9 = ssub.s32 %s2997_s29, %s5583_s6  ;;  %p124_p9 = scmp.eq.s32.totalorder %s2638_s0, 1 }
  0x1d   : > { %p85_p10 = scmp.eq.s32.totalorder %s82_s9, 0  ;;  %p3143_p11 = por %p101_p8, %p100_p6 }
  0x1e   : > { %p3147_p12 = por %p124_p9, %p94_p4  ;;  %p130_p13 = scmp.eq.s32.totalorder %s2639_s5, 1 }
  0x1f   : > { %s3152_s12 = scalar_select %p85_p10, %s2989_s27, %s87_s7  }
  0x20   : > { %s5440_s11 = scalar_select %p3147_p12, 1, 0 }
  0x21   : > { %5442 = sst [smem:[#allocation21_spill]] %s3152_s12  ;;  %p3154_p0 = por %p130_p13, %p100_p6 }
  0x22   : > { %5441 = sst [smem:[#allocation20_spill]] %s5440_s11  ;;  %p2766_p2 = scmp.lt.s32.totalorder %s3001_s30, 2 }
  0x23   : > { %s5443_s13 = scalar_select %p3154_p0, 1, 0 }
  0x24   : > { %s156_s14 = sand.u32 1, %s2989_s27   ;;  %s2752_s16 = sshll.u32 %s2997_s29, 11 }
  0x25   : > { %5444 = sst [smem:[#allocation22_spill]] %s5443_s13  ;;  %s2642_s15 = sshll.u32 %s156_s14, 7 }
  0x26   : > { %s5445_s3 = sld [smem:[#allocation37_spill]]  ;;  %s160_s20 = scalar_lea.vmem [#allocation6], %s2642_s15 }
  0x27   : > { %s170_s21 = sshll.u32 %s160_s20, 4  ;;  %p3171_p3 = pnand %p2766_p2, %p3137_p7  ;;  %s3167_s21 = int_to_ptr.vmem [resolvable:$true] %s170_s21 }
  0x28   : > { %s3176_s23 = scalar_lea.sflag [#allocation7], %s156_s14 }
  0x29   : > { %p2889_p6 = pneg %p3171_p3 }
  0x2c   : > { %s3165_s19 = scalar_lea.hbm %s5445_s3, %s2752_s16  ;;  %s2892_s7 = scalar_lea.hbm %s5445_s3, 4096 }
  0x2d   : > { %s2887_s24 = scalar_lea.hbm %s3165_s19, 2048  ;;  %p2893_p7 = scmp.lt.u32.totalorder %s3165_s19, %s5445_s3 }
  0x2e   : > { %p2888_p5 = scmp.ne.s32.totalorder %s3165_s19, %s2887_s24  ;;  %p2894_p10 = scmp.lt.u32.totalorder %s2892_s7, %s2887_s24 }
  0x2f   : > { %p2896_p2 = scmp.lt.u32.totalorder %s2887_s24, %s3165_s19 }
  0x30   : > { %p2890_p8 = pnand %p2889_p6, %p2888_p5  ;;  %p2895_p13 = por %p2894_p10, %p2893_p7 }
  0x32   : > { %p2891_p9 = pneg %p2890_p8  ;;  %p2897_p1 = por %p2896_p2, %p2895_p13 }
  0x34   : > { %p2898_p4 = pnand %p2897_p1, %p2891_p9 }
  0x36   : > { %2901 = shalt.err (!%p2898_p4)
}
  0x37   : > { %s2902_s14 = scalar_lea.vmem %s3167_s21, 2048  ;;  %s3004_s15 = smov [#allocation6]  }
  0x38   : > { %p2903_p5 = scmp.ne.s32.totalorder %s3167_s21, %s2902_s14  ;;  %s2907_s16 = sshll.u32 %s3004_s15, 4  ;;  %s2908_s16 = int_to_ptr.vmem [resolvable:$false] %s2907_s16 }
  0x39   : > { %s2909_s17 = scalar_lea.vmem %s2908_s16, 4096  ;;  %p2910_p12 = scmp.lt.s32.totalorder %s3167_s21, %s2908_s16 }
  0x3a   : > { %p2905_p8 = pnand %p2903_p5, %p2889_p6  ;;  %p2911_p7 = scmp.lt.s32.totalorder %s2909_s17, %s2902_s14 }
  0x3c   : > { %p2906_p0 = pneg %p2905_p8  ;;  %p2912_p10 = por %p2911_p7, %p2910_p12 }
  0x3e   : > { %p2913_p13 = pnand %p2912_p10, %p2906_p0 }
  0x40   : > { %2916 = shalt.err (!%p2913_p13)
}
  0x41   : > { %s3005_s18 = smov 256   ;;  %s3006_s20 = smov 16  }
  0x42   : > { %2761 = dma.hbm_to_vmem [thread:$0]  (!%p3171_p3), %s3165_s19, 2048, %s3167_s21, %s3176_s23, %s3005_s18, %s3005_s18, %s3006_s20  }
  0x43   : > { %p178_p1 = scmp.lt.s32.totalorder %s3001_s30, 3  ;;  %p5447_p4 = scmp.ge.s32.totalorder %s3001_s30, 1 }
  0x45   : > { %p179_p6 = pnand %p5447_p4, %p178_p1 }
  0x47   : > { %182 = sbr.rel (%p179_p6) target bundleno = 680 (0x2a8), region = 32 }
  0x4e   : > { %s3208_s24 = sand.u32 1, %s2985_s26  }
  0x4f   : > { %s2646_s0 = sshll.u32 %s3208_s24, 7  ;;  %s185_s5 = scalar_lea.sflag [#allocation7], %s3208_s24 }
  0x50   : > { %s3212_s7 = scalar_lea.vmem [#allocation6], %s2646_s0 }
  0x51   : > { %2972 = dma.done.wait (%p3143_p11), %s185_s5, 2048  }
  0x52   : > { %2974 = vsyncadd (%p3143_p11), %s185_s5, 4294965248  ;;  %v216_v0 = vlaneseq  ;;  %v5448_v1 = vmov 0  ;;  %v3007_v2 = vmov -inf   ;;  %v3008_v3 = vmov 0.0   ;;  %v222_v4 = vld [vmem:[%s3212_s7] sm:$0xff]  ;;  %v223_v5 = vld [vmem:[%s3212_s7 + $0x8] sm:$0xff] }
  0x53   : > { %v224_v6 = vld [vmem:[%s3212_s7 + $0x10] sm:$0xff]  ;;  %v225_v7 = vld [vmem:[%s3212_s7 + $0x18] sm:$0xff]  ;;  %v226_v8 = vld [vmem:[%s3212_s7 + $0x20] sm:$0xff]  ;;  %v3009_v49 = vmov 1966171168   ;;  %s3010_s10 = smov 50  }
  0x54   : > { %vm3219_vm0 = vcmp.lt.s32.totalorder %v216_v0, 256  ;;  %v227_v9 = vld [vmem:[%s3212_s7 + $0x28] sm:$0xff]  ;;  %v239_v10 = vadd.f32 %v224_v6, %v222_v4  ;;  %v228_v11 = vld [vmem:[%s3212_s7 + $0x30] sm:$0xff]  ;;  %v229_v12 = vld [vmem:[%s3212_s7 + $0x38] sm:$0xff]  ;;  %v252_v14 = vadd.f32 %v225_v7, %v223_v5  ;;  %v290_v15 = vmax.f32 %v222_v4, %v226_v8  ;;  %s3011_s19 = smov 51   ;;  %s3012_s21 = smov 49  }
  0x55   : > { %v5449_v1 = vsel %vm3219_vm0, 4294967295, %v5448_v1  ;;  %221 = vst.msk [vmem:[#allocation3] sm:$0x3] %vm3219_vm0, %v3007_v2  ;;  %220 = vst.msk [vmem:[#allocation2] sm:$0x3] %vm3219_vm0, %v3008_v3  ;;  %v230_v13 = vld [vmem:[%s3212_s7 + $0x40] sm:$0xff]  ;;  %v303_v16 = vmax.f32 %v223_v5, %v227_v9  ;;  %v291_v21 = vmax.f32 %v224_v6, %v228_v11  ;;  %v304_v22 = vmax.f32 %v225_v7, %v229_v12 }
  0x56   : > { %5450 = vst [vmem:[#allocation23_spill] sm:$0xff] %v5449_v1  ;;  %v231_v17 = vld [vmem:[%s3212_s7 + $0x48] sm:$0xff]  ;;  %v232_v18 = vld [vmem:[%s3212_s7 + $0x50] sm:$0xff]  ;;  %v233_v19 = vld [vmem:[%s3212_s7 + $0x58] sm:$0xff]  ;;  %v240_v20 = vadd.f32 %v239_v10, %v226_v8  ;;  %v253_v26 = vadd.f32 %v252_v14, %v227_v9  ;;  %v292_v27 = vmax.f32 %v290_v15, %v230_v13  ;;  %v269_v50 = vunpack.c.l.s4 %v3009_v49  ;;  %s3013_s22 = smov 48   ;;  %s3014_s23 = smov 47  }
  0x57   : > { %v234_v23 = vld [vmem:[%s3212_s7 + $0x60] sm:$0xff]  ;;  %v235_v24 = vld [vmem:[%s3212_s7 + $0x68] sm:$0xff]  ;;  %v236_v25 = vld [vmem:[%s3212_s7 + $0x70] sm:$0xff]  ;;  %v305_v28 = vmax.f32 %v303_v16, %v231_v17  ;;  %v293_v31 = vmax.f32 %v291_v21, %v232_v18  ;;  %v306_v32 = vmax.f32 %v304_v22, %v233_v19  ;;  %v272_v58 = vshrl.u32 %v216_v0, 7  ;;  %s3015_s8 = smov 46   ;;  %s3016_s9 = smov 45  }
  0x58   : > { %v237_v29 = vld [vmem:[%s3212_s7 + $0x78] sm:$0xff]  ;;  %v241_v30 = vadd.f32 %v240_v20, %v228_v11  ;;  %v254_v33 = vadd.f32 %v253_v26, %v229_v12  ;;  %v294_v34 = vmax.f32 %v292_v27, %v234_v23  ;;  %v270_v60 = vunpack.c.0.s8 %v269_v50  ;;  %s3017_s14 = smov 35   ;;  %s3018_s15 = smov 34  }
  0x59   : > { %v307_v35 = vmax.f32 %v305_v28, %v235_v24  ;;  %v295_v37 = vmax.f32 %v293_v31, %v236_v25  ;;  %v308_v38 = vmax.f32 %v306_v32, %v237_v29  ;;  %v379_v26 = vsub.s32 1, %v272_v58  ;;  %s3019_s16 = smov 33   ;;  %s3020_s17 = smov 32  }
  0x5a   : > { %v242_v36 = vadd.f32 %v241_v30, %v230_v13  ;;  %v255_v39 = vadd.f32 %v254_v33, %v231_v17  ;;  %v3244_v7 = vsub.s32 %v270_v60, %v272_v58  ;;  %s3021_s18 = smov 31   ;;  %s3022_s20 = smov 30  }
  0x5b   : > { %v296_v41 = vmax.f32 %v294_v34, %v295_v37  ;;  %v309_v42 = vmax.f32 %v307_v35, %v308_v38  ;;  %s3023_s0 = smov 29   ;;  %s3024_s5 = smov 19  }
  0x5c   : > { %v243_v40 = vadd.f32 %v242_v36, %v232_v18  ;;  %v256_v43 = vadd.f32 %v255_v39, %v233_v19  ;;  %v289_v17 = vld [vmem:[#allocation3] sm:$0x3]  ;;  %v238_v22 = vld [vmem:[#allocation2] sm:$0x3]  ;;  %s3025_s7 = smov 18   ;;  %s3484_s3 = sld [smem:[#allocation5 + $0x7]] }
  0x5d   : > { %v297_v45 = vrot.slane %v296_v41, 4  ;;  %v310_v46 = vrot.slane %v309_v42, 4  ;;  %s3486_s6 = sld [smem:[#allocation5 + $0x38]]  ;;  %s3035_s29 = smov 126  }
  0x5e   : > { %v244_v44 = vadd.f32 %v243_v40, %v234_v23  ;;  %v257_v47 = vadd.f32 %v256_v43, %v235_v24  ;;  %s3494_s12 = sld [smem:[#allocation5 + $0x39]]  ;;  %s3499_s26 = sld [smem:[#allocation5 + $0x3a]] }
  0x5f   : > { %v298_v51 = vmax.f32 %v296_v41, %v297_v45  ;;  %v311_v52 = vmax.f32 %v309_v42, %v310_v46  ;;  %s3497_s27 = sld [smem:[#allocation5 + $0x9]]  ;;  %s3505_s30 = sld [smem:[#allocation5 + $0xa]] }
  0x60   : > { %v245_v48 = vadd.f32 %v244_v44, %v236_v25  ;;  %v258_v53 = vadd.f32 %v257_v47, %v237_v29  ;;  %v375_v25 = vsub.s32 0, %v272_v58  ;;  %s3507_s13 = sld [smem:[#allocation5 + $0x3b]]  ;;  %s3512_s4 = sld [smem:[#allocation5 + $0x3c]] }
  0x61   : > { %v299_v55 = vrot.slane %v298_v51, 2  ;;  %v312_v56 = vrot.slane %v311_v52, 2  ;;  %s3509_s25 = sld [smem:[#allocation5 + $0xb]]  ;;  %s3675_s28 = sld [smem:[#allocation5 + $0xd]] }
  0x62   : > { %v246_v54 = vrot.slane %v245_v48, 4  ;;  %v259_v57 = vrot.slane %v258_v53, 4  ;;  %s3679_s11 = sld [smem:[#allocation5 + $0x3e]] }
  0x63   : > { %v300_v61 = vmax.f32 %v298_v51, %v299_v55  ;;  %v313_v62 = vmax.f32 %v311_v52, %v312_v56 }
  0x64   : > { %v247_v59 = vadd.f32 %v246_v54, %v245_v48  ;;  %v260_v63 = vadd.f32 %v259_v57, %v258_v53 }
  0x65   : > { %v301_v3 = vrot.slane %v300_v61, 1  ;;  %v314_v4 = vrot.slane %v313_v62, 1 }
  0x66   : > { %v248_v2 = vrot.slane %v247_v59, 2  ;;  %v261_v5 = vrot.slane %v260_v63, 2 }
  0x67   : > { %v302_v8 = vmax.f32 %v300_v61, %v301_v3  ;;  %v315_v9 = vmax.f32 %v313_v62, %v314_v4 }
  0x68   : > { %v249_v6 = vadd.f32 %v248_v2, %v247_v59  ;;  %v262_v10 = vadd.f32 %v261_v5, %v260_v63 }
  0x69   : > { %v318_v12 = vcombine.low %v302_v8, %v315_v9 }
  0x6a   : > { %v250_v11 = vrot.slane %v249_v6, 1  ;;  %v263_v13 = vrot.slane %v262_v10, 1 }
  0x6b   : > { %v325_v15 = vrot.slane %v318_v12, %v3244_v7 }
  0x6c   : > { %v251_v14 = vadd.f32 %v250_v11, %v249_v6  ;;  %v264_v16 = vadd.f32 %v263_v13, %v262_v10 }
  0x6d   : > { %v332_v18 = vrot.slane %v325_v15, %v3244_v7 }
  0x6e   : > { %v267_v19 = vcombine.low %v251_v14, %v264_v16 }
  0x6f   : > { %v334_v20 = vmax.f32 %v289_v17, %v332_v18  ;;  %v3490_v17 = vand.u32 127, %v216_v0 }
  0x70   : > { %v274_v21 = vrot.slane %v267_v19, %v3244_v7 }
  0x71   : > { %335 = vst.msk [vmem:[#allocation3] sm:$0x3] %vm3219_vm0, %v334_v20  ;;  %vm389_vm1 = vcmp.lt.s32.totalorder %v3490_v17, 51  ;;  %vm444_vm2 = vcmp.lt.s32.totalorder %v3490_v17, 50  ;;  %vm488_vm3 = vcmp.lt.s32.totalorder %v3490_v17, 49  ;;  %vm532_vm4 = vcmp.lt.s32.totalorder %v3490_v17, 48 }
  0x72   : > { %v281_v23 = vrot.slane %v274_v21, %v3244_v7  ;;  %vm576_vm5 = vcmp.lt.s32.totalorder %v3490_v17, 47  ;;  %vm620_vm6 = vcmp.lt.s32.totalorder %v3490_v17, 46  ;;  %vm664_vm7 = vcmp.lt.s32.totalorder %v3490_v17, 45 }
  0x73   : > { %vm711_vm14 = vcmp.lt.s32.totalorder %v3490_v17, 35 }
  0x74   : > { %v283_v24 = vadd.f32 %v281_v23, %v238_v22  ;;  %v3611_v22 = vld [vmem:[%s5400_s2] sm:$0x3] }
  0x75   : > { %vm344_vm8 = vcmp.ge.s32.totalorder %v3611_v22, 3  ;;  %vm345_vm9 = vcmp.lt.s32.totalorder %v3611_v22, 19  ;;  %vm347_vm12 = vcmp.ge.s32.totalorder %v3611_v22, 2  ;;  %vm348_vm13 = vcmp.lt.s32.totalorder %v3611_v22, 18 }
  0x76   : > { %288 = vst.msk [vmem:[#allocation2] sm:$0x3] %vm3219_vm0, %v283_v24  ;;  %vm350_vm15 = vcmp.ge.s32.totalorder %v3611_v22, 1 }
  0x78   : > { %v341_v27 = vld [vmem:[#allocation3] sm:$0x3] }
  0x79   : > { %v3254_v28 = vrot.slane %v341_v27, %v375_v25  ;;  %v3258_v29 = vrot.slane %v341_v27, %v379_v26 }
  0x7b   : > { %447 = vrot.lane.b32.xlu0 %v3254_v28, %s3010_s10  ;;  %403 = vrot.lane.b32.xlu1 %v3254_v28, %s3011_s19 }
  0x7d   : > { %v339_v30 = vld [vmem:[#allocation2] sm:$0x3] }
  0x7e   : > { %v3268_v31 = vmul.f32 0.015625, %v339_v30 }
  0x7f   : > { %491 = vrot.lane.b32.xlu0 %v3254_v28, %s3012_s21  ;;  %405 = vrot.lane.b32.xlu1 %v3258_v29, %s3011_s19 }
  0x80   : > { %5451 = vst [vmem:[#allocation24_spill] sm:$0xff] %v3268_v31  ;;  %v3273_v32 = vrot.slane %v3268_v31, %v375_v25  ;;  %v3278_v33 = vrot.slane %v3268_v31, %v379_v26 }
  0x83   : > { %535 = vrot.lane.b32.xlu0 %v3254_v28, %s3013_s22  ;;  %449 = vrot.lane.b32.xlu1 %v3258_v29, %s3010_s10 }
  0x87   : > { %579 = vrot.lane.b32.xlu0 %v3254_v28, %s3014_s23  ;;  %493 = vrot.lane.b32.xlu1 %v3258_v29, %s3012_s21 }
  0x8b   : > { %623 = vrot.lane.b32.xlu0 %v3254_v28, %s3015_s8  ;;  %537 = vrot.lane.b32.xlu1 %v3258_v29, %s3013_s22 }
  0x8f   : > { %667 = vrot.lane.b32.xlu0 %v3254_v28, %s3016_s9  ;;  %581 = vrot.lane.b32.xlu1 %v3258_v29, %s3014_s23 }
  0x93   : > { %625 = vrot.lane.b32.xlu1 %v3258_v29, %s3015_s8  ;;  %383 = vrot.lane.b32.xlu0 %v3273_v32, %s3011_s19 }
  0x97   : > { %669 = vrot.lane.b32.xlu1 %v3258_v29, %s3016_s9  ;;  %385 = vrot.lane.b32.xlu0 %v3278_v33, %s3011_s19  ;;  %s3027_s19 = smov 16  }
  0x9b   : > { %442 = vrot.lane.b32.xlu1 %v3278_v33, %s3010_s10  ;;  %440 = vrot.lane.b32.xlu0 %v3273_v32, %s3010_s10  ;;  %s3026_s10 = smov 17  }
  0x9f   : > { %486 = vrot.lane.b32.xlu1 %v3278_v33, %s3012_s21  ;;  %484 = vrot.lane.b32.xlu0 %v3273_v32, %s3012_s21  ;;  %s3028_s21 = smov 15  }
  0xa3   : > { %530 = vrot.lane.b32.xlu1 %v3278_v33, %s3013_s22  ;;  %528 = vrot.lane.b32.xlu0 %v3273_v32, %s3013_s22  ;;  %s3029_s22 = smov 14  }
  0xa7   : > { %574 = vrot.lane.b32.xlu1 %v3278_v33, %s3014_s23  ;;  %572 = vrot.lane.b32.xlu0 %v3273_v32, %s3014_s23  ;;  %s3030_s23 = smov 13  }
  0xab   : > { %618 = vrot.lane.b32.xlu1 %v3278_v33, %s3015_s8  ;;  %616 = vrot.lane.b32.xlu0 %v3273_v32, %s3015_s8  ;;  %s3031_s8 = smov 3  }
  0xaf   : > { %662 = vrot.lane.b32.xlu1 %v3278_v33, %s3016_s9  ;;  %660 = vrot.lane.b32.xlu0 %v3273_v32, %s3016_s9  ;;  %s3032_s9 = smov 2  }
  0xb3   : > { %709 = vrot.lane.b32.xlu1 %v3278_v33, %s3017_s14  ;;  %707 = vrot.lane.b32.xlu0 %v3273_v32, %s3017_s14 }
  0xb7   : > { %716 = vrot.lane.b32.xlu1 %v3258_v29, %s3017_s14  ;;  %714 = vrot.lane.b32.xlu0 %v3254_v28, %s3017_s14  ;;  %s3033_s14 = smov 1  }
  0xbb   : > { %753 = vrot.lane.b32.xlu1 %v3278_v33, %s3018_s15  ;;  %751 = vrot.lane.b32.xlu0 %v3273_v32, %s3018_s15 }
  0xbf   : > { %760 = vrot.lane.b32.xlu1 %v3258_v29, %s3018_s15  ;;  %758 = vrot.lane.b32.xlu0 %v3254_v28, %s3018_s15  ;;  %s3442_s15 = sld [smem:[#allocation5 + $0x31]] }
  0xc3   : > { %797 = vrot.lane.b32.xlu1 %v3278_v33, %s3019_s16  ;;  %795 = vrot.lane.b32.xlu0 %v3273_v32, %s3019_s16 }
  0xc5   : > { %v414_v0 = vstv %s3442_s15  ;;  %s3531_s15 = sld [smem:[#allocation5 + $0x3d]] }
  0xc7   : > { %804 = vrot.lane.b32.xlu1 %v3258_v29, %s3019_s16  ;;  %802 = vrot.lane.b32.xlu0 %v3254_v28, %s3019_s16  ;;  %s3444_s16 = sld [smem:[#allocation5 + $0x32]] }
  0xcb   : > { %841 = vrot.lane.b32.xlu1 %v3278_v33, %s3020_s17  ;;  %839 = vrot.lane.b32.xlu0 %v3273_v32, %s3020_s17 }
  0xcd   : > { %v458_v20 = vstv %s3444_s16  ;;  %s3036_s16 = smov 125  }
  0xcf   : > { %848 = vrot.lane.b32.xlu1 %v3258_v29, %s3020_s17  ;;  %846 = vrot.lane.b32.xlu0 %v3254_v28, %s3020_s17  ;;  %s3034_s17 = smov 127  }
  0xd3   : > { %885 = vrot.lane.b32.xlu1 %v3278_v33, %s3021_s18  ;;  %883 = vrot.lane.b32.xlu0 %v3273_v32, %s3021_s18 }
  0xd7   : > { %892 = vrot.lane.b32.xlu1 %v3258_v29, %s3021_s18  ;;  %890 = vrot.lane.b32.xlu0 %v3254_v28, %s3021_s18  ;;  %s3447_s18 = sld [smem:[#allocation5 + $0x33]] }
  0xdb   : > { %929 = vrot.lane.b32.xlu1 %v3278_v33, %s3022_s20  ;;  %927 = vrot.lane.b32.xlu0 %v3273_v32, %s3022_s20 }
  0xdf   : > { %936 = vrot.lane.b32.xlu1 %v3258_v29, %s3022_s20  ;;  %934 = vrot.lane.b32.xlu0 %v3254_v28, %s3022_s20  ;;  %s3449_s20 = sld [smem:[#allocation5 + $0x34]] }
  0xe3   : > { %973 = vrot.lane.b32.xlu1 %v3278_v33, %s3023_s0  ;;  %971 = vrot.lane.b32.xlu0 %v3273_v32, %s3023_s0 }
  0xe7   : > { %980 = vrot.lane.b32.xlu1 %v3258_v29, %s3023_s0  ;;  %978 = vrot.lane.b32.xlu0 %v3254_v28, %s3023_s0  ;;  %s3452_s0 = sld [smem:[#allocation5 + $0x35]] }
  0xeb   : > { %1020 = vrot.lane.b32.xlu1 %v3278_v33, %s3024_s5  ;;  %1018 = vrot.lane.b32.xlu0 %v3273_v32, %s3024_s5 }
  0xed   : > { %v3324_v34 = vpop.permute.xlu0 %447  ;;  %v3326_v35 = vpop.permute.xlu1 %403 }
  0xef   : > { %1027 = vrot.lane.b32.xlu1 %v3258_v29, %s3024_s5  ;;  %1025 = vrot.lane.b32.xlu0 %v3254_v28, %s3024_s5  ;;  %s3454_s5 = sld [smem:[#allocation5 + $0x36]] }
  0xf1   : > { %v3330_v36 = vpop.permute.xlu0 %491  ;;  %v3332_v37 = vpop.permute.xlu1 %405 }
  0xf3   : > { %1064 = vrot.lane.b32.xlu1 %v3278_v33, %s3025_s7  ;;  %1062 = vrot.lane.b32.xlu0 %v3273_v32, %s3025_s7 }
  0xf5   : > { %v3336_v38 = vpop.permute.xlu0 %535  ;;  %v3338_v39 = vpop.permute.xlu1 %449 }
  0xf6   : > { %v451_v26 = vsel %vm444_vm2, %v3324_v34, %v3338_v39 }
  0xf7   : > { %1071 = vrot.lane.b32.xlu1 %v3258_v29, %s3025_s7  ;;  %1069 = vrot.lane.b32.xlu0 %v3254_v28, %s3025_s7  ;;  %s3460_s7 = sld [smem:[#allocation5 + $0x37]] }
  0xf9   : > { %v3342_v40 = vpop.permute.xlu0 %579  ;;  %v3344_v41 = vpop.permute.xlu1 %493 }
  0xfb   : > { %1108 = vrot.lane.b32.xlu1 %v3278_v33, %s3026_s10  ;;  %1106 = vrot.lane.b32.xlu0 %v3273_v32, %s3026_s10 }
  0xfd   : > { %v3348_v42 = vpop.permute.xlu0 %623  ;;  %v3350_v43 = vpop.permute.xlu1 %537 }
  0xff   : > { %1115 = vrot.lane.b32.xlu1 %v3258_v29, %s3026_s10  ;;  %1113 = vrot.lane.b32.xlu0 %v3254_v28, %s3026_s10  ;;  %s3462_s10 = sld [smem:[#allocation5]] }
 0x101   : > { %v3354_v44 = vpop.permute.xlu0 %667  ;;  %v3356_v45 = vpop.permute.xlu1 %581 }
 0x103   : > { %1152 = vrot.lane.b32.xlu1 %v3278_v33, %s3027_s19  ;;  %1150 = vrot.lane.b32.xlu0 %v3273_v32, %s3027_s19 }
 0x105   : > { %v3360_v46 = vpop.permute.xlu1 %625  ;;  %v3362_v47 = vpop.permute.xlu0 %383  ;;  %v410_v30 = vstv %s3462_s10  ;;  %s3045_s10 = smov 98  }
 0x107   : > { %1159 = vrot.lane.b32.xlu1 %v3258_v29, %s3027_s19  ;;  %1157 = vrot.lane.b32.xlu0 %v3254_v28, %s3027_s19  ;;  %s3464_s19 = sld [smem:[#allocation5 + $0x62]] }
 0x109   : > { %v3366_v48 = vpop.permute.xlu1 %669  ;;  %v3368_v49 = vpop.permute.xlu0 %385 }
 0x10b   : > { %1196 = vrot.lane.b32.xlu1 %v3278_v33, %s3028_s21  ;;  %1194 = vrot.lane.b32.xlu0 %v3273_v32, %s3028_s21 }
 0x10d   : > { %v3372_v50 = vpop.permute.xlu1 %442  ;;  %v3374_v51 = vpop.permute.xlu0 %440 }
 0x10f   : > { %1203 = vrot.lane.b32.xlu1 %v3258_v29, %s3028_s21  ;;  %1201 = vrot.lane.b32.xlu0 %v3254_v28, %s3028_s21  ;;  %s3466_s21 = sld [smem:[#allocation5 + $0x1]] }
 0x111   : > { %v3378_v52 = vpop.permute.xlu1 %486  ;;  %v3380_v53 = vpop.permute.xlu0 %484 }
 0x113   : > { %1240 = vrot.lane.b32.xlu1 %v3278_v33, %s3029_s22  ;;  %1238 = vrot.lane.b32.xlu0 %v3273_v32, %s3029_s22 }
 0x115   : > { %v3384_v54 = vpop.permute.xlu1 %530  ;;  %v3386_v55 = vpop.permute.xlu0 %528  ;;  %v454_v21 = vstv %s3466_s21  ;;  %s4518_s21 = sld [smem:[#allocation5 + $0x16]] }
 0x117   : > { %1247 = vrot.lane.b32.xlu1 %v3258_v29, %s3029_s22  ;;  %1245 = vrot.lane.b32.xlu0 %v3254_v28, %s3029_s22  ;;  %s3469_s22 = sld [smem:[#allocation5 + $0x2]] }
 0x119   : > { %v3390_v56 = vpop.permute.xlu1 %574  ;;  %v3392_v57 = vpop.permute.xlu0 %572 }
 0x11b   : > { %1284 = vrot.lane.b32.xlu1 %v3278_v33, %s3030_s23  ;;  %1282 = vrot.lane.b32.xlu0 %v3273_v32, %s3030_s23 }
 0x11d   : > { %v3396_v58 = vpop.permute.xlu1 %618  ;;  %v3398_v59 = vpop.permute.xlu0 %616 }
 0x11f   : > { %1291 = vrot.lane.b32.xlu1 %v3258_v29, %s3030_s23  ;;  %1289 = vrot.lane.b32.xlu0 %v3254_v28, %s3030_s23  ;;  %s3472_s23 = sld [smem:[#allocation5 + $0x3]] }
 0x121   : > { %v3402_v60 = vpop.permute.xlu1 %662  ;;  %v3404_v61 = vpop.permute.xlu0 %660 }
 0x123   : > { %1331 = vrot.lane.b32.xlu1 %v3278_v33, %s3031_s8  ;;  %1329 = vrot.lane.b32.xlu0 %v3273_v32, %s3031_s8 }
 0x125   : > { %v3408_v62 = vpop.permute.xlu1 %709  ;;  %v3410_v63 = vpop.permute.xlu0 %707 }
 0x127   : > { %1338 = vrot.lane.b32.xlu1 %v3258_v29, %s3031_s8  ;;  %1336 = vrot.lane.b32.xlu0 %v3254_v28, %s3031_s8  ;;  %s3474_s8 = sld [smem:[#allocation5 + $0x4]] }
 0x129   : > { %v3414_v2 = vpop.permute.xlu1 %716  ;;  %v3416_v3 = vpop.permute.xlu0 %714 }
 0x12b   : > { %1375 = vrot.lane.b32.xlu1 %v3278_v33, %s3032_s9  ;;  %1373 = vrot.lane.b32.xlu0 %v3273_v32, %s3032_s9 }
 0x12d   : > { %v3420_v4 = vpop.permute.xlu1 %753  ;;  %v3422_v5 = vpop.permute.xlu0 %751 }
 0x12f   : > { %1382 = vrot.lane.b32.xlu1 %v3258_v29, %s3032_s9  ;;  %1380 = vrot.lane.b32.xlu0 %v3254_v28, %s3032_s9  ;;  %s3480_s9 = sld [smem:[#allocation5 + $0x5]] }
 0x131   : > { %v3426_v6 = vpop.permute.xlu1 %760  ;;  %v3428_v8 = vpop.permute.xlu0 %758 }
 0x133   : > { %1419 = vrot.lane.b32.xlu1 %v3278_v33, %s3033_s14  ;;  %1417 = vrot.lane.b32.xlu0 %v3273_v32, %s3033_s14 }
 0x135   : > { %v3432_v9 = vpop.permute.xlu1 %797  ;;  %v3434_v10 = vpop.permute.xlu0 %795 }
 0x137   : > { %1426 = vrot.lane.b32.xlu1 %v3258_v29, %s3033_s14  ;;  %1424 = vrot.lane.b32.xlu0 %v3254_v28, %s3033_s14  ;;  %s3482_s14 = sld [smem:[#allocation5 + $0x6]] }
 0x139   : > { %v3438_v11 = vpop.permute.xlu1 %804  ;;  %v3440_v12 = vpop.permute.xlu0 %802 }
 0x13b   : > { %1473 = vrot.lane.b32.xlu1 %v3278_v33, %s3034_s17  ;;  %1471 = vrot.lane.b32.xlu0 %v3273_v32, %s3034_s17 }
 0x13d   : > { %v3456_v13 = vpop.permute.xlu1 %841  ;;  %v3458_v14 = vpop.permute.xlu0 %839 }
 0x13e   : > { %5452 = vst [vmem:[#allocation25_spill] sm:$0xff] %v3456_v13  ;;  %5453 = vst [vmem:[#allocation26_spill] sm:$0xff] %v3458_v14  ;;  %v408_v14 = vsel %vm389_vm1, %v3332_v37, %v3326_v35  ;;  %v495_v13 = vsel %vm488_vm3, %v3330_v36, %v3344_v41 }
 0x13f   : > { %1480 = vrot.lane.b32.xlu1 %v3258_v29, %s3034_s17  ;;  %1478 = vrot.lane.b32.xlu0 %v3254_v28, %s3034_s17  ;;  %s3492_s17 = sld [smem:[#allocation5 + $0x8]]  ;;  %v415_v31 = vmul.f32 %v414_v0, %v408_v14 }
 0x141   : > { %v3476_v15 = vpop.permute.xlu1 %848  ;;  %v3478_v16 = vpop.permute.xlu0 %846 }
 0x142   : > { %5454 = vst [vmem:[#allocation27_spill] sm:$0xff] %v3476_v15  ;;  %5455 = vst [vmem:[#allocation28_spill] sm:$0xff] %v3478_v16  ;;  %v452_v15 = vsel %vm444_vm2, %v3338_v39, %v3324_v34  ;;  %v390_v16 = vsel %vm389_vm1, %v3362_v47, %v3368_v49  ;;  %v446_v34 = vsel %vm444_vm2, %v3372_v50, %v3374_v51 }
 0x143   : > { %1517 = vrot.lane.b32.xlu1 %v3278_v33, %s3035_s29  ;;  %1515 = vrot.lane.b32.xlu0 %v3273_v32, %s3035_s29  ;;  %v455_v14 = vmul.f32 %v454_v21, %v446_v34 }
 0x145   : > { %v3501_v18 = vpop.permute.xlu1 %885  ;;  %v3503_v19 = vpop.permute.xlu0 %883 }
 0x146   : > { %5456 = vst [vmem:[#allocation29_spill] sm:$0xff] %v3501_v18  ;;  %5457 = vst [vmem:[#allocation30_spill] sm:$0xff] %v3503_v19  ;;  %v407_v18 = vsel %vm389_vm1, %v3326_v35, %v3332_v37  ;;  %v391_v35 = vsel %vm389_vm1, %v3368_v49, %v3362_v47  ;;  %v445_v37 = vsel %vm444_vm2, %v3374_v51, %v3372_v50  ;;  %vm351_vm1 = vcmp.lt.s32.totalorder %v3611_v22, 17 }
 0x147   : > { %1524 = vrot.lane.b32.xlu1 %v3258_v29, %s3035_s29  ;;  %1522 = vrot.lane.b32.xlu0 %v3254_v28, %s3035_s29  ;;  %s3529_s29 = sld [smem:[#allocation5 + $0xc]]  ;;  %v496_v47 = vsel %vm488_vm3, %v3344_v41, %v3330_v36  ;;  %v416_v50 = vmul.f32 %v414_v0, %v407_v18  ;;  %v459_v51 = vmul.f32 %v458_v20, %v452_v15  ;;  %v3618_v36 = vld [vmem:[%s5399_s1] sm:$0x3]  ;;  %v5462_v15 = vstv %s3447_s18  ;;  %s3706_s18 = sld [smem:[#allocation5 + $0xe]] }
 0x148   : > { %v460_v19 = vmul.f32 %v458_v20, %v451_v26  ;;  %v411_v41 = vmul.f32 %v410_v30, %v391_v35  ;;  %v412_v49 = vmul.f32 %v410_v30, %v390_v16  ;;  %v456_v18 = vmul.f32 %v454_v21, %v445_v37 }
 0x149   : > { %v3521_v23 = vpop.permute.xlu1 %892  ;;  %v3523_v24 = vpop.permute.xlu0 %890  ;;  %v503_v0 = vmul.f32 %v5462_v15, %v496_v47  ;;  %v5463_v20 = vmov %v5462_v15  ;;  %v540_v35 = vsel %vm532_vm4, %v3350_v43, %v3336_v38  ;;  %v534_v30 = vsel %vm532_vm4, %v3384_v54, %v3386_v55 }
 0x14a   : > { %5458 = vst [vmem:[#allocation31_spill] sm:$0xff] %v3521_v23  ;;  %5459 = vst [vmem:[#allocation32_spill] sm:$0xff] %v3523_v24  ;;  %v504_v26 = vmul.f32 %v5463_v20, %v495_v13  ;;  %v539_v23 = vsel %vm532_vm4, %v3336_v38, %v3350_v43  ;;  %v489_v13 = vsel %vm488_vm3, %v3380_v53, %v3378_v52  ;;  %vm368_vm10 = vcmp.ge.s32.totalorder %v3618_v36, 3 }
 0x14b   : > { %1561 = vrot.lane.b32.xlu1 %v3278_v33, %s3036_s16  ;;  %1559 = vrot.lane.b32.xlu0 %v3273_v32, %s3036_s16  ;;  %v490_v38 = vsel %vm488_vm3, %v3378_v52, %v3380_v53  ;;  %v533_v43 = vsel %vm532_vm4, %v3386_v55, %v3384_v54  ;;  %v583_v37 = vsel %vm576_vm5, %v3342_v40, %v3356_v45  ;;  %vm369_vm11 = vcmp.lt.s32.totalorder %v3618_v36, 19 }
 0x14c   : > { %v584_v52 = vsel %vm576_vm5, %v3356_v45, %v3342_v40  ;;  %v577_v53 = vsel %vm576_vm5, %v3392_v57, %v3390_v56  ;;  %v578_v54 = vsel %vm576_vm5, %v3390_v56, %v3392_v57  ;;  %v417_v40 = vadd.f32 %v415_v31, %v411_v41  ;;  %vm3783_vm5 = vmand %vm344_vm8, %vm345_vm9 }
 0x14d   : > { %v3547_v1 = vpop.permute.xlu1 %929  ;;  %v3549_v24 = vpop.permute.xlu0 %927  ;;  %v418_v45 = vadd.f32 %v416_v50, %v412_v49  ;;  %v461_v55 = vadd.f32 %v459_v51, %v455_v14  ;;  %v462_v56 = vadd.f32 %v460_v19, %v456_v18  ;;  %v5466_v57 = vstv %s3469_s22  ;;  %s3746_s22 = sld [smem:[#allocation5 + $0xf]]  ;;  %vm3809_vm9 = vmand %vm347_vm12, %vm348_vm13 }
 0x14e   : > { %5460 = vst [vmem:[#allocation33_spill] sm:$0xff] %v3547_v1  ;;  %5461 = vst [vmem:[#allocation34_spill] sm:$0xff] %v3549_v24  ;;  %v499_v34 = vmul.f32 %v5466_v57, %v490_v38  ;;  %v5467_v47 = vmov %v5466_v57  ;;  %v5468_v20 = vstv %s3472_s23  ;;  %v5472_v19 = vstv %s3474_s8  ;;  %s4256_s23 = sld [smem:[#allocation5 + $0x44]] }
 0x14f   : > { %1568 = vrot.lane.b32.xlu1 %v3258_v29, %s3036_s16  ;;  %1566 = vrot.lane.b32.xlu0 %v3254_v28, %s3036_s16  ;;  %s3037_s16 = smov 115   ;;  %v500_v15 = vmul.f32 %v5467_v47, %v489_v13  ;;  %v543_v25 = vmul.f32 %v5468_v20, %v534_v30  ;;  %v5469_v31 = vmov %v5468_v20  ;;  %v587_v18 = vmul.f32 %v5472_v19, %v578_v54  ;;  %s4258_s8 = sld [smem:[#allocation5 + $0x14]] }
 0x150   : > { %v544_v41 = vmul.f32 %v5469_v31, %v533_v43  ;;  %v5473_v24 = vmov %v5472_v19  ;;  %v5474_v13 = vstv %s3452_s0  ;;  %v621_v57 = vsel %vm620_vm6, %v3398_v59, %v3396_v58  ;;  %s3744_s0 = sld [smem:[#allocation5 + $0x3f]] }
 0x151   : > { %v3594_v39 = vpop.permute.xlu1 %936  ;;  %v3596_v27 = vpop.permute.xlu0 %934  ;;  %v588_v1 = vmul.f32 %v5473_v24, %v577_v53  ;;  %v591_v38 = vmul.f32 %v5474_v13, %v584_v52  ;;  %v5475_v30 = vmov %v5474_v13  ;;  %v627_v24 = vsel %vm620_vm6, %v3348_v42, %v3360_v46 }
 0x152   : > { %v592_v43 = vmul.f32 %v5475_v30, %v583_v37  ;;  %v465_v37 = vcombine.low %v461_v55, %v462_v56  ;;  %vm353_vm2 = vcmp.ge.s32.totalorder %v3611_v22, 0  ;;  %vm354_vm3 = vcmp.lt.s32.totalorder %v3611_v22, 16 }
 0x153   : > { %1608 = vrot.lane.b32.xlu1 %v3278_v33, %s3037_s16  ;;  %1606 = vrot.lane.b32.xlu0 %v3273_v32, %s3037_s16  ;;  %v593_v54 = vadd.f32 %v591_v38, %v587_v18  ;;  %vm755_vm4 = vcmp.lt.s32.totalorder %v3490_v17, 34  ;;  %v665_v31 = vsel %vm664_vm7, %v3404_v61, %v3402_v60  ;;  %vm799_vm8 = vcmp.lt.s32.totalorder %v3490_v17, 33 }
 0x154   : > { %v472_v20 = vrot.slane %v465_v37, %v3244_v7  ;;  %v718_v37 = vsel %vm711_vm14, %v3416_v3, %v3414_v2 }
 0x155   : > { %v3634_v16 = vpop.permute.xlu1 %973  ;;  %v3636_v21 = vpop.permute.xlu0 %971 }
 0x156   : > { %5464 = vst [vmem:[#allocation35_spill] sm:$0xff] %v3634_v16  ;;  %5465 = vst [vmem:[#allocation36_spill] sm:$0xff] %v3636_v21  ;;  %v5470_v21 = vstv %s3449_s20  ;;  %s3038_s20 = smov 114  }
 0x157   : > { %1615 = vrot.lane.b32.xlu1 %v3258_v29, %s3037_s16  ;;  %1613 = vrot.lane.b32.xlu0 %v3254_v28, %s3037_s16  ;;  %v547_v16 = vmul.f32 %v5470_v21, %v540_v35  ;;  %v5471_v51 = vmov %v5470_v21  ;;  %v628_v35 = vsel %vm620_vm6, %v3360_v46, %v3348_v42  ;;  %v421_v21 = vcombine.low %v417_v40, %v418_v45  ;;  %s4529_s16 = sld [smem:[#allocation5 + $0x47]] }
 0x158   : > { %v548_v14 = vmul.f32 %v5471_v51, %v539_v23  ;;  %v622_v23 = vsel %vm620_vm6, %v3396_v58, %v3398_v59  ;;  %v505_v58 = vadd.f32 %v503_v0, %v499_v34  ;;  %v506_v59 = vadd.f32 %v504_v26, %v500_v15 }
 0x159   : > { %v3693_v49 = vpop.permute.xlu1 %980  ;;  %v3695_v50 = vpop.permute.xlu0 %978  ;;  %v549_v52 = vadd.f32 %v547_v16, %v543_v25  ;;  %v594_v40 = vadd.f32 %v592_v43, %v588_v1  ;;  %v5476_v45 = vstv %s3480_s9  ;;  %v5478_v25 = vstv %s3454_s5  ;;  %s3039_s5 = smov 113   ;;  %s3043_s9 = smov 109  }
 0x15a   : > { %v550_v53 = vadd.f32 %v548_v14, %v544_v41  ;;  %v631_v55 = vmul.f32 %v5476_v45, %v622_v23  ;;  %v5477_v56 = vmov %v5476_v45  ;;  %v635_v0 = vmul.f32 %v5478_v25, %v628_v35 }
 0x15b   : > { %1652 = vrot.lane.b32.xlu1 %v3278_v33, %s3038_s20  ;;  %1650 = vrot.lane.b32.xlu0 %v3273_v32, %s3038_s20  ;;  %v632_v47 = vmul.f32 %v5477_v56, %v621_v57  ;;  %v5479_v26 = vmov %v5478_v25  ;;  %v985_v34 = vstv %s3675_s28  ;;  %v989_v15 = vstv %s3679_s11  ;;  %s3046_s28 = smov 97   ;;  %s4586_s11 = sld [smem:[#allocation5 + $0x17]] }
 0x15c   : > { %v636_v16 = vmul.f32 %v5479_v26, %v627_v24  ;;  %v428_v1 = vrot.slane %v421_v21, %v3244_v7  ;;  %vm357_vm6 = vcmp.lt.s32.totalorder %v3611_v22, 15  ;;  %v666_v41 = vsel %vm664_vm7, %v3402_v60, %v3404_v61 }
 0x15d   : > { %v3734_v42 = vpop.permute.xlu1 %1020  ;;  %v3736_v46 = vpop.permute.xlu0 %1018  ;;  %v671_v51 = vsel %vm664_vm7, %v3354_v44, %v3366_v48  ;;  %v672_v14 = vsel %vm664_vm7, %v3366_v48, %v3354_v44  ;;  %v509_v61 = vcombine.low %v505_v58, %v506_v59  ;;  %v553_v19 = vcombine.low %v549_v52, %v550_v53  ;;  %vm3795_vm7 = vmand %vm368_vm10, %vm369_vm11 }
 0x15e   : > { %v597_v48 = vcombine.low %v593_v54, %v594_v40  ;;  %v3799_v38 = vadd.f32 %v635_v0, %v631_v55  ;;  %v3801_v30 = vadd.f32 %v636_v16, %v632_v47  ;;  %v1032_v43 = vstv %s3706_s18  ;;  %vm371_vm12 = vmand %vm3795_vm7, %vm3783_vm5  ;;  %s4593_s18 = sld [smem:[#allocation5 + $0x48]] }
 0x15f   : > { %1659 = vrot.lane.b32.xlu1 %v3258_v29, %s3038_s20  ;;  %1657 = vrot.lane.b32.xlu0 %v3254_v28, %s3038_s20  ;;  %v5486_v23 = vstv %s3482_s14  ;;  %v719_v58 = vsel %vm711_vm14, %v3414_v2, %v3416_v3  ;;  %v5488_v59 = vstv %s3460_s7  ;;  %v435_v40 = vrot.slane %v428_v1, %v3244_v7  ;;  %vm439_vm13 = vmand %vm3795_vm7, %vm3809_vm9  ;;  %s3981_s7 = sld [smem:[#allocation5 + $0x41]]  ;;  %s4293_s14 = sld [smem:[#allocation5 + $0x45]] }
 0x160   : > { %v675_v24 = vmul.f32 %v5486_v23, %v666_v41  ;;  %v5487_v35 = vmov %v5486_v23  ;;  %v679_v52 = vmul.f32 %v5488_v59, %v672_v14  ;;  %v5489_v53 = vmov %v5488_v59  ;;  %s3047_s20 = smov 96  }
 0x161   : > { %v3787_v18 = vpop.permute.xlu1 %1027  ;;  %v3789_v13 = vpop.permute.xlu0 %1025  ;;  %v676_v21 = vmul.f32 %v5487_v35, %v665_v31  ;;  %v680_v54 = vmul.f32 %v5489_v53, %v671_v51  ;;  %v479_v45 = vrot.slane %v472_v20, %v3244_v7  ;;  %vm360_vm11 = vcmp.lt.s32.totalorder %v3611_v22, 14 }
 0x162   : > { %v516_v2 = vrot.slane %v509_v61, %v3244_v7  ;;  %v3843_v3 = vrot.slane %v553_v19, %v3244_v7  ;;  %v712_v55 = vsel %vm711_vm14, %v3410_v63, %v3408_v62  ;;  %v713_v56 = vsel %vm711_vm14, %v3408_v62, %v3410_v63  ;;  %vm3871_vm14 = vmand %vm350_vm15, %vm351_vm1 }
 0x163   : > { %1696 = vrot.lane.b32.xlu1 %v3278_v33, %s3039_s5  ;;  %1694 = vrot.lane.b32.xlu0 %v3273_v32, %s3039_s5  ;;  %v5490_v0 = vstv %s3486_s6  ;;  %v1036_v20 = vstv %s3744_s0  ;;  %v3876_v63 = vrot.slane %v597_v48, %v3244_v7  ;;  %v641_v41 = vcombine.low %v3799_v38, %v3801_v30  ;;  %vm3916_vm15 = vmand %vm353_vm2, %vm354_vm3  ;;  %s3040_s6 = smov 112   ;;  %s4625_s0 = sld [smem:[#allocation5 + $0x18]] }
 0x164   : > { %v726_v26 = vmul.f32 %v5490_v0, %v719_v58  ;;  %v5491_v16 = vmov %v5490_v0  ;;  %v3880_v51 = vadd.f32 %v679_v52, %v675_v24  ;;  %v3882_v14 = vadd.f32 %v680_v54, %v676_v21  ;;  %vm483_vm1 = vmand %vm3795_vm7, %vm3871_vm14 }
 0x165   : > { %v3853_v47 = vpop.permute.xlu1 %1064  ;;  %v3855_v25 = vpop.permute.xlu0 %1062  ;;  %v727_v1 = vmul.f32 %v5491_v16, %v718_v37  ;;  %vm843_vm10 = vcmp.lt.s32.totalorder %v3490_v17, 32  ;;  %v5494_v61 = vstv %s3484_s3  ;;  %v762_v48 = vsel %vm755_vm4, %v3428_v8, %v3426_v6  ;;  %s3962_s3 = sld [smem:[#allocation5 + $0x40]] }
 0x166   : > { %v722_v19 = vmul.f32 %v5494_v61, %v713_v56  ;;  %v5495_v23 = vmov %v5494_v61  ;;  %v763_v38 = vsel %vm755_vm4, %v3426_v6, %v3428_v8  ;;  %v437_v30 = vsel %vm371_vm12, %v435_v40, 0.0 }
 0x167   : > { %1703 = vrot.lane.b32.xlu1 %v3258_v29, %s3039_s5  ;;  %v723_v35 = vmul.f32 %v5495_v23, %v712_v55  ;;  %1701 = vrot.lane.b32.xlu0 %v3254_v28, %s3039_s5  ;;  %v481_v24 = vsel %vm439_vm13, %v479_v45, 0.0  ;;  %v523_v21 = vrot.slane %v516_v2, %v3244_v7  ;;  %v567_v8 = vrot.slane %v3843_v3, %v3244_v7  ;;  %s3056_s5 = smov 78  }
 0x168   : > { %v3930_v59 = vadd.f32 %v726_v26, %v722_v19  ;;  %v756_v53 = vsel %vm755_vm4, %v3422_v5, %v3420_v4  ;;  %v757_v54 = vsel %vm755_vm4, %v3420_v4, %v3422_v5  ;;  %vm5498_vm2 = vcmp.ge.s32.totalorder %v3611_v22, 4294967295  ;;  %vm527_vm4 = vmand %vm3795_vm7, %vm3916_vm15 }
 0x169   : > { %v3922_v37 = vpop.permute.xlu1 %1071  ;;  %v3924_v58 = vpop.permute.xlu0 %1069  ;;  %v3932_v52 = vadd.f32 %v727_v1, %v723_v35  ;;  %vm3946_vm3 = vmand %vm5498_vm2, %vm357_vm6  ;;  %v5501_v45 = vstv %s3494_s12  ;;  %v806_v56 = vsel %vm799_vm8, %v3440_v12, %v3438_v11  ;;  %v807_v4 = vsel %vm799_vm8, %v3438_v11, %v3440_v12  ;;  %s3979_s12 = sld [smem:[#allocation5 + $0x10]] }
 0x16a   : > { %v770_v2 = vmul.f32 %v5501_v45, %v763_v38  ;;  %v5502_v3 = vmov %v5501_v45  ;;  %v5503_v5 = vstv %s3464_s19  ;;  %v611_v26 = vrot.slane %v3876_v63, %v3244_v7  ;;  %s4225_s19 = sld [smem:[#allocation5 + $0x13]] }
 0x16b   : > { %v771_v55 = vmul.f32 %v5502_v3, %v762_v48  ;;  %1740 = vrot.lane.b32.xlu1 %v3278_v33, %s3040_s6  ;;  %v438_v0 = vadd.f32 %v437_v30, %v5503_v5  ;;  %v648_v16 = vrot.slane %v641_v41, %v3244_v7  ;;  %v685_v11 = vcombine.low %v3880_v51, %v3882_v14  ;;  %v5514_v5 = vld [vmem:[#allocation28_spill] sm:$0xff] }
 0x16c   : > { %1738 = vrot.lane.b32.xlu0 %v3273_v32, %s3040_s6  ;;  %v5504_v12 = vstv %s3492_s17  ;;  %v800_v63 = vsel %vm799_vm8, %v3434_v10, %v3432_v9  ;;  %v801_v41 = vsel %vm799_vm8, %v3432_v9, %v3434_v10  ;;  %v525_v35 = vsel %vm483_vm1, %v523_v21, 0.0  ;;  %vm571_vm8 = vmand %vm3795_vm7, %vm3946_vm3  ;;  %s4339_s17 = sld [smem:[#allocation5 + $0x15]] }
 0x16d   : > { %v766_v1 = vmul.f32 %v5504_v12, %v757_v54  ;;  %v5505_v61 = vmov %v5504_v12  ;;  %v3996_v51 = vpop.permute.xlu1 %1108  ;;  %v3998_v14 = vpop.permute.xlu0 %1106  ;;  %v482_v23 = vadd.f32 %v481_v24, %v438_v0  ;;  %vm363_vm13 = vcmp.lt.s32.totalorder %v3611_v22, 13 }
 0x16e   : > { %v767_v19 = vmul.f32 %v5505_v61, %v756_v53  ;;  %v5506_v9 = vstv %s3499_s26  ;;  %vm931_vm2 = vcmp.lt.s32.totalorder %v3490_v17, 30  ;;  %v569_v30 = vsel %vm527_vm4, %v567_v8, 0.0  ;;  %s3041_s26 = smov 111  }
 0x16f   : > { %v814_v10 = vmul.f32 %v5506_v9, %v807_v4  ;;  %v5507_v48 = vmov %v5506_v9  ;;  %vm5508_vm1 = vcmp.ge.s32.totalorder %v3611_v22, 4294967294  ;;  %v732_v21 = vcombine.low %v3930_v59, %v3932_v52  ;;  %1747 = vrot.lane.b32.xlu1 %v3258_v29, %s3040_s6  ;;  %v5513_v4 = vld [vmem:[#allocation27_spill] sm:$0xff] }
 0x170   : > { %v815_v38 = vmul.f32 %v5507_v48, %v806_v56  ;;  %vm4025_vm6 = vmand %vm5508_vm1, %vm360_vm11  ;;  %v772_v53 = vadd.f32 %v770_v2, %v766_v1  ;;  %v773_v54 = vadd.f32 %v771_v55, %v767_v19  ;;  %vm704_vm4 = vcmp.lt.s32.totalorder %v3618_v36, 18  ;;  %1745 = vrot.lane.b32.xlu0 %v3254_v28, %s3040_s6  ;;  %s4652_s6 = sld [smem:[#allocation5 + $0x19]] }
 0x171   : > { %v5511_v8 = vstv %s3497_s27  ;;  %v850_v0 = vsel %vm843_vm10, %v5514_v5, %v5513_v4  ;;  %v851_v59 = vsel %vm843_vm10, %v5513_v4, %v5514_v5  ;;  %v526_v52 = vadd.f32 %v525_v35, %v482_v23  ;;  %v4059_v1 = vpop.permute.xlu1 %1115  ;;  %v4061_v61 = vpop.permute.xlu0 %1113  ;;  %vm615_vm1 = vmand %vm3795_vm7, %vm4025_vm6  ;;  %s4110_s27 = sld [smem:[#allocation5 + $0x11]] }
 0x172   : > { %v810_v45 = vmul.f32 %v5511_v8, %v801_v41  ;;  %v5512_v3 = vmov %v5511_v8  ;;  %v613_v2 = vsel %vm571_vm8, %v611_v26, 0.0  ;;  %v655_v55 = vrot.slane %v648_v16, %v3244_v7  ;;  %v5516_v16 = vld [vmem:[#allocation26_spill] sm:$0xff] }
 0x173   : > { %v811_v56 = vmul.f32 %v5512_v3, %v800_v63  ;;  %v4056_v12 = vrot.slane %v685_v11, %v3244_v7  ;;  %vm975_vm11 = vcmp.lt.s32.totalorder %v3490_v17, 29  ;;  %v5515_v63 = vld [vmem:[#allocation25_spill] sm:$0xff]  ;;  %v570_v23 = vadd.f32 %v569_v30, %v526_v52  ;;  %1784 = vrot.lane.b32.xlu1 %v3278_v33, %s3041_s26 }
 0x174   : > { %v816_v19 = vadd.f32 %v814_v10, %v810_v45  ;;  %v844_v11 = vsel %vm843_vm10, %v5516_v16, %v5515_v63  ;;  %v845_v41 = vsel %vm843_vm10, %v5515_v63, %v5516_v16  ;;  %v5517_v35 = vstv %s3507_s13  ;;  %1782 = vrot.lane.b32.xlu0 %v3273_v32, %s3041_s26  ;;  %v5521_v16 = vld [vmem:[#allocation31_spill] sm:$0xff]  ;;  %s4223_s13 = sld [smem:[#allocation5 + $0x43]] }
 0x175   : > { %v817_v26 = vadd.f32 %v815_v38, %v811_v56  ;;  %v858_v9 = vmul.f32 %v5517_v35, %v851_v59  ;;  %v5518_v48 = vmov %v5517_v35  ;;  %v1080_v3 = vstv %s3962_s3  ;;  %v4096_v63 = vpop.permute.xlu1 %1152  ;;  %s4943_s3 = sld [smem:[#allocation5 + $0x22]] }
 0x176   : > { %v859_v8 = vmul.f32 %v5518_v48, %v850_v0  ;;  %v4082_v10 = vrot.slane %v732_v21, %v3244_v7  ;;  %v776_v38 = vcombine.low %v772_v53, %v773_v54  ;;  %v614_v4 = vadd.f32 %v613_v2, %v570_v23  ;;  %v4098_v21 = vpop.permute.xlu0 %1150  ;;  %v5522_v2 = vld [vmem:[#allocation32_spill] sm:$0xff]  ;;  %v5526_v48 = vld [vmem:[#allocation30_spill] sm:$0xff] }
 0x177   : > { %v657_v30 = vsel %vm615_vm1, %v655_v55, 0.0  ;;  %v5519_v5 = vstv %s3505_s30  ;;  %v699_v53 = vrot.slane %v4056_v12, %v3244_v7  ;;  %v820_v54 = vcombine.low %v816_v19, %v817_v26  ;;  %1791 = vrot.lane.b32.xlu1 %v3258_v29, %s3041_s26  ;;  %s3042_s30 = smov 110  }
 0x178   : > { %v854_v0 = vmul.f32 %v5519_v5, %v845_v41  ;;  %v5520_v59 = vmov %v5519_v5  ;;  %vm5523_vm10 = vcmp.lt.s32.totalorder %v3490_v17, 31  ;;  %v938_v12 = vsel %vm931_vm2, %v3596_v27, %v3594_v39  ;;  %1789 = vrot.lane.b32.xlu0 %v3254_v28, %s3041_s26  ;;  %s4722_s26 = sld [smem:[#allocation5 + $0x1a]] }
 0x179   : > { %v855_v52 = vmul.f32 %v5520_v59, %v844_v11  ;;  %v894_v23 = vsel %vm5523_vm10, %v5522_v2, %v5521_v16  ;;  %vm5524_vm8 = vmmov %vm5523_vm10  ;;  %v939_v19 = vsel %vm931_vm2, %v3594_v39, %v3596_v27  ;;  %v746_v26 = vrot.slane %v4082_v10, %v3244_v7  ;;  %v5533_v59 = vld [vmem:[#allocation33_spill] sm:$0xff] }
 0x17a   : > { %v895_v55 = vsel %vm5524_vm8, %v5521_v16, %v5522_v2  ;;  %v860_v11 = vadd.f32 %v858_v9, %v854_v0  ;;  %v4125_v35 = vrot.slane %v776_v38, %v3244_v7  ;;  %v5525_v9 = vld [vmem:[#allocation29_spill] sm:$0xff]  ;;  %vm5527_vm10 = vmmov %vm5524_vm8  ;;  %vm5528_vm1 = vcmp.ge.s32.totalorder %v3611_v22, 4294967293  ;;  %v4156_v22 = vpop.permute.xlu1 %1159 }
 0x17b   : > { %v861_v41 = vadd.f32 %v859_v8, %v855_v52  ;;  %v888_v8 = vsel %vm5527_vm10, %v5526_v48, %v5525_v9  ;;  %v889_v27 = vsel %vm5524_vm8, %v5525_v9, %v5526_v48  ;;  %vm4140_vm12 = vmand %vm5528_vm1, %vm363_vm13  ;;  %v5531_v10 = vstv %s3512_s4  ;;  %v5534_v52 = vld [vmem:[#allocation34_spill] sm:$0xff]  ;;  %v4158_v9 = vpop.permute.xlu0 %1157  ;;  %s4185_s4 = sld [smem:[#allocation5 + $0x42]]  ;;  %1828 = vrot.lane.b32.xlu1 %v3278_v33, %s3042_s30 }
 0x17c   : > { %v902_v38 = vmul.f32 %v5531_v10, %v895_v55  ;;  %v5532_v5 = vmov %v5531_v10  ;;  %v932_v16 = vsel %vm931_vm2, %v5534_v52, %v5533_v59  ;;  %v933_v2 = vsel %vm931_vm2, %v5533_v59, %v5534_v52  ;;  %1826 = vrot.lane.b32.xlu0 %v3273_v32, %s3042_s30 }
 0x17d   : > { %v903_v0 = vmul.f32 %v5532_v5, %v894_v23  ;;  %v5535_v48 = vstv %s3531_s15  ;;  %v982_v5 = vsel %vm975_vm11, %v3695_v50, %v3693_v49  ;;  %v983_v59 = vsel %vm975_vm11, %v3693_v49, %v3695_v50  ;;  %s4379_s15 = sld [smem:[#allocation5 + $0x46]] }
 0x17e   : > { %v946_v55 = vmul.f32 %v5535_v48, %v939_v19  ;;  %v5536_v10 = vmov %v5535_v48  ;;  %vm5537_vm13 = vcmp.ge.s32.totalorder %v3618_v36, 2  ;;  %v864_v19 = vcombine.low %v860_v11, %v861_v41  ;;  %v5544_v41 = vld [vmem:[#allocation35_spill] sm:$0xff] }
 0x17f   : > { %v947_v23 = vmul.f32 %v5536_v10, %v938_v12  ;;  %vm4176_vm2 = vmand %vm5537_vm13, %vm704_vm4  ;;  %v827_v12 = vrot.slane %v820_v54, %v3244_v7  ;;  %v5540_v48 = vstv %s3509_s25  ;;  %v5542_v49 = vstv %s3529_s29  ;;  %s4207_s25 = sld [smem:[#allocation5 + $0x12]]  ;;  %1835 = vrot.lane.b32.xlu1 %v3258_v29, %s3042_s30  ;;  %s3044_s29 = smov 99  }
 0x180   : > { %v898_v10 = vmul.f32 %v5540_v48, %v889_v27  ;;  %v5541_v45 = vmov %v5540_v48  ;;  %vm659_vm4 = vmand %vm3795_vm7, %vm4140_vm12  ;;  %v942_v50 = vmul.f32 %v5542_v49, %v933_v2  ;;  %v5543_v54 = vmov %v5542_v49  ;;  %v5545_v27 = vld [vmem:[#allocation36_spill] sm:$0xff]  ;;  %1833 = vrot.lane.b32.xlu0 %v3254_v28, %s3042_s30  ;;  %s4762_s30 = sld [smem:[#allocation5 + $0x1b]] }
 0x181   : > { %v899_v56 = vmul.f32 %v5541_v45, %v888_v8  ;;  %v943_v11 = vmul.f32 %v5543_v54, %v932_v16  ;;  %v976_v45 = vsel %vm975_vm11, %v5545_v27, %v5544_v41  ;;  %v977_v8 = vsel %vm975_vm11, %v5544_v41, %v5545_v27  ;;  %v4213_v54 = vpop.permute.xlu1 %1196  ;;  %vm706_vm11 = vmand %vm4176_vm2, %vm3783_vm5 }
 0x182   : > { %v904_v48 = vadd.f32 %v902_v38, %v898_v10  ;;  %v990_v16 = vmul.f32 %v989_v15, %v983_v59  ;;  %v991_v49 = vmul.f32 %v989_v15, %v982_v5  ;;  %v658_v31 = vadd.f32 %v657_v30, %v614_v4  ;;  %v4221_v10 = vpop.permute.xlu0 %1194  ;;  %vm750_vm10 = vmand %vm4176_vm2, %vm3809_vm9 }
 0x183   : > { %v905_v2 = vadd.f32 %v903_v0, %v899_v56  ;;  %v948_v41 = vadd.f32 %v946_v55, %v942_v50  ;;  %v949_v27 = vadd.f32 %v947_v23, %v943_v11  ;;  %vm1066_vm1 = vcmp.lt.s32.totalorder %v3490_v17, 18  ;;  %vm794_vm13 = vmand %vm4176_vm2, %vm3871_vm14  ;;  %1872 = vrot.lane.b32.xlu1 %v3278_v33, %s3043_s9 }
 0x184   : > { %v1164_v38 = vstv %s4110_s27  ;;  %v701_v15 = vsel %vm659_vm4, %v699_v53, 0.0  ;;  %v790_v56 = vrot.slane %v4125_v35, %v3244_v7  ;;  %v986_v4 = vmul.f32 %v985_v34, %v977_v8  ;;  %1870 = vrot.lane.b32.xlu0 %v3273_v32, %s3043_s9  ;;  %s4726_s27 = sld [smem:[#allocation5 + $0x4b]] }
 0x185   : > { %v987_v30 = vmul.f32 %v985_v34, %v976_v45  ;;  %v834_v44 = vrot.slane %v827_v12, %v3244_v7  ;;  %v871_v0 = vrot.slane %v864_v19, %v3244_v7  ;;  %vm5546_vm7 = vcmp.lt.s32.totalorder %v3490_v17, 19  ;;  %v4270_v23 = vpop.permute.xlu1 %1203 }
 0x186   : > { %v1029_v53 = vsel %vm5546_vm7, %v3789_v13, %v3787_v18  ;;  %vm5547_vm8 = vmmov %vm5546_vm7  ;;  %v748_v35 = vsel %vm706_vm11, %v746_v26, 0.0  ;;  %vm1110_vm4 = vcmp.lt.s32.totalorder %v3490_v17, 17  ;;  %v702_v5 = vadd.f32 %v701_v15, %v658_v31  ;;  %v4280_v19 = vpop.permute.xlu0 %1201 }
 0x187   : > { %v1030_v34 = vsel %vm5547_vm8, %v3787_v18, %v3789_v13  ;;  %v908_v18 = vcombine.low %v904_v48, %v905_v2  ;;  %v992_v13 = vadd.f32 %v990_v16, %v986_v4  ;;  %v993_v55 = vadd.f32 %v991_v49, %v987_v30  ;;  %vm5548_vm11 = vmmov %vm5546_vm7  ;;  %1879 = vrot.lane.b32.xlu1 %v3258_v29, %s3043_s9 }
 0x188   : > { %v952_v59 = vcombine.low %v948_v41, %v949_v27  ;;  %v1023_v26 = vsel %vm5546_vm7, %v3736_v46, %v3734_v42  ;;  %v1024_v12 = vsel %vm5548_vm11, %v3734_v42, %v3736_v46  ;;  %v792_v31 = vsel %vm750_vm10, %v790_v56, 0.0  ;;  %vm838_vm8 = vmand %vm4176_vm2, %vm3916_vm15  ;;  %1877 = vrot.lane.b32.xlu0 %v3254_v28, %s3043_s9  ;;  %s4812_s9 = sld [smem:[#allocation5 + $0x1d]] }
 0x189   : > { %v1037_v50 = vmul.f32 %v1036_v20, %v1030_v34  ;;  %v1038_v11 = vmul.f32 %v1036_v20, %v1029_v53  ;;  %v1168_v45 = vstv %s4185_s4  ;;  %v749_v42 = vadd.f32 %v748_v35, %v702_v5  ;;  %v4313_v41 = vpop.permute.xlu1 %1240  ;;  %vm926_vm7 = vmand %vm4176_vm2, %vm4025_vm6  ;;  %s3049_s4 = smov 94  }
 0x18a   : > { %v836_v46 = vsel %vm794_vm13, %v834_v44, 0.0  ;;  %v878_v8 = vrot.slane %v871_v0, %v3244_v7  ;;  %vm1154_vm10 = vcmp.lt.s32.totalorder %v3490_v17, 16  ;;  %v1208_v20 = vstv %s4207_s25  ;;  %v4318_v30 = vpop.permute.xlu0 %1238  ;;  %s4765_s25 = sld [smem:[#allocation5 + $0x4c]] }
 0x18b   : > { %v915_v48 = vrot.slane %v908_v18, %v3244_v7  ;;  %v996_v2 = vcombine.low %v992_v13, %v993_v55  ;;  %v1033_v16 = vmul.f32 %v1032_v43, %v1024_v12  ;;  %v1034_v49 = vmul.f32 %v1032_v43, %v1023_v26  ;;  %1919 = vrot.lane.b32.xlu1 %v3278_v33, %s3044_s29 }
 0x18c   : > { %v793_v27 = vadd.f32 %v792_v31, %v749_v42  ;;  %v959_v15 = vrot.slane %v952_v59, %v3244_v7  ;;  %v1212_v56 = vstv %s4223_s13  ;;  %v1252_v4 = vstv %s4225_s19  ;;  %1917 = vrot.lane.b32.xlu0 %v3273_v32, %s3044_s29  ;;  %s3050_s13 = smov 93   ;;  %s4787_s19 = sld [smem:[#allocation5 + $0x1c]] }
 0x18d   : > { %v4320_v44 = vadd.f32 %v1037_v50, %v1033_v16  ;;  %v1040_v0 = vadd.f32 %v1038_v11, %v1034_v49  ;;  %v1073_v53 = vsel %vm1066_vm1, %v3924_v58, %v3922_v37  ;;  %v1074_v43 = vsel %vm1066_vm1, %v3922_v37, %v3924_v58  ;;  %v4352_v59 = vpop.permute.xlu1 %1247 }
 0x18e   : > { %v837_v34 = vadd.f32 %v836_v46, %v793_v27  ;;  %v880_v35 = vsel %vm838_vm8, %v878_v8, 0.0  ;;  %v1256_v18 = vstv %s4256_s23  ;;  %v1296_v13 = vstv %s4258_s8  ;;  %s4790_s23 = sld [smem:[#allocation5 + $0x4d]]  ;;  %s3051_s8 = smov 83  }
 0x18f   : > { %v922_v55 = vrot.slane %v915_v48, %v3244_v7  ;;  %v1003_v5 = vrot.slane %v996_v2, %v3244_v7  ;;  %v1067_v37 = vsel %vm1066_vm1, %v3855_v25, %v3853_v47  ;;  %v1068_v58 = vsel %vm1066_vm1, %v3853_v47, %v3855_v25  ;;  %v4366_v25 = vpop.permute.xlu0 %1245  ;;  %vm882_vm1 = vmand %vm4176_vm2, %vm3946_vm3  ;;  %1926 = vrot.lane.b32.xlu1 %v3258_v29, %s3044_s29 }
 0x190   : > { %vm1198_vm13 = vcmp.lt.s32.totalorder %v3490_v17, 15  ;;  %v1081_v26 = vmul.f32 %v1080_v3, %v1074_v43  ;;  %v1082_v12 = vmul.f32 %v1080_v3, %v1073_v53  ;;  %v1117_v31 = vsel %vm1110_vm4, %v4061_v61, %v4059_v1  ;;  %1924 = vrot.lane.b32.xlu0 %v3254_v28, %s3044_s29  ;;  %s4843_s29 = sld [smem:[#allocation5 + $0x1e]] }
 0x191   : > { %v1118_v47 = vsel %vm1110_vm4, %v4059_v1, %v4061_v61  ;;  %v881_v50 = vadd.f32 %v880_v35, %v837_v34  ;;  %v966_v3 = vrot.slane %v959_v15, %v3244_v7  ;;  %vm1015_vm11 = vcmp.lt.s32.totalorder %v3618_v36, 17 }
 0x192   : > { %v1043_v11 = vcombine.low %v4320_v44, %v1040_v0  ;;  %v1300_v1 = vstv %s4293_s14  ;;  %v5549_v61 = vstv %s3746_s22  ;;  %v1111_v48 = vsel %vm1110_vm4, %v3998_v14, %v3996_v51  ;;  %s4627_s22 = sld [smem:[#allocation5 + $0x49]]  ;;  %s4815_s14 = sld [smem:[#allocation5 + $0x4e]] }
 0x193   : > { %v1077_v42 = vmul.f32 %v5549_v61, %v1068_v58  ;;  %v5550_v46 = vmov %v5549_v61  ;;  %v1112_v2 = vsel %vm1110_vm4, %v3996_v51, %v3998_v14  ;;  %vm1242_vm8 = vcmp.lt.s32.totalorder %v3490_v17, 14  ;;  %v4412_v14 = vpop.permute.xlu1 %1284  ;;  %v4420_v35 = vpop.permute.xlu0 %1282  ;;  %1963 = vrot.lane.b32.xlu1 %v3278_v33, %s3045_s10 }
 0x194   : > { %v1078_v8 = vmul.f32 %v5550_v46, %v1067_v37  ;;  %v5551_v16 = vstv %s3981_s7  ;;  %v1161_v44 = vsel %vm1154_vm10, %v4158_v9, %v4156_v22  ;;  %v1162_v51 = vsel %vm1154_vm10, %v4156_v22, %v4158_v9  ;;  %1961 = vrot.lane.b32.xlu0 %v3273_v32, %s3045_s10  ;;  %s3048_s7 = smov 95  }
 0x195   : > { %v1125_v49 = vmul.f32 %v5551_v16, %v1118_v47  ;;  %v5552_v27 = vmov %v5551_v16  ;;  %v924_v0 = vsel %vm882_vm1, %v922_v55, 0.0  ;;  %v1010_v53 = vrot.slane %v1003_v5, %v3244_v7  ;;  %vm970_vm1 = vmand %vm4176_vm2, %vm4140_vm12 }
 0x196   : > { %v1126_v15 = vmul.f32 %v5552_v27, %v1117_v31  ;;  %v1083_v43 = vadd.f32 %v1081_v26, %v1077_v42  ;;  %v1084_v34 = vadd.f32 %v1082_v12, %v1078_v8  ;;  %v5553_v37 = vstv %s3979_s12  ;;  %s4660_s12 = sld [smem:[#allocation5 + $0x4a]] }
 0x197   : > { %v1121_v58 = vmul.f32 %v5553_v37, %v1112_v2  ;;  %v5554_v31 = vmov %v5553_v37  ;;  %v1155_v9 = vsel %vm1154_vm10, %v4098_v21, %v4096_v63  ;;  %v1156_v55 = vsel %vm1154_vm10, %v4096_v63, %v4098_v21  ;;  %1970 = vrot.lane.b32.xlu1 %v3258_v29, %s3045_s10 }
 0x198   : > { %v1122_v22 = vmul.f32 %v5554_v31, %v1111_v48  ;;  %vm1286_vm4 = vcmp.lt.s32.totalorder %v3490_v17, 13  ;;  %v968_v5 = vsel %vm926_vm7, %v966_v3, 0.0  ;;  %v1169_v26 = vmul.f32 %v1168_v45, %v1162_v51  ;;  %v1292_v3 = vpop.permute.xlu1 %1291  ;;  %1968 = vrot.lane.b32.xlu0 %v3254_v28, %s3045_s10  ;;  %s3053_s10 = smov 81  }
 0x199   : > { %v1170_v63 = vmul.f32 %v1168_v45, %v1161_v44  ;;  %v1343_v21 = vstv %s4339_s17  ;;  %v925_v12 = vadd.f32 %v924_v0, %v881_v50  ;;  %v1050_v47 = vrot.slane %v1043_v11, %v3244_v7  ;;  %v1290_v11 = vpop.permute.xlu0 %1289  ;;  %s3052_s17 = smov 82  }
 0x19a   : > { %v1127_v61 = vadd.f32 %v1125_v49, %v1121_v58  ;;  %v1128_v42 = vadd.f32 %v1126_v15, %v1122_v22  ;;  %v1165_v46 = vmul.f32 %v1164_v38, %v1156_v55  ;;  %v1166_v8 = vmul.f32 %v1164_v38, %v1155_v9 }
 0x19b   : > { %v1205_v45 = vsel %vm1198_vm13, %v4280_v19, %v4270_v23  ;;  %v1206_v50 = vsel %vm1198_vm13, %v4270_v23, %v4280_v19  ;;  %vm1333_vm10 = vcmp.lt.s32.totalorder %v3490_v17, 3  ;;  %v969_v48 = vadd.f32 %v968_v5, %v925_v12  ;;  %2007 = vrot.lane.b32.xlu1 %v3278_v33, %s3046_s28 }
 0x19c   : > { %v1012_v38 = vsel %vm970_vm1, %v1010_v53, 0.0  ;;  %v1087_v2 = vcombine.low %v1083_v43, %v1084_v34  ;;  %v1347_v16 = vstv %s4379_s15  ;;  %v1171_v49 = vadd.f32 %v1169_v26, %v1165_v46  ;;  %v1332_v0 = vpop.permute.xlu1 %1331  ;;  %2005 = vrot.lane.b32.xlu0 %v3273_v32, %s3046_s28  ;;  %s4846_s15 = sld [smem:[#allocation5 + $0x4f]] }
 0x19d   : > { %v1172_v27 = vadd.f32 %v1170_v63, %v1166_v8  ;;  %v1199_v23 = vsel %vm1198_vm13, %v4221_v10, %v4213_v54  ;;  %v1200_v52 = vsel %vm1198_vm13, %v4213_v54, %v4221_v10  ;;  %v1213_v19 = vmul.f32 %v1212_v56, %v1206_v50  ;;  %v1330_v43 = vpop.permute.xlu0 %1329 }
 0x19e   : > { %v1214_v15 = vmul.f32 %v1212_v56, %v1205_v45  ;;  %v1249_v44 = vsel %vm1242_vm8, %v4366_v25, %v4352_v59  ;;  %v1250_v51 = vsel %vm1242_vm8, %v4352_v59, %v4366_v25  ;;  %v1013_v54 = vadd.f32 %v1012_v38, %v969_v48 }
 0x19f   : > { %vm5555_vm2 = vcmp.ge.s32.totalorder %v3618_v36, 1  ;;  %v1057_v56 = vrot.slane %v1050_v47, %v3244_v7  ;;  %v1131_v53 = vcombine.low %v1127_v61, %v1128_v42  ;;  %vm1377_vm7 = vcmp.lt.s32.totalorder %v3490_v17, 2  ;;  %2014 = vrot.lane.b32.xlu1 %v3258_v29, %s3046_s28 }
 0x1a0   : > { %vm4499_vm13 = vmand %vm5555_vm2, %vm1015_vm11  ;;  %v1209_v34 = vmul.f32 %v1208_v20, %v1200_v52  ;;  %v1210_v59 = vmul.f32 %v1208_v20, %v1199_v23  ;;  %v1243_v25 = vsel %vm1242_vm8, %v4318_v30, %v4313_v41  ;;  %v1244_v36 = vsel %vm1242_vm8, %v4313_v41, %v4318_v30  ;;  %v1339_v9 = vpop.permute.xlu1 %1338  ;;  %2012 = vrot.lane.b32.xlu0 %v3254_v28, %s3046_s28  ;;  %s3054_s28 = smov 80  }
 0x1a1   : > { %v1257_v37 = vmul.f32 %v1256_v18, %v1250_v51  ;;  %v1258_v20 = vmul.f32 %v1256_v18, %v1249_v44  ;;  %v1293_v58 = vsel %vm1286_vm4, %v1290_v11, %v1292_v3  ;;  %v1294_v31 = vsel %vm1286_vm4, %v1292_v3, %v1290_v11  ;;  %vm1017_vm11 = vmand %vm4499_vm13, %vm3783_vm5  ;;  %v1337_v12 = vpop.permute.xlu0 %1336 }
 0x1a2   : > { %v1094_v41 = vrot.slane %v1087_v2, %v3244_v7  ;;  %v1175_v30 = vcombine.low %v1171_v49, %v1172_v27  ;;  %v1215_v18 = vadd.f32 %v1213_v19, %v1209_v34  ;;  %v1216_v22 = vadd.f32 %v1214_v15, %v1210_v59  ;;  %vm1061_vm8 = vmand %vm4499_vm13, %vm3809_vm9 }
 0x1a3   : > { %v1253_v55 = vmul.f32 %v1252_v4, %v1244_v36  ;;  %v1254_v5 = vmul.f32 %v1252_v4, %v1243_v25  ;;  %v1287_v26 = vsel %vm1286_vm4, %v4420_v35, %v4412_v14  ;;  %v1288_v63 = vsel %vm1286_vm4, %v4412_v14, %v4420_v35  ;;  %vm1105_vm4 = vmand %vm4499_vm13, %vm3871_vm14  ;;  %2051 = vrot.lane.b32.xlu1 %v3278_v33, %s3047_s20 }
 0x1a4   : > { %v1301_v47 = vmul.f32 %v1300_v1, %v1294_v31  ;;  %v1302_v61 = vmul.f32 %v1300_v1, %v1293_v58  ;;  %v1340_v42 = vsel %vm1333_vm10, %v1337_v12, %v1339_v9  ;;  %v1341_v4 = vsel %vm1333_vm10, %v1339_v9, %v1337_v12  ;;  %v1376_v11 = vpop.permute.xlu1 %1375  ;;  %vm1149_vm1 = vmand %vm4499_vm13, %vm3916_vm15  ;;  %2049 = vrot.lane.b32.xlu0 %v3273_v32, %s3047_s20 }
 0x1a5   : > { %v1059_v14 = vsel %vm1017_vm11, %v1057_v56, 0.0  ;;  %v1138_v35 = vrot.slane %v1131_v53, %v3244_v7  ;;  %v1259_v3 = vadd.f32 %v1257_v37, %v1253_v55  ;;  %v1260_v46 = vadd.f32 %v1258_v20, %v1254_v5  ;;  %v1374_v27 = vpop.permute.xlu0 %1373  ;;  %vm1193_vm2 = vmand %vm4499_vm13, %vm3946_vm3 }
 0x1a6   : > { %v1297_v1 = vmul.f32 %v1296_v13, %v1288_v63  ;;  %v1298_v8 = vmul.f32 %v1296_v13, %v1287_v26  ;;  %v1334_v45 = vsel %vm1333_vm10, %v1330_v43, %v1332_v0  ;;  %v1335_v50 = vsel %vm1333_vm10, %v1332_v0, %v1330_v43 }
 0x1a7   : > { %v1101_v48 = vrot.slane %v1094_v41, %v3244_v7  ;;  %v1219_v38 = vcombine.low %v1215_v18, %v1216_v22  ;;  %v1348_v2 = vmul.f32 %v1347_v16, %v1341_v4  ;;  %v1349_v49 = vmul.f32 %v1347_v16, %v1340_v42  ;;  %2058 = vrot.lane.b32.xlu1 %v3258_v29, %s3047_s20 }
 0x1a8   : > { %v1182_v13 = vrot.slane %v1175_v30, %v3244_v7  ;;  %v1303_v23 = vadd.f32 %v1301_v47, %v1297_v1  ;;  %v1304_v52 = vadd.f32 %v1302_v61, %v1298_v8  ;;  %v1387_v19 = vstv %s4518_s21  ;;  %v1383_v34 = vpop.permute.xlu1 %1382  ;;  %2056 = vrot.lane.b32.xlu0 %v3254_v28, %s3047_s20  ;;  %s4868_s21 = sld [smem:[#allocation5 + $0x1f]]  ;;  %s3055_s20 = smov 79  }
 0x1a9   : > { %v1060_v15 = vadd.f32 %v1059_v14, %v1013_v54  ;;  %v1344_v44 = vmul.f32 %v1343_v21, %v1335_v50  ;;  %v1345_v51 = vmul.f32 %v1343_v21, %v1334_v45  ;;  %v1391_v16 = vstv %s4529_s16  ;;  %v1381_v36 = vpop.permute.xlu0 %1380  ;;  %s4871_s16 = sld [smem:[#allocation5 + $0x50]] }
 0x1aa   : > { %v1145_v0 = vrot.slane %v1138_v35, %v3244_v7  ;;  %v1263_v56 = vcombine.low %v1259_v3, %v1260_v46  ;;  %v1378_v53 = vsel %vm1377_vm7, %v1374_v27, %v1376_v11  ;;  %v1379_v43 = vsel %vm1377_vm7, %v1376_v11, %v1374_v27  ;;  %v4643_v35 = vld [vmem:[%s5399_s1] sm:$0x3] }
 0x1ab   : > { %v1103_v21 = vsel %vm1061_vm8, %v1101_v48, 0.0  ;;  %v1226_v54 = vrot.slane %v1219_v38, %v3244_v7  ;;  %v1350_v59 = vadd.f32 %v1348_v2, %v1344_v44  ;;  %v1351_v25 = vadd.f32 %v1349_v49, %v1345_v51  ;;  %vm1237_vm8 = vmand %vm4499_vm13, %vm4025_vm6  ;;  %2095 = vrot.lane.b32.xlu1 %v3278_v33, %s3048_s7 }
 0x1ac   : > { %v1189_v37 = vrot.slane %v1182_v13, %v3244_v7  ;;  %v1307_v20 = vcombine.low %v1303_v23, %v1304_v52  ;;  %v1384_v58 = vsel %vm1377_vm7, %v1381_v36, %v1383_v34  ;;  %v1385_v31 = vsel %vm1377_vm7, %v1383_v34, %v1381_v36  ;;  %v1420_v26 = vpop.permute.xlu1 %1419  ;;  %2093 = vrot.lane.b32.xlu0 %v3273_v32, %s3048_s7 }
 0x1ad   : > { %v1388_v41 = vmul.f32 %v1387_v19, %v1379_v43  ;;  %v1389_v30 = vmul.f32 %v1387_v19, %v1378_v53  ;;  %v1392_v18 = vmul.f32 %v1391_v16, %v1385_v31  ;;  %v1393_v22 = vmul.f32 %v1391_v16, %v1384_v58  ;;  %v1418_v42 = vpop.permute.xlu0 %1417 }
 0x1ae   : > { %v1104_v9 = vadd.f32 %v1103_v21, %v1060_v15  ;;  %v1147_v55 = vsel %vm1105_vm4, %v1145_v0, 0.0  ;;  %v1270_v5 = vrot.slane %v1263_v56, %v3244_v7  ;;  %vm1421_vm10 = vcmp.lt.s32.totalorder %v3490_v17, 1 }
 0x1af   : > { %v1233_v63 = vrot.slane %v1226_v54, %v3244_v7  ;;  %v1354_v12 = vcombine.low %v1350_v59, %v1351_v25  ;;  %v1394_v47 = vadd.f32 %v1392_v18, %v1388_v41  ;;  %v1395_v61 = vadd.f32 %v1393_v22, %v1389_v30  ;;  %2102 = vrot.lane.b32.xlu1 %v3258_v29, %s3048_s7  ;;  %v5560_v22 = vld [vmem:[#allocation24_spill] sm:$0xff] }
 0x1b0   : > { %v1191_v4 = vsel %vm1149_vm1, %v1189_v37, 0.0  ;;  %v1314_v14 = vrot.slane %v1307_v20, %v3244_v7  ;;  %vm1325_vm7 = vcmp.ge.s32.totalorder %v4643_v35, 0  ;;  %v1148_v3 = vadd.f32 %v1147_v55, %v1104_v9  ;;  %v1427_v11 = vpop.permute.xlu1 %1426  ;;  %vm1281_vm1 = vmand %vm4499_vm13, %vm4140_vm12  ;;  %2100 = vrot.lane.b32.xlu0 %v3254_v28, %s3048_s7  ;;  %v2875_v55 = vld [vmem:[#allocation3] sm:$0x3]  ;;  %s4968_s7 = sld [smem:[#allocation5 + $0x23]] }
 0x1b1   : > { %vm1326_vm11 = vcmp.lt.s32.totalorder %v4643_v35, 16  ;;  %v1398_v46 = vcombine.low %v1394_v47, %v1395_v61  ;;  %v1431_v1 = vstv %s4586_s11  ;;  %v1277_v8 = vrot.slane %v1270_v5, %v3244_v7  ;;  %v1425_v27 = vpop.permute.xlu0 %1424  ;;  %s4893_s11 = sld [smem:[#allocation5 + $0x20]] }
 0x1b2   : > { %v1422_v45 = vsel %vm1421_vm10, %v1418_v42, %v1420_v26  ;;  %v1423_v50 = vsel %vm1421_vm10, %v1420_v26, %v1418_v42  ;;  %v1435_v48 = vstv %s4593_s18  ;;  %v1192_v38 = vadd.f32 %v1191_v4, %v1148_v3  ;;  %s4896_s18 = sld [smem:[#allocation5 + $0x51]] }
 0x1b3   : > { %v1235_v2 = vsel %vm1193_vm2, %v1233_v63, 0.0  ;;  %v1361_v49 = vrot.slane %v1354_v12, %v3244_v7  ;;  %vm1475_vm4 = vcmp.lt.s32.totalorder %v3490_v17, 127  ;;  %v1321_v13 = vrot.slane %v1314_v14, %v3244_v7  ;;  %vm4688_vm2 = vmand %vm1325_vm7, %vm1326_vm11  ;;  %2139 = vrot.lane.b32.xlu1 %v3278_v33, %s3049_s4 }
 0x1b4   : > { %v1405_v23 = vrot.slane %v1398_v46, %v3244_v7  ;;  %v1428_v52 = vsel %vm1421_vm10, %v1425_v27, %v1427_v11  ;;  %v1429_v19 = vsel %vm1421_vm10, %v1427_v11, %v1425_v27  ;;  %v1432_v44 = vmul.f32 %v1431_v1, %v1423_v50  ;;  %v1474_v53 = vpop.permute.xlu1 %1473  ;;  %vm1328_vm10 = vmand %vm4688_vm2, %vm3783_vm5  ;;  %2137 = vrot.lane.b32.xlu0 %v3273_v32, %s3049_s4 }
 0x1b5   : > { %v1433_v51 = vmul.f32 %v1431_v1, %v1422_v45  ;;  %v1436_v16 = vmul.f32 %v1435_v48, %v1429_v19  ;;  %v1437_v0 = vmul.f32 %v1435_v48, %v1428_v52  ;;  %v1279_v56 = vsel %vm1237_vm8, %v1277_v8, 0.0  ;;  %v1472_v36 = vpop.permute.xlu0 %1471  ;;  %vm1372_vm13 = vmand %vm4688_vm2, %vm3809_vm9 }
 0x1b6   : > { %v1462_v43 = vstv %s4625_s0  ;;  %v1465_v34 = vstv %s4627_s22  ;;  %v1236_v21 = vadd.f32 %v1235_v2, %v1192_v38  ;;  %v1368_v54 = vrot.slane %v1361_v49, %v3244_v7  ;;  %vm1416_vm11 = vmand %vm4688_vm2, %vm3871_vm14  ;;  %s4918_s0 = sld [smem:[#allocation5 + $0x21]]  ;;  %s4921_s22 = sld [smem:[#allocation5 + $0x52]] }
 0x1b7   : > { %v1438_v59 = vadd.f32 %v1436_v16, %v1432_v44  ;;  %v1439_v25 = vadd.f32 %v1437_v0, %v1433_v51  ;;  %v1323_v37 = vsel %vm1281_vm1, %v1321_v13, 0.0  ;;  %v1412_v20 = vrot.slane %v1405_v23, %v3244_v7  ;;  %vm1460_vm8 = vmand %vm4688_vm2, %vm3916_vm15  ;;  %2146 = vrot.lane.b32.xlu1 %v3258_v29, %s3049_s4 }
 0x1b8   : > { %v1476_v58 = vsel %vm1475_vm4, %v1472_v36, %v1474_v53  ;;  %v1477_v31 = vsel %vm1475_vm4, %v1474_v53, %v1472_v36  ;;  %v1280_v10 = vadd.f32 %v1279_v56, %v1236_v21  ;;  %v1485_v30 = vstv %s4652_s6  ;;  %v1481_v18 = vpop.permute.xlu1 %1480  ;;  %2144 = vrot.lane.b32.xlu0 %v3254_v28, %s3049_s4  ;;  %s4946_s6 = sld [smem:[#allocation5 + $0x53]]  ;;  %s4992_s4 = sld [smem:[#allocation5 + $0x55]] }
 0x1b9   : > { %v1442_v41 = vcombine.low %v1438_v59, %v1439_v25  ;;  %v1463_v9 = vmul.f32 %v1462_v43, %v5560_v22  ;;  %v1466_v5 = vmul.f32 %v2875_v55, %v1465_v34  ;;  %v1489_v26 = vstv %s4660_s12  ;;  %v1479_v61 = vpop.permute.xlu0 %1478  ;;  %s3057_s12 = smov 77  }
 0x1ba   : > { %v1324_v63 = vadd.f32 %v1323_v37, %v1280_v10  ;;  %v1370_v12 = vsel %vm1328_vm10, %v1368_v54, 0.0  ;;  %vm1519_vm7 = vcmp.lt.s32.totalorder %v3490_v17, 126  ;;  %v1414_v42 = vsel %vm1372_vm13, %v1412_v20, 0.0  ;;  %vm1514_vm10 = vmand %vm4688_vm2, %vm4025_vm6 }
 0x1bb   : > { %v1449_v47 = vrot.slane %v1442_v41, %v3244_v7  ;;  %v1486_v4 = vmul.f32 %v1485_v30, %v1476_v58  ;;  %v1482_v14 = vsel %vm1475_vm4, %v1479_v61, %v1481_v18  ;;  %v1483_v3 = vsel %vm1475_vm4, %v1481_v18, %v1479_v61  ;;  %vm1470_vm4 = vmand %vm4688_vm2, %vm3946_vm3  ;;  %2183 = vrot.lane.b32.xlu1 %v3278_v33, %s3050_s13 }
 0x1bc   : > { %v1487_v1 = vmul.f32 %v1485_v30, %v1477_v31  ;;  %v1490_v8 = vmul.f32 %v1489_v26, %v1482_v14  ;;  %v1491_v45 = vmul.f32 %v1489_v26, %v1483_v3  ;;  %v1371_v50 = vadd.f32 %v1370_v12, %v1324_v63  ;;  %v1518_v11 = vpop.permute.xlu1 %1517  ;;  %2181 = vrot.lane.b32.xlu0 %v3273_v32, %s3050_s13 }
 0x1bd   : > { %v1456_v46 = vrot.slane %v1449_v47, %v3244_v7  ;;  %v1467_v38 = vadd.f32 %v1466_v5, %v1463_v9  ;;  %v1516_v27 = vpop.permute.xlu0 %1515  ;;  %v1529_v44 = vstv %s4722_s26  ;;  %v1533_v0 = vstv %s4726_s27  ;;  %s4971_s26 = sld [smem:[#allocation5 + $0x54]] }
 0x1be   : > { %v1492_v2 = vadd.f32 %v1490_v8, %v1486_v4  ;;  %v1493_v49 = vadd.f32 %v1491_v45, %v1487_v1  ;;  %v1415_v13 = vadd.f32 %v1414_v42, %v1371_v50  ;;  %v1520_v23 = vsel %vm1519_vm7, %v1516_v27, %v1518_v11  ;;  %s4989_s27 = sld [smem:[#allocation5 + $0x24]] }
 0x1bf   : > { %v1458_v48 = vsel %vm1416_vm11, %v1456_v46, 0.0  ;;  %v1521_v52 = vsel %vm1519_vm7, %v1518_v11, %v1516_v27  ;;  %v1468_v56 = vsel %vm1460_vm8, %v1467_v38, 0.0  ;;  %v1530_v34 = vmul.f32 %v1529_v44, %v1520_v23  ;;  %2190 = vrot.lane.b32.xlu1 %v3258_v29, %s3050_s13 }
 0x1c0   : > { %v1496_v19 = vcombine.low %v1492_v2, %v1493_v49  ;;  %v1459_v51 = vadd.f32 %v1458_v48, %v1415_v13  ;;  %v1525_v16 = vpop.permute.xlu1 %1524  ;;  %vm1563_vm1 = vcmp.lt.s32.totalorder %v3490_v17, 125  ;;  %v1531_v25 = vmul.f32 %v1529_v44, %v1521_v52  ;;  %2188 = vrot.lane.b32.xlu0 %v3254_v28, %s3050_s13  ;;  %s5037_s13 = sld [smem:[#allocation5 + $0x26]] }
 0x1c1   : > { %v1523_v43 = vpop.permute.xlu0 %1522  ;;  %v1573_v5 = vstv %s4762_s30  ;;  %v1577_v63 = vstv %s4765_s25  ;;  %vm1610_vm13 = vcmp.lt.s32.totalorder %v3490_v17, 115  ;;  %v1620_v13 = vstv %s4787_s19  ;;  %s5016_s30 = sld [smem:[#allocation5 + $0x25]]  ;;  %s5019_s25 = sld [smem:[#allocation5 + $0x56]] }
 0x1c2   : > { %v1503_v53 = vrot.slane %v1496_v19, %v3244_v7  ;;  %v1526_v21 = vsel %vm1519_vm7, %v1523_v43, %v1525_v16  ;;  %v1527_v54 = vsel %vm1519_vm7, %v1525_v16, %v1523_v43  ;;  %v1469_v20 = vadd.f32 %v1468_v56, %v1459_v51  ;;  %vm1558_vm7 = vmand %vm4688_vm2, %vm4140_vm12  ;;  %s5040_s19 = sld [smem:[#allocation5 + $0x57]] }
 0x1c3   : > { %v1534_v36 = vmul.f32 %v1533_v0, %v1526_v21  ;;  %v1535_v37 = vmul.f32 %v1533_v0, %v1527_v54  ;;  %2230 = vrot.lane.b32.xlu1 %v3278_v33, %s3051_s8  ;;  %v1624_v52 = vstv %s4790_s23  ;;  %vm1654_vm11 = vcmp.lt.s32.totalorder %v3490_v17, 114  ;;  %s2727_s23 = sld [smem:[#allocation5 + $0x58]] }
 0x1c4   : > { %v1510_v59 = vrot.slane %v1503_v53, %v3244_v7  ;;  %v1562_v58 = vpop.permute.xlu1 %1561  ;;  %2228 = vrot.lane.b32.xlu0 %v3273_v32, %s3051_s8  ;;  %vm1602_vm2 = vcmp.ge.s32.totalorder %v4643_v35, 4294967295  ;;  %vm1603_vm8 = vcmp.lt.s32.totalorder %v4643_v35, 15 }
 0x1c5   : > { %v1536_v10 = vadd.f32 %v1534_v36, %v1530_v34  ;;  %v1537_v41 = vadd.f32 %v1535_v37, %v1531_v25  ;;  %v1560_v30 = vpop.permute.xlu0 %1559 }
 0x1c6   : > { %v1512_v31 = vsel %vm1470_vm4, %v1510_v59, 0.0  ;;  %v1564_v22 = vsel %vm1563_vm1, %v1560_v30, %v1562_v58  ;;  %v1565_v9 = vsel %vm1563_vm1, %v1562_v58, %v1560_v30  ;;  %vm4837_vm4 = vmand %vm1602_vm2, %vm1603_vm8  ;;  %v1668_v30 = vstv %s4815_s14  ;;  %s5098_s14 = sld [smem:[#allocation5 + $0x28]] }
 0x1c7   : > { %v1513_v18 = vadd.f32 %v1512_v31, %v1469_v20  ;;  %v1540_v55 = vcombine.low %v1536_v10, %v1537_v41  ;;  %v1574_v61 = vmul.f32 %v1573_v5, %v1564_v22  ;;  %v1575_v3 = vmul.f32 %v1573_v5, %v1565_v9  ;;  %2237 = vrot.lane.b32.xlu1 %v3258_v29, %s3051_s8  ;;  %vm1737_vm8 = vmand %vm4837_vm4, %vm3916_vm15 }
 0x1c8   : > { %v1569_v26 = vpop.permute.xlu1 %1568  ;;  %2235 = vrot.lane.b32.xlu0 %v3254_v28, %s3051_s8  ;;  %v1664_v10 = vstv %s4812_s9  ;;  %vm1786_vm2 = vcmp.lt.s32.totalorder %v3490_v17, 111  ;;  %s2726_s8 = sld [smem:[#allocation5 + $0x27]]  ;;  %s5094_s9 = sld [smem:[#allocation5 + $0x59]] }
 0x1c9   : > { %v1547_v12 = vrot.slane %v1540_v55, %v3244_v7  ;;  %v1567_v47 = vpop.permute.xlu0 %1566 }
 0x1ca   : > { %v1570_v42 = vsel %vm1563_vm1, %v1567_v47, %v1569_v26  ;;  %v1571_v4 = vsel %vm1563_vm1, %v1569_v26, %v1567_v47  ;;  %vm1605_vm1 = vmand %vm4837_vm4, %vm3783_vm5 }
 0x1cb   : > { %v1554_v14 = vrot.slane %v1547_v12, %v3244_v7  ;;  %v1578_v46 = vmul.f32 %v1577_v63, %v1570_v42  ;;  %v1579_v1 = vmul.f32 %v1577_v63, %v1571_v4  ;;  %2274 = vrot.lane.b32.xlu1 %v3278_v33, %s3052_s17 }
 0x1cc   : > { %v1609_v8 = vpop.permute.xlu1 %1608  ;;  %2272 = vrot.lane.b32.xlu0 %v3273_v32, %s3052_s17 }
 0x1cd   : > { %v1556_v45 = vsel %vm1514_vm10, %v1554_v14, 0.0  ;;  %v1580_v50 = vadd.f32 %v1578_v46, %v1574_v61  ;;  %v1581_v11 = vadd.f32 %v1579_v1, %v1575_v3  ;;  %v1607_v48 = vpop.permute.xlu0 %1606  ;;  %vm1698_vm10 = vcmp.lt.s32.totalorder %v3490_v17, 113 }
 0x1ce   : > { %v1557_v38 = vadd.f32 %v1556_v45, %v1513_v18  ;;  %v1611_v2 = vsel %vm1610_vm13, %v1607_v48, %v1609_v8  ;;  %v1612_v49 = vsel %vm1610_vm13, %v1609_v8, %v1607_v48  ;;  %v1712_v48 = vstv %s4846_s15  ;;  %s5106_s15 = sld [smem:[#allocation5 + $0x2a]] }
 0x1cf   : > { %v1584_v27 = vcombine.low %v1580_v50, %v1581_v11  ;;  %v1621_v51 = vmul.f32 %v1620_v13, %v1611_v2  ;;  %v1622_v53 = vmul.f32 %v1620_v13, %v1612_v49  ;;  %2281 = vrot.lane.b32.xlu1 %v3258_v29, %s3052_s17  ;;  %v1708_v50 = vstv %s4843_s29  ;;  %s5104_s29 = sld [smem:[#allocation5 + $0x5a]] }
 0x1d0   : > { %v1616_v23 = vpop.permute.xlu1 %1615  ;;  %2279 = vrot.lane.b32.xlu0 %v3254_v28, %s3052_s17  ;;  %s5102_s17 = sld [smem:[#allocation5 + $0x29]] }
 0x1d1   : > { %v1591_v19 = vrot.slane %v1584_v27, %v3244_v7  ;;  %v1614_v44 = vpop.permute.xlu0 %1613 }
 0x1d2   : > { %v1617_v16 = vsel %vm1610_vm13, %v1614_v44, %v1616_v23  ;;  %v1618_v0 = vsel %vm1610_vm13, %v1616_v23, %v1614_v44  ;;  %vm1649_vm13 = vmand %vm4837_vm4, %vm3809_vm9 }
 0x1d3   : > { %v1598_v56 = vrot.slane %v1591_v19, %v3244_v7  ;;  %v1625_v43 = vmul.f32 %v1624_v52, %v1617_v16  ;;  %v1626_v34 = vmul.f32 %v1624_v52, %v1618_v0  ;;  %2318 = vrot.lane.b32.xlu1 %v3278_v33, %s3053_s10 }
 0x1d4   : > { %v1653_v15 = vpop.permute.xlu1 %1652  ;;  %2316 = vrot.lane.b32.xlu0 %v3273_v32, %s3053_s10 }
 0x1d5   : > { %v1600_v21 = vsel %vm1558_vm7, %v1598_v56, 0.0  ;;  %v1627_v54 = vadd.f32 %v1625_v43, %v1621_v51  ;;  %v1628_v59 = vadd.f32 %v1626_v34, %v1622_v53  ;;  %v1651_v25 = vpop.permute.xlu0 %1650  ;;  %vm1742_vm7 = vcmp.lt.s32.totalorder %v3490_v17, 112 }
 0x1d6   : > { %v1601_v36 = vadd.f32 %v1600_v21, %v1557_v38  ;;  %v1655_v37 = vsel %vm1654_vm11, %v1651_v25, %v1653_v15  ;;  %v1656_v20 = vsel %vm1654_vm11, %v1653_v15, %v1651_v25  ;;  %v1756_v25 = vstv %s4871_s16  ;;  %s5114_s16 = sld [smem:[#allocation5 + $0x5c]] }
 0x1d7   : > { %v1631_v31 = vcombine.low %v1627_v54, %v1628_v59  ;;  %v1665_v9 = vmul.f32 %v1664_v10, %v1655_v37  ;;  %v1666_v63 = vmul.f32 %v1664_v10, %v1656_v20  ;;  %2325 = vrot.lane.b32.xlu1 %v3258_v29, %s3053_s10  ;;  %v1752_v54 = vstv %s4868_s21  ;;  %s5112_s21 = sld [smem:[#allocation5 + $0x2b]] }
 0x1d8   : > { %v1660_v41 = vpop.permute.xlu1 %1659  ;;  %2323 = vrot.lane.b32.xlu0 %v3254_v28, %s3053_s10  ;;  %s5108_s10 = sld [smem:[#allocation5 + $0x5b]] }
 0x1d9   : > { %v1638_v18 = vrot.slane %v1631_v31, %v3244_v7  ;;  %v1658_v22 = vpop.permute.xlu0 %1657 }
 0x1da   : > { %v1661_v55 = vsel %vm1654_vm11, %v1658_v22, %v1660_v41  ;;  %v1662_v5 = vsel %vm1654_vm11, %v1660_v41, %v1658_v22  ;;  %vm1693_vm11 = vmand %vm4837_vm4, %vm3871_vm14 }
 0x1db   : > { %v1645_v26 = vrot.slane %v1638_v18, %v3244_v7  ;;  %v1669_v12 = vmul.f32 %v1668_v30, %v1661_v55  ;;  %v1670_v47 = vmul.f32 %v1668_v30, %v1662_v5  ;;  %2362 = vrot.lane.b32.xlu1 %v3278_v33, %s3054_s28 }
 0x1dc   : > { %v1697_v61 = vpop.permute.xlu1 %1696  ;;  %2360 = vrot.lane.b32.xlu0 %v3273_v32, %s3054_s28 }
 0x1dd   : > { %v1647_v42 = vsel %vm1605_vm1, %v1645_v26, 0.0  ;;  %v1671_v4 = vadd.f32 %v1669_v12, %v1665_v9  ;;  %v1672_v14 = vadd.f32 %v1670_v47, %v1666_v63  ;;  %v1695_v3 = vpop.permute.xlu0 %1694  ;;  %vm1830_vm1 = vcmp.lt.s32.totalorder %v3490_v17, 110 }
 0x1de   : > { %v1648_v46 = vadd.f32 %v1647_v42, %v1601_v36  ;;  %v1699_v1 = vsel %vm1698_vm10, %v1695_v3, %v1697_v61  ;;  %v1700_v8 = vsel %vm1698_vm10, %v1697_v61, %v1695_v3  ;;  %v1800_v3 = vstv %s4896_s18  ;;  %s5130_s18 = sld [smem:[#allocation5 + $0x2d]] }
 0x1df   : > { %v1675_v45 = vcombine.low %v1671_v4, %v1672_v14  ;;  %v1709_v49 = vmul.f32 %v1708_v50, %v1699_v1  ;;  %v1710_v52 = vmul.f32 %v1708_v50, %v1700_v8  ;;  %2369 = vrot.lane.b32.xlu1 %v3258_v29, %s3054_s28  ;;  %v1796_v4 = vstv %s4893_s11  ;;  %s5124_s11 = sld [smem:[#allocation5 + $0x5d]] }
 0x1e0   : > { %v1704_v11 = vpop.permute.xlu1 %1703  ;;  %2367 = vrot.lane.b32.xlu0 %v3254_v28, %s3054_s28  ;;  %s5122_s28 = sld [smem:[#allocation5 + $0x2c]] }
 0x1e1   : > { %v1682_v38 = vrot.slane %v1675_v45, %v3244_v7  ;;  %v1702_v2 = vpop.permute.xlu0 %1701 }
 0x1e2   : > { %v1705_v27 = vsel %vm1698_vm10, %v1702_v2, %v1704_v11  ;;  %v1706_v13 = vsel %vm1698_vm10, %v1704_v11, %v1702_v2  ;;  %vm1781_vm10 = vmand %vm4837_vm4, %vm3946_vm3 }
 0x1e3   : > { %v1689_v23 = vrot.slane %v1682_v38, %v3244_v7  ;;  %v1713_v19 = vmul.f32 %v1712_v48, %v1705_v27  ;;  %v1714_v44 = vmul.f32 %v1712_v48, %v1706_v13  ;;  %2406 = vrot.lane.b32.xlu1 %v3278_v33, %s3055_s20 }
 0x1e4   : > { %v1741_v51 = vpop.permute.xlu1 %1740  ;;  %2404 = vrot.lane.b32.xlu0 %v3273_v32, %s3055_s20 }
 0x1e5   : > { %v1691_v16 = vsel %vm1649_vm13, %v1689_v23, 0.0  ;;  %v1715_v0 = vadd.f32 %v1713_v19, %v1709_v49  ;;  %v1716_v56 = vadd.f32 %v1714_v44, %v1710_v52  ;;  %v1739_v53 = vpop.permute.xlu0 %1738  ;;  %vm1874_vm13 = vcmp.lt.s32.totalorder %v3490_v17, 109 }
 0x1e6   : > { %v1692_v43 = vadd.f32 %v1691_v16, %v1648_v46  ;;  %v1743_v34 = vsel %vm1742_vm7, %v1739_v53, %v1741_v51  ;;  %v1744_v15 = vsel %vm1742_vm7, %v1741_v51, %v1739_v53  ;;  %v1844_v53 = vstv %s4921_s22  ;;  %s5174_s22 = sld [smem:[#allocation5 + $0x5f]] }
 0x1e7   : > { %v1719_v21 = vcombine.low %v1715_v0, %v1716_v56  ;;  %v1753_v20 = vmul.f32 %v1752_v54, %v1743_v34  ;;  %v1754_v30 = vmul.f32 %v1752_v54, %v1744_v15  ;;  %2413 = vrot.lane.b32.xlu1 %v3258_v29, %s3055_s20  ;;  %v1840_v0 = vstv %s4918_s0  ;;  %s5172_s0 = sld [smem:[#allocation5 + $0x2e]] }
 0x1e8   : > { %v1748_v59 = vpop.permute.xlu1 %1747  ;;  %2411 = vrot.lane.b32.xlu0 %v3254_v28, %s3055_s20  ;;  %s5140_s20 = sld [smem:[#allocation5 + $0x5e]] }
 0x1e9   : > { %v1726_v36 = vrot.slane %v1719_v21, %v3244_v7  ;;  %v1746_v37 = vpop.permute.xlu0 %1745 }
 0x1ea   : > { %v1749_v31 = vsel %vm1742_vm7, %v1746_v37, %v1748_v59  ;;  %v1750_v10 = vsel %vm1742_vm7, %v1748_v59, %v1746_v37  ;;  %vm1825_vm7 = vmand %vm4837_vm4, %vm4025_vm6 }
 0x1eb   : > { %v1733_v41 = vrot.slane %v1726_v36, %v3244_v7  ;;  %v1757_v18 = vmul.f32 %v1756_v25, %v1749_v31  ;;  %v1758_v22 = vmul.f32 %v1756_v25, %v1750_v10  ;;  %2450 = vrot.lane.b32.xlu1 %v3278_v33, %s3056_s5 }
 0x1ec   : > { %v1785_v9 = vpop.permute.xlu1 %1784  ;;  %2448 = vrot.lane.b32.xlu0 %v3273_v32, %s3056_s5 }
 0x1ed   : > { %v1735_v55 = vsel %vm1693_vm11, %v1733_v41, 0.0  ;;  %v1759_v5 = vadd.f32 %v1757_v18, %v1753_v20  ;;  %v1760_v26 = vadd.f32 %v1758_v22, %v1754_v30  ;;  %v1783_v63 = vpop.permute.xlu0 %1782  ;;  %vm1921_vm11 = vcmp.lt.s32.totalorder %v3490_v17, 99 }
 0x1ee   : > { %v1736_v12 = vadd.f32 %v1735_v55, %v1692_v43  ;;  %v1787_v47 = vsel %vm1786_vm2, %v1783_v63, %v1785_v9  ;;  %v1788_v61 = vsel %vm1786_vm2, %v1785_v9, %v1783_v63  ;;  %v1884_v55 = vstv %s4943_s3 }
 0x1ef   : > { %v1763_v42 = vcombine.low %v1759_v5, %v1760_v26  ;;  %v1797_v8 = vmul.f32 %v1796_v4, %v1787_v47  ;;  %v1798_v48 = vmul.f32 %v1796_v4, %v1788_v61  ;;  %2457 = vrot.lane.b32.xlu1 %v3258_v29, %s3056_s5  ;;  %v1888_v5 = vstv %s4946_s6  ;;  %s5234_s6 = sld [smem:[#allocation5 + $0x2f]] }
 0x1f0   : > { %v1792_v14 = vpop.permute.xlu1 %1791  ;;  %2455 = vrot.lane.b32.xlu0 %v3254_v28, %s3056_s5 }
 0x1f1   : > { %v1770_v46 = vrot.slane %v1763_v42, %v3244_v7  ;;  %v1790_v1 = vpop.permute.xlu0 %1789 }
 0x1f2   : > { %v1793_v45 = vsel %vm1786_vm2, %v1790_v1, %v1792_v14  ;;  %v1794_v50 = vsel %vm1786_vm2, %v1792_v14, %v1790_v1  ;;  %vm1869_vm2 = vmand %vm4837_vm4, %vm4140_vm12  ;;  %vm1914_vm4 = vcmp.lt.s32.totalorder %v4643_v35, 14 }
 0x1f3   : > { %v1777_v11 = vrot.slane %v1770_v46, %v3244_v7  ;;  %v1801_v38 = vmul.f32 %v1800_v3, %v1793_v45  ;;  %v1802_v2 = vmul.f32 %v1800_v3, %v1794_v50  ;;  %2494 = vrot.lane.b32.xlu1 %v3278_v33, %s3057_s12 }
 0x1f4   : > { %v1829_v49 = vpop.permute.xlu1 %1828  ;;  %2492 = vrot.lane.b32.xlu0 %v3273_v32, %s3057_s12 }
 0x1f5   : > { %v1779_v27 = vsel %vm1737_vm8, %v1777_v11, 0.0  ;;  %v1803_v13 = vadd.f32 %v1801_v38, %v1797_v8  ;;  %v1804_v23 = vadd.f32 %v1802_v2, %v1798_v48  ;;  %v1827_v52 = vpop.permute.xlu0 %1826  ;;  %v1931_v38 = vstv %s4968_s7  ;;  %s5278_s7 = sld [smem:[#allocation5 + $0x30]] }
 0x1f6   : > { %v1780_v19 = vadd.f32 %v1779_v27, %v1736_v12  ;;  %v1831_v44 = vsel %vm1830_vm1, %v1827_v52, %v1829_v49  ;;  %v1832_v51 = vsel %vm1830_vm1, %v1829_v49, %v1827_v52  ;;  %v1935_v49 = vstv %s4971_s26  ;;  %s5280_s26 = sld [smem:[#allocation5 + $0x61]] }
 0x1f7   : > { %v1807_v16 = vcombine.low %v1803_v13, %v1804_v23  ;;  %v1841_v15 = vmul.f32 %v1840_v0, %v1831_v44  ;;  %v1842_v25 = vmul.f32 %v1840_v0, %v1832_v51  ;;  %2501 = vrot.lane.b32.xlu1 %v3258_v29, %s3057_s12  ;;  %vm1965_vm8 = vcmp.lt.s32.totalorder %v3490_v17, 98 }
 0x1f8   : > { %v1836_v56 = vpop.permute.xlu1 %1835  ;;  %2499 = vrot.lane.b32.xlu0 %v3254_v28, %s3057_s12  ;;  %s5236_s12 = sld [smem:[#allocation5 + $0x60]] }
 0x1f9   : > { %v1814_v43 = vrot.slane %v1807_v16, %v3244_v7  ;;  %v1834_v34 = vpop.permute.xlu0 %1833 }
 0x1fa   : > { %v1837_v21 = vsel %vm1830_vm1, %v1834_v34, %v1836_v56  ;;  %v1838_v54 = vsel %vm1830_vm1, %v1836_v56, %v1834_v34  ;;  %vm1913_vm1 = vcmp.ge.s32.totalorder %v4643_v35, 4294967294 }
 0x1fb   : > { %v1821_v59 = vrot.slane %v1814_v43, %v3244_v7  ;;  %v1845_v36 = vmul.f32 %v1844_v53, %v1837_v21  ;;  %v1846_v37 = vmul.f32 %v1844_v53, %v1838_v54 }
 0x1fc   : > { %v1873_v20 = vpop.permute.xlu1 %1872 }
 0x1fd   : > { %v1823_v31 = vsel %vm1781_vm10, %v1821_v59, 0.0  ;;  %v1847_v10 = vadd.f32 %v1845_v36, %v1841_v15  ;;  %v1848_v41 = vadd.f32 %v1846_v37, %v1842_v25  ;;  %v1871_v30 = vpop.permute.xlu0 %1870  ;;  %vm5011_vm10 = vmand %vm1913_vm1, %vm1914_vm4  ;;  %v1975_v36 = vstv %s4989_s27  ;;  %s5567_s27 = sld [smem:[#allocation16_spill]] }
 0x1fe   : > { %v1824_v18 = vadd.f32 %v1823_v31, %v1780_v19  ;;  %v1875_v33 = vsel %vm1874_vm13, %v1871_v30, %v1873_v20  ;;  %v1876_v22 = vsel %vm1874_vm13, %v1873_v20, %v1871_v30  ;;  %v1979_v37 = vstv %s4992_s4  ;;  %vm2048_vm1 = vmand %vm5011_vm10, %vm3916_vm15  ;;  %s5568_s4 = sld [smem:[#allocation20_spill]] }
 0x1ff   : > { %v1851_v9 = vcombine.low %v1847_v10, %v1848_v41  ;;  %v1885_v12 = vmul.f32 %v1884_v55, %v1875_v33  ;;  %v1886_v61 = vmul.f32 %v1884_v55, %v1876_v22  ;;  %vm2097_vm4 = vcmp.lt.s32.totalorder %v3490_v17, 95 }
 0x200   : > { %v1880_v32 = vpop.permute.xlu1 %1879 }
 0x201   : > { %v1858_v26 = vrot.slane %v1851_v9, %v3244_v7  ;;  %v1878_v63 = vpop.permute.xlu0 %1877 }
 0x202   : > { %v1881_v29 = vsel %vm1874_vm13, %v1878_v63, %v1880_v32  ;;  %v1882_v28 = vsel %vm1874_vm13, %v1880_v32, %v1878_v63  ;;  %vm1916_vm13 = vmand %vm5011_vm10, %vm3783_vm5 }
 0x203   : > { %v1865_v47 = vrot.slane %v1858_v26, %v3244_v7  ;;  %v1889_v42 = vmul.f32 %v1888_v5, %v1881_v29  ;;  %v1890_v4 = vmul.f32 %v1888_v5, %v1882_v28 }
 0x204   : > { %v1920_v14 = vpop.permute.xlu1 %1919  ;;  %p5571_p12 = scmp.ne.s32.totalorder %s5568_s4, 0 }
 0x205   : > { %v1867_v3 = vsel %vm1825_vm7, %v1865_v47, 0.0  ;;  %v1891_v46 = vadd.f32 %v1889_v42, %v1885_v12  ;;  %v1892_v1 = vadd.f32 %v1890_v4, %v1886_v61  ;;  %v1918_v8 = vpop.permute.xlu0 %1917  ;;  %vm2009_vm7 = vcmp.lt.s32.totalorder %v3490_v17, 97 }
 0x206   : > { %v1868_v45 = vadd.f32 %v1867_v3, %v1824_v18  ;;  %v1922_v50 = vsel %vm1921_vm11, %v1918_v8, %v1920_v14  ;;  %v1923_v11 = vsel %vm1921_vm11, %v1920_v14, %v1918_v8  ;;  %v2019_v61 = vstv %s5016_s30  ;;  %s2647_s30 = sshll.u32 %s3208_s24, 1 }
 0x207   : > { %v1895_v48 = vcombine.low %v1891_v46, %v1892_v1  ;;  %v1932_v23 = vmul.f32 %v1931_v38, %v1922_v50  ;;  %v1933_v51 = vmul.f32 %v1931_v38, %v1923_v11  ;;  %v2023_v4 = vstv %s5019_s25  ;;  %s2753_s25 = sshll.u32 %s5567_s27, 5 }
 0x208   : > { %v1927_v2 = vpop.permute.xlu1 %1926 }
 0x209   : > { %v1902_v27 = vrot.slane %v1895_v48, %v3244_v7  ;;  %v1925_v13 = vpop.permute.xlu0 %1924 }
 0x20a   : > { %v1928_v52 = vsel %vm1921_vm11, %v1925_v13, %v1927_v2  ;;  %v1929_v19 = vsel %vm1921_vm11, %v1927_v2, %v1925_v13  ;;  %vm1960_vm11 = vmand %vm5011_vm10, %vm3809_vm9 }
 0x20b   : > { %v1909_v44 = vrot.slane %v1902_v27, %v3244_v7  ;;  %v1936_v16 = vmul.f32 %v1935_v49, %v1928_v52  ;;  %v1937_v0 = vmul.f32 %v1935_v49, %v1929_v19 }
 0x20c   : > { %v1964_v58 = vpop.permute.xlu1 %1963 }
 0x20d   : > { %v1911_v56 = vsel %vm1869_vm2, %v1909_v44, 0.0  ;;  %v1938_v53 = vadd.f32 %v1936_v16, %v1932_v23  ;;  %v1939_v43 = vadd.f32 %v1937_v0, %v1933_v51  ;;  %v1962_v34 = vpop.permute.xlu0 %1961  ;;  %vm2053_vm2 = vcmp.lt.s32.totalorder %v3490_v17, 96 }
 0x20e   : > { %v1912_v15 = vadd.f32 %v1911_v56, %v1868_v45  ;;  %v1966_v21 = vsel %vm1965_vm8, %v1962_v34, %v1964_v58  ;;  %v1967_v54 = vsel %vm1965_vm8, %v1964_v58, %v1962_v34  ;;  %v2063_v51 = vstv %s5037_s13  ;;  %s210_s13 = scalar_lea.vmem [#allocation9], %s2647_s30 }
 0x20f   : > { %v1942_v25 = vcombine.low %v1938_v53, %v1939_v43  ;;  %v1976_v10 = vmul.f32 %v1975_v36, %v1966_v21  ;;  %v1977_v33 = vmul.f32 %v1975_v36, %v1967_v54  ;;  %v2067_v0 = vstv %s5040_s19  ;;  %s2557_s19 = sshll.u32 %s210_s13, 4  ;;  %s5349_s19 = int_to_ptr.vmem [resolvable:$true] %s2557_s19 }
 0x210   : > { %v1971_v35 = vpop.permute.xlu1 %1970 }
 0x211   : > { %v1949_v20 = vrot.slane %v1942_v25, %v3244_v7  ;;  %v1969_v31 = vpop.permute.xlu0 %1968 }
 0x212   : > { %v1972_v41 = vsel %vm1965_vm8, %v1969_v31, %v1971_v35  ;;  %v1973_v30 = vsel %vm1965_vm8, %v1971_v35, %v1969_v31  ;;  %vm2004_vm8 = vmand %vm5011_vm10, %vm3871_vm14 }
 0x213   : > { %v1956_v18 = vrot.slane %v1949_v20, %v3244_v7  ;;  %v1980_v22 = vmul.f32 %v1979_v37, %v1972_v41  ;;  %v1981_v9 = vmul.f32 %v1979_v37, %v1973_v30 }
 0x214   : > { %v2008_v55 = vpop.permute.xlu1 %2007 }
 0x215   : > { %v1958_v32 = vsel %vm1916_vm13, %v1956_v18, 0.0  ;;  %v1982_v5 = vadd.f32 %v1980_v22, %v1976_v10  ;;  %v1983_v26 = vadd.f32 %v1981_v9, %v1977_v33  ;;  %v2006_v63 = vpop.permute.xlu0 %2005  ;;  %vm2141_vm13 = vcmp.lt.s32.totalorder %v3490_v17, 94 }
 0x216   : > { %v1959_v12 = vadd.f32 %v1958_v32, %v1912_v15  ;;  %v2010_v29 = vsel %vm2009_vm7, %v2006_v63, %v2008_v55  ;;  %v2011_v28 = vsel %vm2009_vm7, %v2008_v55, %v2006_v63 }
 0x217   : > { %v1986_v47 = vcombine.low %v1982_v5, %v1983_v26  ;;  %v2020_v46 = vmul.f32 %v2019_v61, %v2010_v29  ;;  %v2021_v50 = vmul.f32 %v2019_v61, %v2011_v28 }
 0x218   : > { %v2015_v42 = vpop.permute.xlu1 %2014 }
 0x219   : > { %v1993_v14 = vrot.slane %v1986_v47, %v3244_v7  ;;  %v2013_v3 = vpop.permute.xlu0 %2012 }
 0x21a   : > { %v2016_v1 = vsel %vm2009_vm7, %v2013_v3, %v2015_v42  ;;  %v2017_v8 = vsel %vm2009_vm7, %v2015_v42, %v2013_v3  ;;  %v2111_v3 = vstv %s2727_s23  ;;  %vm2185_vm7 = vcmp.lt.s32.totalorder %v3490_v17, 93 }
 0x21b   : > { %v2000_v45 = vrot.slane %v1993_v14, %v3244_v7  ;;  %v2024_v11 = vmul.f32 %v2023_v4, %v2016_v1  ;;  %v2025_v48 = vmul.f32 %v2023_v4, %v2017_v8 }
 0x21c   : > { %v2052_v38 = vpop.permute.xlu1 %2051 }
 0x21d   : > { %v2002_v2 = vsel %vm1960_vm11, %v2000_v45, 0.0  ;;  %v2026_v49 = vadd.f32 %v2024_v11, %v2020_v46  ;;  %v2027_v27 = vadd.f32 %v2025_v48, %v2021_v50  ;;  %v2050_v13 = vpop.permute.xlu0 %2049  ;;  %v2107_v45 = vstv %s2726_s8 }
 0x21e   : > { %v2003_v23 = vadd.f32 %v2002_v2, %v1959_v12  ;;  %v2054_v52 = vsel %vm2053_vm2, %v2050_v13, %v2052_v38  ;;  %v2055_v19 = vsel %vm2053_vm2, %v2052_v38, %v2050_v13  ;;  %vm2232_vm11 = vcmp.lt.s32.totalorder %v3490_v17, 83 }
 0x21f   : > { %v2030_v44 = vcombine.low %v2026_v49, %v2027_v27  ;;  %v2064_v53 = vmul.f32 %v2063_v51, %v2054_v52  ;;  %v2065_v21 = vmul.f32 %v2063_v51, %v2055_v19 }
 0x220   : > { %v2059_v16 = vpop.permute.xlu1 %2058 }
 0x221   : > { %v2037_v58 = vrot.slane %v2030_v44, %v3244_v7  ;;  %v2057_v56 = vpop.permute.xlu0 %2056  ;;  %v2155_v44 = vstv %s5094_s9  ;;  %s5569_s9 = sld [smem:[#allocation38_spill]] }
 0x222   : > { %v2060_v43 = vsel %vm2053_vm2, %v2057_v56, %v2059_v16  ;;  %v2061_v34 = vsel %vm2053_vm2, %v2059_v16, %v2057_v56  ;;  %vm2276_vm2 = vcmp.lt.s32.totalorder %v3490_v17, 82 }
 0x223   : > { %v2044_v15 = vrot.slane %v2037_v58, %v3244_v7  ;;  %v2068_v54 = vmul.f32 %v2067_v0, %v2060_v43  ;;  %v2069_v25 = vmul.f32 %v2067_v0, %v2061_v34  ;;  %v2151_v58 = vstv %s5098_s14 }
 0x224   : > { %v2096_v36 = vpop.permute.xlu1 %2095 }
 0x225   : > { %v2046_v35 = vsel %vm2004_vm8, %v2044_v15, 0.0  ;;  %v2070_v37 = vadd.f32 %v2068_v54, %v2064_v53  ;;  %v2071_v20 = vadd.f32 %v2069_v25, %v2065_v21  ;;  %v2094_v31 = vpop.permute.xlu0 %2093  ;;  %v2195_v54 = vstv %s5102_s17  ;;  %s2543_s17 = scalar_lea.sflag [#allocation8], %s3208_s24 }
 0x226   : > { %v2047_v10 = vadd.f32 %v2046_v35, %v2003_v23  ;;  %v2098_v50 = vsel %vm2097_vm4, %v2094_v31, %v2096_v36  ;;  %v2099_v11 = vsel %vm2097_vm4, %v2096_v36, %v2094_v31  ;;  %v2199_v25 = vstv %s5104_s29  ;;  %s2917_s29 = scalar_lea.vmem %s5349_s19, 32 }
 0x227   : > { %v2074_v41 = vcombine.low %v2070_v37, %v2071_v20  ;;  %v2108_v49 = vmul.f32 %v2107_v45, %v2098_v50  ;;  %v2109_v27 = vmul.f32 %v2107_v45, %v2099_v11  ;;  %v2242_v36 = vstv %s5106_s15  ;;  %s5347_s14 = scalar_lea.hbm %s5569_s9, %s2753_s25  ;;  %p2918_p11 = scmp.ne.s32.totalorder %s5349_s19, %s2917_s29 }
 0x228   : > { %v2103_v30 = vpop.permute.xlu1 %2102  ;;  %v2246_v35 = vstv %s5108_s10  ;;  %vm2320_vm8 = vcmp.lt.s32.totalorder %v3490_v17, 81  ;;  %v2374_v11 = vstv %s5130_s18  ;;  %s3058_s15 = smov [#allocation9]  }
 0x229   : > { %v2081_v18 = vrot.slane %v2074_v41, %v3244_v7  ;;  %v2101_v33 = vpop.permute.xlu0 %2100  ;;  %v2290_v41 = vstv %s5114_s16  ;;  %p2919_p0 = pnand %p2918_p11, %p5571_p12  ;;  %s2921_s10 = sshll.u32 %s3058_s15, 4  ;;  %s2922_s10 = int_to_ptr.vmem [resolvable:$false] %s2921_s10 }
 0x22a   : > { %v2104_v46 = vsel %vm2097_vm4, %v2101_v33, %v2103_v30  ;;  %v2105_v1 = vsel %vm2097_vm4, %v2103_v30, %v2101_v33  ;;  %vm2092_vm4 = vmand %vm5011_vm10, %vm3946_vm3  ;;  %p2924_p9 = scmp.lt.s32.totalorder %s5349_s19, %s2922_s10 }
 0x22b   : > { %v2088_v22 = vrot.slane %v2081_v18, %v3244_v7  ;;  %v2112_v38 = vmul.f32 %v2111_v3, %v2104_v46  ;;  %v2113_v2 = vmul.f32 %v2111_v3, %v2105_v1  ;;  %v2334_v3 = vstv %s5124_s11  ;;  %p2920_p3 = pneg %p2919_p0 }
 0x22c   : > { %v2140_v9 = vpop.permute.xlu1 %2139 }
 0x22d   : > { %v2090_v55 = vsel %vm2048_vm1, %v2088_v22, 0.0  ;;  %v2138_v32 = vpop.permute.xlu0 %2137  ;;  %v2114_v52 = vadd.f32 %v2112_v38, %v2108_v49  ;;  %v2115_v19 = vadd.f32 %v2113_v2, %v2109_v27  ;;  %vm2364_vm1 = vcmp.lt.s32.totalorder %v3490_v17, 80 }
 0x22e   : > { %v5075_v5 = vadd.f32 %v2090_v55, %v2047_v10  ;;  %v2142_v43 = vsel %vm2141_vm13, %v2138_v32, %v2140_v9  ;;  %v2143_v34 = vsel %vm2141_vm13, %v2140_v9, %v2138_v32  ;;  %v2286_v10 = vstv %s5112_s21  ;;  %s2923_s21 = scalar_lea.vmem %s2922_s10, 64 }
 0x22f   : > { %v2118_v53 = vcombine.low %v2114_v52, %v2115_v19  ;;  %v2152_v20 = vmul.f32 %v2151_v58, %v2142_v43  ;;  %v2153_v31 = vmul.f32 %v2151_v58, %v2143_v34  ;;  %v2378_v58 = vstv %s5140_s20  ;;  %p2925_p2 = scmp.lt.s32.totalorder %s2923_s21, %s2917_s29 }
 0x230   : > { %v2147_v26 = vpop.permute.xlu1 %2146 }
 0x231   : > { %v2145_v63 = vpop.permute.xlu0 %2144  ;;  %v2125_v18 = vrot.slane %v2118_v53, %v3244_v7  ;;  %p2926_p5 = por %p2925_p2, %p2924_p9 }
 0x232   : > { %v2148_v51 = vsel %vm2141_vm13, %v2145_v63, %v2147_v26  ;;  %v2149_v16 = vsel %vm2141_vm13, %v2147_v26, %v2145_v63  ;;  %vm2408_vm13 = vcmp.lt.s32.totalorder %v3490_v17, 79 }
 0x233   : > { %v2156_v15 = vmul.f32 %v2155_v44, %v2148_v51  ;;  %v2157_v21 = vmul.f32 %v2155_v44, %v2149_v16  ;;  %v2132_v38 = vrot.slane %v2125_v18, %v3244_v7  ;;  %v2422_v18 = vstv %s5174_s22  ;;  %p2927_p8 = pnand %p2926_p5, %p2920_p3 }
 0x234   : > { %v5077_v12 = vpop.permute.xlu1 %2183 }
 0x235   : > { %v5079_v29 = vpop.permute.xlu0 %2181  ;;  %v2158_v9 = vadd.f32 %v2156_v15, %v2152_v20  ;;  %v2159_v55 = vadd.f32 %v2157_v21, %v2153_v31  ;;  %v2418_v31 = vstv %s5172_s0 }
 0x236   : > { %v2186_v63 = vsel %vm2185_vm7, %v5079_v29, %v5077_v12 }
 0x237   : > { %v2162_v2 = vcombine.low %v2158_v9, %v2159_v55  ;;  %v2196_v49 = vmul.f32 %v2195_v54, %v2186_v63 }
 0x238   : > { %v5081_v28 = vpop.permute.xlu1 %2190 }
 0x239   : > { %v5083_v47 = vpop.permute.xlu0 %2188 }
 0x23a   : > { %v2192_v33 = vsel %vm2185_vm7, %v5083_v47, %v5081_v28  ;;  %v2193_v22 = vsel %vm2185_vm7, %v5081_v28, %v5083_v47  ;;  %v2187_v28 = vsel %vm2185_vm7, %v5077_v12, %v5079_v29  ;;  %v2330_v47 = vstv %s5122_s28 }
 0x23b   : > { %v2197_v27 = vmul.f32 %v2195_v54, %v2187_v28 }
 0x23c   : > { %v5085_v61 = vpop.permute.xlu1 %2230 }
 0x23d   : > { %v5087_v42 = vpop.permute.xlu0 %2228 }
 0x23e   : > { %v2233_v1 = vsel %vm2232_vm11, %v5087_v42, %v5085_v61  ;;  %v2234_v12 = vsel %vm2232_vm11, %v5085_v61, %v5087_v42 }
 0x23f   : > { %v2243_v52 = vmul.f32 %v2242_v36, %v2233_v1  ;;  %v2244_v19 = vmul.f32 %v2242_v36, %v2234_v12  ;;  %v2134_v36 = vsel %vm2092_vm4, %v2132_v38, 0.0  ;;  %vm2180_vm4 = vmand %vm5011_vm10, %vm4140_vm12 }
 0x240   : > { %v5089_v4 = vpop.permute.xlu1 %2237 }
 0x241   : > { %v5091_v14 = vpop.permute.xlu0 %2235 }
 0x242   : > { %v2239_v32 = vsel %vm2232_vm11, %v5091_v14, %v5089_v4  ;;  %v2240_v26 = vsel %vm2232_vm11, %v5089_v4, %v5091_v14  ;;  %v2200_v4 = vmul.f32 %v2199_v25, %v2192_v33  ;;  %v2201_v14 = vmul.f32 %v2199_v25, %v2193_v22  ;;  %v2876_v33 = vld [vmem:[%s5399_s1] sm:$0x3] }
 0x243   : > { %v2247_v45 = vmul.f32 %v2246_v35, %v2239_v32  ;;  %v2248_v50 = vmul.f32 %v2246_v35, %v2240_v26  ;;  %v5214_v35 = vrot.slane %v2162_v2, %v3244_v7  ;;  %vm2224_vm7 = vcmp.ge.s32.totalorder %v2876_v33, 4294967293 }
 0x244   : > { %v5096_v8 = vpop.permute.xlu1 %2274  ;;  %v2202_v51 = vadd.f32 %v2200_v4, %v2196_v49  ;;  %v2203_v16 = vadd.f32 %v2201_v14, %v2197_v27  ;;  %vm2225_vm11 = vcmp.lt.s32.totalorder %v2876_v33, 13 }
 0x245   : > { %v5100_v48 = vpop.permute.xlu0 %2272  ;;  %v2249_v43 = vadd.f32 %v2247_v45, %v2243_v52  ;;  %v2250_v34 = vadd.f32 %v2248_v50, %v2244_v19 }
 0x246   : > { %v2206_v32 = vcombine.low %v2202_v51, %v2203_v16 }
 0x247   : > { %v2253_v26 = vcombine.low %v2249_v43, %v2250_v34 }
 0x248   : > { %v5110_v13 = vpop.permute.xlu1 %2281 }
 0x249   : > { %v5116_v23 = vpop.permute.xlu0 %2279 }
 0x24a   : > { %v2283_v44 = vsel %vm2276_vm2, %v5116_v23, %v5110_v13  ;;  %v2284_v61 = vsel %vm2276_vm2, %v5110_v13, %v5116_v23  ;;  %v2277_v13 = vsel %vm2276_vm2, %v5100_v48, %v5096_v8  ;;  %v2278_v23 = vsel %vm2276_vm2, %v5096_v8, %v5100_v48 }
 0x24b   : > { %v2291_v15 = vmul.f32 %v2290_v41, %v2283_v44  ;;  %v2292_v21 = vmul.f32 %v2290_v41, %v2284_v61  ;;  %v2287_v8 = vmul.f32 %v2286_v10, %v2277_v13  ;;  %v2288_v48 = vmul.f32 %v2286_v10, %v2278_v23 }
 0x24c   : > { %v5120_v0 = vpop.permute.xlu1 %2318  ;;  %vm2452_vm2 = vcmp.lt.s32.totalorder %v3490_v17, 78  ;;  %v2176_v44 = vrot.slane %v5214_v35, %v3244_v7  ;;  %v2213_v61 = vrot.slane %v2206_v32, %v3244_v7 }
 0x24d   : > { %v5127_v56 = vpop.permute.xlu0 %2316  ;;  %v2293_v63 = vadd.f32 %v2291_v15, %v2287_v8  ;;  %v2294_v28 = vadd.f32 %v2292_v21, %v2288_v48  ;;  %v2462_v21 = vstv %s5234_s6 }
 0x24e   : > { %v2322_v41 = vsel %vm2320_vm8, %v5120_v0, %v5127_v56  ;;  %v2220_v35 = vrot.slane %v2213_v61, %v3244_v7 }
 0x250   : > { %v2326_v37 = vpop.permute.xlu1 %2325 }
 0x251   : > { %v2324_v30 = vpop.permute.xlu0 %2323 }
 0x252   : > { %v2327_v54 = vsel %vm2320_vm8, %v2324_v30, %v2326_v37  ;;  %v2328_v25 = vsel %vm2320_vm8, %v2326_v37, %v2324_v30  ;;  %v2321_v37 = vsel %vm2320_vm8, %v5127_v56, %v5120_v0  ;;  %v2332_v56 = vmul.f32 %v2330_v47, %v2322_v41  ;;  %vm2136_vm8 = vmand %vm5011_vm10, %vm4025_vm6 }
 0x253   : > { %v2335_v22 = vmul.f32 %v2334_v3, %v2327_v54  ;;  %v2336_v9 = vmul.f32 %v2334_v3, %v2328_v25  ;;  %v2331_v0 = vmul.f32 %v2330_v47, %v2321_v37  ;;  %v2466_v54 = vstv %s5236_s12 }
 0x254   : > { %v5170_v46 = vpop.permute.xlu1 %2362  ;;  %v2135_v25 = vadd.f32 %v2134_v36, %v5075_v5  ;;  %v2178_v5 = vsel %vm2136_vm8, %v2176_v44, 0.0 }
 0x255   : > { %v2361_v29 = vpop.permute.xlu0 %2360  ;;  %v2337_v2 = vadd.f32 %v2335_v22, %v2331_v0  ;;  %v2338_v47 = vadd.f32 %v2336_v9, %v2332_v56 }
 0x256   : > { %v2365_v3 = vsel %vm2364_vm1, %v2361_v29, %v5170_v46  ;;  %v2366_v4 = vsel %vm2364_vm1, %v5170_v46, %v2361_v29 }
 0x257   : > { %v2375_v46 = vmul.f32 %v2374_v11, %v2365_v3  ;;  %v2376_v29 = vmul.f32 %v2374_v11, %v2366_v4  ;;  %v2341_v11 = vcombine.low %v2337_v2, %v2338_v47 }
 0x258   : > { %v2370_v42 = vpop.permute.xlu1 %2369 }
 0x259   : > { %v2368_v53 = vpop.permute.xlu0 %2367  ;;  %v2348_v41 = vrot.slane %v2341_v11, %v3244_v7 }
 0x25a   : > { %v2371_v55 = vsel %vm2364_vm1, %v2368_v53, %v2370_v42  ;;  %v2372_v10 = vsel %vm2364_vm1, %v2370_v42, %v2368_v53  ;;  %v2297_v53 = vcombine.low %v2293_v63, %v2294_v28  ;;  %vm5270_vm1 = vmand %vm2224_vm7, %vm2225_vm11  ;;  %v2222_v63 = vsel %vm2180_vm4, %v2220_v35, 0.0 }
 0x25b   : > { %v2379_v1 = vmul.f32 %v2378_v58, %v2371_v55  ;;  %v2380_v12 = vmul.f32 %v2378_v58, %v2372_v10  ;;  %v2260_v58 = vrot.slane %v2253_v26, %v3244_v7  ;;  %vm2227_vm10 = vmand %vm5270_vm1, %vm3783_vm5  ;;  %v2179_v26 = vadd.f32 %v2178_v5, %v2135_v25 }
 0x25c   : > { %v2407_v20 = vpop.permute.xlu1 %2406  ;;  %v2304_v33 = vrot.slane %v2297_v53, %v3244_v7  ;;  %vm2271_vm5 = vmand %vm5270_vm1, %vm3809_vm9 }
 0x25d   : > { %v2405_v30 = vpop.permute.xlu0 %2404  ;;  %v2381_v43 = vadd.f32 %v2379_v1, %v2375_v46  ;;  %v2382_v34 = vadd.f32 %v2380_v12, %v2376_v29  ;;  %v2267_v36 = vrot.slane %v2260_v58, %v3244_v7  ;;  %v2355_v1 = vrot.slane %v2348_v41, %v3244_v7  ;;  %vm2315_vm7 = vmand %vm5270_vm1, %vm3871_vm14 }
 0x25e   : > { %v2409_v45 = vsel %vm2408_vm13, %v2405_v30, %v2407_v20  ;;  %v2410_v50 = vsel %vm2408_vm13, %v2407_v20, %v2405_v30  ;;  %v2311_v0 = vrot.slane %v2304_v33, %v3244_v7  ;;  %vm2359_vm9 = vmand %vm5270_vm1, %vm3916_vm15 }
 0x25f   : > { %v2419_v42 = vmul.f32 %v2418_v31, %v2409_v45  ;;  %v2420_v51 = vmul.f32 %v2418_v31, %v2410_v50  ;;  %v2385_v48 = vcombine.low %v2381_v43, %v2382_v34  ;;  %v2223_v45 = vadd.f32 %v2222_v63, %v2179_v26  ;;  %vm2403_vm14 = vmand %vm5270_vm1, %vm3946_vm3 }
 0x260   : > { %v2414_v14 = vpop.permute.xlu1 %2413  ;;  %v2313_v46 = vsel %vm2271_vm5, %v2311_v0, 0.0  ;;  %vm2447_vm15 = vmand %vm5270_vm1, %vm4025_vm6 }
 0x261   : > { %v2412_v38 = vpop.permute.xlu0 %2411  ;;  %v2392_v56 = vrot.slane %v2385_v48, %v3244_v7  ;;  %vm2491_vm3 = vmand %vm5270_vm1, %vm4140_vm12 }
 0x262   : > { %v2415_v49 = vsel %vm2408_vm13, %v2412_v38, %v2414_v14  ;;  %v2416_v27 = vsel %vm2408_vm13, %v2414_v14, %v2412_v38  ;;  %vm2496_vm13 = vcmp.lt.s32.totalorder %v3490_v17, 77  ;;  %v2269_v14 = vsel %vm2227_vm10, %v2267_v36, 0.0 }
 0x263   : > { %v2423_v52 = vmul.f32 %v2422_v18, %v2415_v49  ;;  %v2424_v19 = vmul.f32 %v2422_v18, %v2416_v27  ;;  %v2506_v38 = vstv %s5278_s7  ;;  %v2510_v49 = vstv %s5280_s26 }
 0x264   : > { %v2451_v16 = vpop.permute.xlu1 %2450  ;;  %v2270_v27 = vadd.f32 %v2269_v14, %v2223_v45  ;;  %v2399_v29 = vrot.slane %v2392_v56, %v3244_v7 }
 0x265   : > { %v2449_v13 = vpop.permute.xlu0 %2448  ;;  %v2425_v23 = vadd.f32 %v2423_v52, %v2419_v42  ;;  %v2426_v15 = vadd.f32 %v2424_v19, %v2420_v51  ;;  %v2357_v19 = vsel %vm2315_vm7, %v2355_v1, 0.0 }
 0x266   : > { %v2453_v31 = vsel %vm2452_vm2, %v2449_v13, %v2451_v16  ;;  %v2454_v18 = vsel %vm2452_vm2, %v2451_v16, %v2449_v13  ;;  %v2314_v43 = vadd.f32 %v2313_v46, %v2270_v27  ;;  %v2401_v6 = vsel %vm2359_vm9, %v2399_v29, 0.0 }
 0x267   : > { %v2429_v30 = vcombine.low %v2425_v23, %v2426_v15  ;;  %v2463_v59 = vmul.f32 %v2462_v21, %v2453_v31  ;;  %v2464_v55 = vmul.f32 %v2462_v21, %v2454_v18 }
 0x268   : > { %v2458_v8 = vpop.permute.xlu1 %2457  ;;  %v2358_v23 = vadd.f32 %v2357_v19, %v2314_v43 }
 0x269   : > { %v2456_v37 = vpop.permute.xlu0 %2455  ;;  %v2436_v12 = vrot.slane %v2429_v30, %v3244_v7 }
 0x26a   : > { %v2459_v22 = vsel %vm2452_vm2, %v2456_v37, %v2458_v8  ;;  %v2460_v9 = vsel %vm2452_vm2, %v2458_v8, %v2456_v37  ;;  %v2402_v21 = vadd.f32 %v2401_v6, %v2358_v23 }
 0x26b   : > { %v2467_v10 = vmul.f32 %v2466_v54, %v2459_v22  ;;  %v2468_v32 = vmul.f32 %v2466_v54, %v2460_v9  ;;  %v2443_v44 = vrot.slane %v2436_v12, %v3244_v7 }
 0x26c   : > { %v2495_v28 = vpop.permute.xlu1 %2494 }
 0x26d   : > { %v2469_v3 = vadd.f32 %v2467_v10, %v2463_v59  ;;  %v2470_v60 = vadd.f32 %v2468_v32, %v2464_v55  ;;  %v2493_v4 = vpop.permute.xlu0 %2492  ;;  %v2445_v17 = vsel %vm2403_vm14, %v2443_v44, 0.0 }
 0x26e   : > { %v2497_v2 = vsel %vm2496_vm13, %v2493_v4, %v2495_v28  ;;  %v2498_v57 = vsel %vm2496_vm13, %v2495_v28, %v2493_v4  ;;  %v2446_v25 = vadd.f32 %v2445_v17, %v2402_v21 }
 0x26f   : > { %v2473_v50 = vcombine.low %v2469_v3, %v2470_v60  ;;  %v2507_v51 = vmul.f32 %v2506_v38, %v2497_v2  ;;  %v2508_v16 = vmul.f32 %v2506_v38, %v2498_v57 }
 0x270   : > { %v2502_v47 = vpop.permute.xlu1 %2501 }
 0x271   : > { %v2480_v52 = vrot.slane %v2473_v50, %v3244_v7  ;;  %v2500_v62 = vpop.permute.xlu0 %2499 }
 0x272   : > { %v2503_v61 = vsel %vm2496_vm13, %v2500_v62, %v2502_v47  ;;  %v2504_v42 = vsel %vm2496_vm13, %v2502_v47, %v2500_v62 }
 0x273   : > { %v2511_v58 = vmul.f32 %v2510_v49, %v2503_v61  ;;  %v2512_v53 = vmul.f32 %v2510_v49, %v2504_v42  ;;  %v2487_v34 = vrot.slane %v2480_v52, %v3244_v7 }
 0x275   : > { %v2513_v13 = vadd.f32 %v2511_v58, %v2507_v51  ;;  %v2514_v11 = vadd.f32 %v2512_v53, %v2508_v16  ;;  %v2489_v40 = vsel %vm2447_vm15, %v2487_v34, 0.0 }
 0x276   : > { %v2490_v24 = vadd.f32 %v2489_v40, %v2446_v25 }
 0x277   : > { %v2517_v15 = vcombine.low %v2513_v13, %v2514_v11 }
 0x279   : > { %v2524_v54 = vrot.slane %v2517_v15, %v3244_v7 }
 0x27b   : > { %v2531_v35 = vrot.slane %v2524_v54, %v3244_v7 }
 0x27d   : > { %v2533_v31 = vsel %vm2491_vm3, %v2531_v35, 0.0 }
 0x27e   : > { %v2534_v18 = vadd.f32 %v2533_v31, %v2490_v24 }
 0x280   : > { %v2746_v8 = vmul.f32 -1.442695, %v2534_v18 }
 0x282   : > { %2870 = vpow2.f32 %v2746_v8 }
 0x28c   : > { %v2871_v5 = vpop.eup %2870 }
 0x28d   : > { %v2538_v36 = vadd.f32 1.0, %v2871_v5 }
 0x28f   : > { %2872 = vrcp.f32 %v2538_v36 }
 0x299   : > { %v2873_v7 = vpop.eup %2872 }
 0x29a   : > { %2541 = vst.msk [vmem:[%s210_s13] sm:$0x3] %vm3219_vm0, %v2873_v7 }
 0x29b   : > { %2930 = shalt.err (!%p2927_p8)
}
 0x29c   : > { %s2931_s24 = scalar_lea.hbm %s5347_s14, 32  ;;  %s2935_s11 = scalar_lea.hbm %s5569_s9, 64 }
 0x29d   : > { %p2932_p7 = scmp.ne.s32.totalorder %s5347_s14, %s2931_s24  ;;  %p2936_p1 = scmp.lt.u32.totalorder %s5347_s14, %s5569_s9 }
 0x29e   : > { %p2937_p4 = scmp.lt.u32.totalorder %s2935_s11, %s2931_s24  ;;  %p2939_p11 = scmp.lt.u32.totalorder %s2931_s24, %s5347_s14 }
 0x29f   : > { %p2933_p10 = pnand %p2932_p7, %p5571_p12 }
 0x2a0   : > { %p2938_p6 = por %p2937_p4, %p2936_p1 }
 0x2a1   : > { %p2934_p13 = pneg %p2933_p10 }
 0x2a2   : > { %p2940_p0 = por %p2939_p11, %p2938_p6 }
 0x2a4   : > { %p2941_p3 = pnand %p2940_p0, %p2934_p13 }
 0x2a6   : > { %2944 = shalt.err (!%p2941_p3)
}
 0x2a7   : > { %2756 = dma.vmem_to_hbm [thread:$0]  (%p5571_p12), %s5349_s19, 32, %s5347_s14, %s2543_s17  }
 0x2a8 PF: > { %s5572_s0 = sld [smem:[#allocation13_spill]]  ;;  %s5573_s22 = sld [smem:[#allocation22_spill]] }
 0x2a9   : > { %s5574_s5 = sld [smem:[#allocation18_spill]] }
 0x2ae   : > { %s2569_s3 = sand.u32 1, %s5572_s0   ;;  %p5575_p9 = scmp.ne.s32.totalorder %s5573_s22, 0 }
 0x2af   : > { %p5576_p2 = scmp.ge.s32.totalorder %s5574_s5, 2  ;;  %s2570_s6 = scalar_lea.sflag [#allocation8], %s2569_s3 }
 0x2b1   : > { %p2763_p5 = pnand %p5576_p2, %p5575_p9 }
 0x2b3   : > { %2976 = dma.done.wait (!%p2763_p5), %s2570_s6, 32  }
 0x2b4   : > { %2978 = vsyncadd (!%p2763_p5), %s2570_s6, 4294967264  ;;  %s24_s30 = sadd.s32 1, %s5574_s5   ;;  %s5577_s25 = sld [smem:[#allocation14_spill]] }
 0x2b5   : > { %p21_p8 = scmp.ge.s32.totalorder %s24_s30, 4   ;;  %s5578_s26 = sld [smem:[#allocation15_spill]] }
 0x2b6   : > { %s5579_s27 = sld [smem:[#allocation21_spill]]  ;;  %s5580_s28 = sld [smem:[#allocation17_spill]] }
 0x2b7   : > { %s5581_s29 = sld [smem:[#allocation19_spill]]  ;;  %23 = sbr.rel (!%p21_p8) target bundleno = 19 (0x13), region = 85 }
 0x2be   :  { %2575 = vsyncpa [#allocation7], 1 }
 0x2bf   :  { %2577 = vsyncpa [#allocation7 + $0x1], 1 }
 0x2c0   :  { %2578 = vsyncpa [#allocation8], 1 }
 0x2c1   :  { %2580 = vsyncpa [#allocation8 + $0x1], 1 }

</bundles_post_ra>
